<compile_context>
chip_gen: v5e
topology: v5e:2x2
jax: 0.10.0
libtpu: 0.0.40
codegen_flags: <defaults>
</compile_context>

<pallas_src>
import math

import jax
import jax.numpy as jnp
from jax.experimental import pallas as pl
from jax.experimental.pallas import tpu as pltpu


def build_lstm_kernel(num_layers, B, T, D, H):
    """Fused multi-layer LSTM kernel: whole sequence, all layers, one call."""

    def kernel(*refs):
        # refs = (x_ref, [wih_T, whh_T, bias] * num_layers, out_ref, seq_scratch)
        x_ref = refs[0]
        w_refs = refs[1:1 + 3 * num_layers]
        out_ref = refs[1 + 3 * num_layers]
        seq_ref = refs[2 + 3 * num_layers]  # VMEM scratch (B, T, H) f32

        for layer in range(num_layers):
            wih = w_refs[3 * layer][...]       # (Din, 4H)  == W_ih^T
            whh = w_refs[3 * layer + 1][...]   # (H,   4H)  == W_hh^T
            bias = w_refs[3 * layer + 2][...]  # (1,   4H)  == b_ih + b_hh

            if layer == 0:
                inp = x_ref[...].astype(jnp.float32)   # (B, T, D)
                d_in = D
            else:
                inp = seq_ref[...]                     # (B, T, H)
                d_in = H

            # Hoisted input projection: one GEMM over the whole sequence instead of
            # T tiny matmuls on the serial path.  Row order is b*T + t.
            gx = jnp.dot(inp.reshape(B * T, d_in), wih,
                         preferred_element_type=jnp.float32) + bias   # (B*T, 4H)
            gx = gx.reshape(B, T, 4 * H)

            h = jnp.zeros((B, H), jnp.float32)
            c = jnp.zeros((B, H), jnp.float32)
            is_last = layer == num_layers - 1

            # Fully unrolled recurrence (T static); only h @ W_hh^T is sequential.
            for t in range(T):
                gates = gx[:, t, :] + jnp.dot(
                    h, whh, preferred_element_type=jnp.float32)       # (B, 4H)
                # PyTorch gate order: input, forget, cell(g), output
                i_g = jax.nn.sigmoid(gates[:, 0 * H:1 * H])
                f_g = jax.nn.sigmoid(gates[:, 1 * H:2 * H])
                g_g = jnp.tanh(gates[:, 2 * H:3 * H])
                o_g = jax.nn.sigmoid(gates[:, 3 * H:4 * H])
                c = f_g * c + i_g * g_g
                h = o_g * jnp.tanh(c)
                if is_last:
                    out_ref[:, t, :] = h.astype(out_ref.dtype)
                else:
                    seq_ref[:, t, :] = h

    return kernel


def lstm_embedding_forward(x_btd, params):
    """Equivalent of LSTMEmbedding.forward: x (B, T, D) -> out (B, T, H)."""
    B, T, D = x_btd.shape
    num_layers = len(params)
    H = params[0][1].shape[1]  # w_hh: (4H, H)

    # Pre-transpose weights once (W^T layouts -> plain row-major GEMMs in the kernel)
    # and fuse the two bias vectors.
    flat_weights = []
    for (w_ih, w_hh, b_ih, b_hh) in params:
        flat_weights.append(jnp.asarray(w_ih, jnp.float32).T)                 # (Din, 4H)
        flat_weights.append(jnp.asarray(w_hh, jnp.float32).T)                 # (H, 4H)
        flat_weights.append(
            (jnp.asarray(b_ih, jnp.float32)
             + jnp.asarray(b_hh, jnp.float32)).reshape(1, 4 * H))             # (1, 4H)

    kernel = build_lstm_kernel(num_layers, B, T, D, H)
    n_in = 1 + 3 * num_layers
    return pl.pallas_call(
        kernel,
        out_shape=jax.ShapeDtypeStruct((B, T, H), x_btd.dtype),
        in_specs=[pl.BlockSpec(memory_space=pltpu.MemorySpace.VMEM)] * n_in,
        out_specs=pl.BlockSpec(memory_space=pltpu.MemorySpace.VMEM),
        scratch_shapes=[pltpu.VMEM((B, T, H), jnp.float32)],
    )(x_btd, *flat_weights)


def init_lstm_params(key, input_size, hidden_size, num_layers):
    """Deterministic init matching PyTorch nn.LSTM parameter shapes/scale."""
    k = 1.0 / math.sqrt(hidden_size)
    params = []
    for layer in range(num_layers):
        in_sz = input_size if layer == 0 else hidden_size
        key, k1, k2, k3, k4 = jax.random.split(key, 5)
        w_ih = jax.random.uniform(k1, (4 * hidden_size, in_sz), jnp.float32, -k, k)
        w_hh = jax.random.uniform(k2, (4 * hidden_size, hidden_size), jnp.float32, -k, k)
        b_ih = jax.random.uniform(k3, (4 * hidden_size,), jnp.float32, -k, k)
        b_hh = jax.random.uniform(k4, (4 * hidden_size,), jnp.float32, -k, k)
        params.append((w_ih, w_hh, b_ih, b_hh))
    return params


def lstm_embedding_ref(x_btd, params):
    """Pure-JAX reference (scan over time) for correctness check."""
    B = x_btd.shape[0]
    h_seq = x_btd
    for (w_ih, w_hh, b_ih, b_hh) in params:
        H = w_hh.shape[1]
        bias = b_ih + b_hh

        def step(carry, x_t):
            h_prev, c_prev = carry
            gates = x_t @ w_ih.T + h_prev @ w_hh.T + bias
            i_g = jax.nn.sigmoid(gates[:, 0 * H:1 * H])
            f_g = jax.nn.sigmoid(gates[:, 1 * H:2 * H])
            g_g = jnp.tanh(gates[:, 2 * H:3 * H])
            o_g = jax.nn.sigmoid(gates[:, 3 * H:4 * H])
            c = f_g * c_prev + i_g * g_g
            h = o_g * jnp.tanh(c)
            return (h, c), h

        init = (jnp.zeros((B, H), jnp.float32), jnp.zeros((B, H), jnp.float32))
        _, out_tbd = jax.lax.scan(step, init, jnp.transpose(h_seq, (1, 0, 2)))
        h_seq = jnp.transpose(out_tbd, (1, 0, 2))
    return h_seq


if __name__ == "__main__":
    # Small shapes consistent with the module: batch=2, seq=8, input=16, hidden=32, layers=2
    B, T, INPUT, HIDDEN, LAYERS = 2, 8, 16, 32, 2

    key = jax.random.PRNGKey(0)
    kx, kp = jax.random.split(key)
    x = jax.random.normal(kx, (B, T, INPUT), dtype=jnp.float32)
    params = init_lstm_params(kp, INPUT, HIDDEN, LAYERS)

    out = lstm_embedding_forward(x, params)
    out = jax.block_until_ready(out)

    ref = lstm_embedding_ref(x, params)
    assert out.shape == (B, T, HIDDEN)
    assert jnp.allclose(out, ref, atol=1e-5, rtol=1e-5)

    print("KERNEL_OK")
</pallas_src>

<mosaic_0001>
module attributes {stable_mosaic.version = 11 : i64} {
  func.func @kernel(%arg0: memref<2x8x16xf32, #tpu.memory_space<vmem>>, %arg1: memref<16x128xf32, #tpu.memory_space<vmem>>, %arg2: memref<32x128xf32, #tpu.memory_space<vmem>>, %arg3: memref<1x128xf32, #tpu.memory_space<vmem>>, %arg4: memref<32x128xf32, #tpu.memory_space<vmem>>, %arg5: memref<32x128xf32, #tpu.memory_space<vmem>>, %arg6: memref<1x128xf32, #tpu.memory_space<vmem>>, %arg7: memref<2x8x32xf32, #tpu.memory_space<vmem>>, %arg8: memref<2x8x32xf32, #tpu.memory_space<vmem>>) attributes {dimension_semantics = [], scalar_prefetch = 0 : i64, scratch_operands = 1 : i64, tpu.core_type = #tpu.core_type<tc>} {
    %c0 = arith.constant 0 : index
    %c0_0 = arith.constant 0 : index
    %0 = vector.load %arg1[%c0, %c0_0] : memref<16x128xf32, #tpu.memory_space<vmem>>, vector<16x128xf32>
    %c0_1 = arith.constant 0 : index
    %c0_2 = arith.constant 0 : index
    %1 = vector.load %arg2[%c0_1, %c0_2] : memref<32x128xf32, #tpu.memory_space<vmem>>, vector<32x128xf32>
    %c0_3 = arith.constant 0 : index
    %c0_4 = arith.constant 0 : index
    %2 = vector.load %arg3[%c0_3, %c0_4] : memref<1x128xf32, #tpu.memory_space<vmem>>, vector<1x128xf32>
    %c0_5 = arith.constant 0 : index
    %c0_6 = arith.constant 0 : index
    %c0_7 = arith.constant 0 : index
    %3 = vector.load %arg0[%c0_5, %c0_6, %c0_7] : memref<2x8x16xf32, #tpu.memory_space<vmem>>, vector<2x8x16xf32>
    %4 = vector.shape_cast %3 : vector<2x8x16xf32> to vector<16x16xf32>
    %cst = arith.constant dense<0.000000e+00> : vector<16x128xf32>
    %5 = tpu.matmul %4, %0, %cst {dimension_numbers = #tpu.dot_dimension_numbers<[1], [0], [0], [1], [0, 0, 1, 1], [], []>} : vector<16x16xf32>, vector<16x128xf32>, vector<16x128xf32> -> vector<16x128xf32>
    %6 = vector.broadcast %2 : vector<1x128xf32> to vector<16x128xf32>
    %7 = arith.addf %5, %6 : vector<16x128xf32>
    %8 = vector.shape_cast %7 : vector<16x128xf32> to vector<2x8x128xf32>
    %cst_8 = arith.constant 0.000000e+00 : f32
    %9 = vector.broadcast %cst_8 : f32 to vector<2x32xf32>
    %cst_9 = arith.constant 0.000000e+00 : f32
    %10 = vector.broadcast %cst_9 : f32 to vector<2x32xf32>
    %11 = vector.extract_strided_slice %8 {offsets = [0, 0, 0], sizes = [2, 1, 128], strides = [1, 1, 1]} : vector<2x8x128xf32> to vector<2x1x128xf32>
    %12 = vector.shape_cast %11 : vector<2x1x128xf32> to vector<2x128xf32>
    %cst_10 = arith.constant dense<0.000000e+00> : vector<2x128xf32>
    %13 = tpu.matmul %9, %1, %cst_10 {dimension_numbers = #tpu.dot_dimension_numbers<[1], [0], [0], [1], [0, 0, 1, 1], [], []>} : vector<2x32xf32>, vector<32x128xf32>, vector<2x128xf32> -> vector<2x128xf32>
    %14 = arith.addf %12, %13 : vector<2x128xf32>
    %15 = vector.extract_strided_slice %14 {offsets = [0, 0], sizes = [2, 32], strides = [1, 1]} : vector<2x128xf32> to vector<2x32xf32>
    %16 = arith.negf %15 : vector<2x32xf32>
    %17 = math.exp %16 : vector<2x32xf32>
    %cst_11 = arith.constant 1.000000e+00 : f32
    %18 = vector.broadcast %cst_11 : f32 to vector<2x32xf32>
    %19 = arith.addf %18, %17 : vector<2x32xf32>
    %20 = arith.divf %18, %19 : vector<2x32xf32>
    %21 = vector.extract_strided_slice %14 {offsets = [0, 32], sizes = [2, 32], strides = [1, 1]} : vector<2x128xf32> to vector<2x32xf32>
    %22 = arith.negf %21 : vector<2x32xf32>
    %23 = math.exp %22 : vector<2x32xf32>
    %cst_12 = arith.constant 1.000000e+00 : f32
    %24 = vector.broadcast %cst_12 : f32 to vector<2x32xf32>
    %25 = arith.addf %24, %23 : vector<2x32xf32>
    %26 = arith.divf %24, %25 : vector<2x32xf32>
    %27 = vector.extract_strided_slice %14 {offsets = [0, 64], sizes = [2, 32], strides = [1, 1]} : vector<2x128xf32> to vector<2x32xf32>
    %28 = math.tanh %27 : vector<2x32xf32>
    %29 = vector.extract_strided_slice %14 {offsets = [0, 96], sizes = [2, 32], strides = [1, 1]} : vector<2x128xf32> to vector<2x32xf32>
    %30 = arith.negf %29 : vector<2x32xf32>
    %31 = math.exp %30 : vector<2x32xf32>
    %cst_13 = arith.constant 1.000000e+00 : f32
    %32 = vector.broadcast %cst_13 : f32 to vector<2x32xf32>
    %33 = arith.addf %32, %31 : vector<2x32xf32>
    %34 = arith.divf %32, %33 : vector<2x32xf32>
    %35 = arith.mulf %26, %10 : vector<2x32xf32>
    %36 = arith.mulf %20, %28 : vector<2x32xf32>
    %37 = arith.addf %35, %36 : vector<2x32xf32>
    %38 = math.tanh %37 : vector<2x32xf32>
    %39 = arith.mulf %34, %38 : vector<2x32xf32>
    %c0_14 = arith.constant 0 : index
    %c0_15 = arith.constant 0 : index
    %c0_16 = arith.constant 0 : index
    %40 = vector.load %arg8[%c0_14, %c0_15, %c0_16] : memref<2x8x32xf32, #tpu.memory_space<vmem>>, vector<2x1x32xf32>
    %41 = vector.shape_cast %40 : vector<2x1x32xf32> to vector<2x32xf32>
    %42 = vector.shape_cast %39 : vector<2x32xf32> to vector<2x1x32xf32>
    tpu.vector_store %arg8[%c0_14, %c0_15, %c0_16], %42 {strides = array<i32>} : memref<2x8x32xf32, #tpu.memory_space<vmem>>, vector<2x1x32xf32>,
    %43 = vector.extract_strided_slice %8 {offsets = [0, 1, 0], sizes = [2, 1, 128], strides = [1, 1, 1]} : vector<2x8x128xf32> to vector<2x1x128xf32>
    %44 = vector.shape_cast %43 : vector<2x1x128xf32> to vector<2x128xf32>
    %cst_17 = arith.constant dense<0.000000e+00> : vector<2x128xf32>
    %45 = tpu.matmul %39, %1, %cst_17 {dimension_numbers = #tpu.dot_dimension_numbers<[1], [0], [0], [1], [0, 0, 1, 1], [], []>} : vector<2x32xf32>, vector<32x128xf32>, vector<2x128xf32> -> vector<2x128xf32>
    %46 = arith.addf %44, %45 : vector<2x128xf32>
    %47 = vector.extract_strided_slice %46 {offsets = [0, 0], sizes = [2, 32], strides = [1, 1]} : vector<2x128xf32> to vector<2x32xf32>
    %48 = arith.negf %47 : vector<2x32xf32>
    %49 = math.exp %48 : vector<2x32xf32>
    %cst_18 = arith.constant 1.000000e+00 : f32
    %50 = vector.broadcast %cst_18 : f32 to vector<2x32xf32>
    %51 = arith.addf %50, %49 : vector<2x32xf32>
    %52 = arith.divf %50, %51 : vector<2x32xf32>
    %53 = vector.extract_strided_slice %46 {offsets = [0, 32], sizes = [2, 32], strides = [1, 1]} : vector<2x128xf32> to vector<2x32xf32>
    %54 = arith.negf %53 : vector<2x32xf32>
    %55 = math.exp %54 : vector<2x32xf32>
    %cst_19 = arith.constant 1.000000e+00 : f32
    %56 = vector.broadcast %cst_19 : f32 to vector<2x32xf32>
    %57 = arith.addf %56, %55 : vector<2x32xf32>
    %58 = arith.divf %56, %57 : vector<2x32xf32>
    %59 = vector.extract_strided_slice %46 {offsets = [0, 64], sizes = [2, 32], strides = [1, 1]} : vector<2x128xf32> to vector<2x32xf32>
    %60 = math.tanh %59 : vector<2x32xf32>
    %61 = vector.extract_strided_slice %46 {offsets = [0, 96], sizes = [2, 32], strides = [1, 1]} : vector<2x128xf32> to vector<2x32xf32>
    %62 = arith.negf %61 : vector<2x32xf32>
    %63 = math.exp %62 : vector<2x32xf32>
    %cst_20 = arith.constant 1.000000e+00 : f32
    %64 = vector.broadcast %cst_20 : f32 to vector<2x32xf32>
    %65 = arith.addf %64, %63 : vector<2x32xf32>
    %66 = arith.divf %64, %65 : vector<2x32xf32>
    %67 = arith.mulf %58, %37 : vector<2x32xf32>
    %68 = arith.mulf %52, %60 : vector<2x32xf32>
    %69 = arith.addf %67, %68 : vector<2x32xf32>
    %70 = math.tanh %69 : vector<2x32xf32>
    %71 = arith.mulf %66, %70 : vector<2x32xf32>
    %c0_21 = arith.constant 0 : index
    %c1 = arith.constant 1 : index
    %c0_22 = arith.constant 0 : index
    %72 = vector.load %arg8[%c0_21, %c1, %c0_22] : memref<2x8x32xf32, #tpu.memory_space<vmem>>, vector<2x1x32xf32>
    %73 = vector.shape_cast %72 : vector<2x1x32xf32> to vector<2x32xf32>
    %74 = vector.shape_cast %71 : vector<2x32xf32> to vector<2x1x32xf32>
    tpu.vector_store %arg8[%c0_21, %c1, %c0_22], %74 {strides = array<i32>} : memref<2x8x32xf32, #tpu.memory_space<vmem>>, vector<2x1x32xf32>,
    %75 = vector.extract_strided_slice %8 {offsets = [0, 2, 0], sizes = [2, 1, 128], strides = [1, 1, 1]} : vector<2x8x128xf32> to vector<2x1x128xf32>
    %76 = vector.shape_cast %75 : vector<2x1x128xf32> to vector<2x128xf32>
    %cst_23 = arith.constant dense<0.000000e+00> : vector<2x128xf32>
    %77 = tpu.matmul %71, %1, %cst_23 {dimension_numbers = #tpu.dot_dimension_numbers<[1], [0], [0], [1], [0, 0, 1, 1], [], []>} : vector<2x32xf32>, vector<32x128xf32>, vector<2x128xf32> -> vector<2x128xf32>
    %78 = arith.addf %76, %77 : vector<2x128xf32>
    %79 = vector.extract_strided_slice %78 {offsets = [0, 0], sizes = [2, 32], strides = [1, 1]} : vector<2x128xf32> to vector<2x32xf32>
    %80 = arith.negf %79 : vector<2x32xf32>
    %81 = math.exp %80 : vector<2x32xf32>
    %cst_24 = arith.constant 1.000000e+00 : f32
    %82 = vector.broadcast %cst_24 : f32 to vector<2x32xf32>
    %83 = arith.addf %82, %81 : vector<2x32xf32>
    %84 = arith.divf %82, %83 : vector<2x32xf32>
    %85 = vector.extract_strided_slice %78 {offsets = [0, 32], sizes = [2, 32], strides = [1, 1]} : vector<2x128xf32> to vector<2x32xf32>
    %86 = arith.negf %85 : vector<2x32xf32>
    %87 = math.exp %86 : vector<2x32xf32>
    %cst_25 = arith.constant 1.000000e+00 : f32
    %88 = vector.broadcast %cst_25 : f32 to vector<2x32xf32>
    %89 = arith.addf %88, %87 : vector<2x32xf32>
    %90 = arith.divf %88, %89 : vector<2x32xf32>
    %91 = vector.extract_strided_slice %78 {offsets = [0, 64], sizes = [2, 32], strides = [1, 1]} : vector<2x128xf32> to vector<2x32xf32>
    %92 = math.tanh %91 : vector<2x32xf32>
    %93 = vector.extract_strided_slice %78 {offsets = [0, 96], sizes = [2, 32], strides = [1, 1]} : vector<2x128xf32> to vector<2x32xf32>
    %94 = arith.negf %93 : vector<2x32xf32>
    %95 = math.exp %94 : vector<2x32xf32>
    %cst_26 = arith.constant 1.000000e+00 : f32
    %96 = vector.broadcast %cst_26 : f32 to vector<2x32xf32>
    %97 = arith.addf %96, %95 : vector<2x32xf32>
    %98 = arith.divf %96, %97 : vector<2x32xf32>
    %99 = arith.mulf %90, %69 : vector<2x32xf32>
    %100 = arith.mulf %84, %92 : vector<2x32xf32>
    %101 = arith.addf %99, %100 : vector<2x32xf32>
    %102 = math.tanh %101 : vector<2x32xf32>
    %103 = arith.mulf %98, %102 : vector<2x32xf32>
    %c0_27 = arith.constant 0 : index
    %c2 = arith.constant 2 : index
    %c0_28 = arith.constant 0 : index
    %104 = vector.load %arg8[%c0_27, %c2, %c0_28] : memref<2x8x32xf32, #tpu.memory_space<vmem>>, vector<2x1x32xf32>
    %105 = vector.shape_cast %104 : vector<2x1x32xf32> to vector<2x32xf32>
    %106 = vector.shape_cast %103 : vector<2x32xf32> to vector<2x1x32xf32>
    tpu.vector_store %arg8[%c0_27, %c2, %c0_28], %106 {strides = array<i32>} : memref<2x8x32xf32, #tpu.memory_space<vmem>>, vector<2x1x32xf32>,
    %107 = vector.extract_strided_slice %8 {offsets = [0, 3, 0], sizes = [2, 1, 128], strides = [1, 1, 1]} : vector<2x8x128xf32> to vector<2x1x128xf32>
    %108 = vector.shape_cast %107 : vector<2x1x128xf32> to vector<2x128xf32>
    %cst_29 = arith.constant dense<0.000000e+00> : vector<2x128xf32>
    %109 = tpu.matmul %103, %1, %cst_29 {dimension_numbers = #tpu.dot_dimension_numbers<[1], [0], [0], [1], [0, 0, 1, 1], [], []>} : vector<2x32xf32>, vector<32x128xf32>, vector<2x128xf32> -> vector<2x128xf32>
    %110 = arith.addf %108, %109 : vector<2x128xf32>
    %111 = vector.extract_strided_slice %110 {offsets = [0, 0], sizes = [2, 32], strides = [1, 1]} : vector<2x128xf32> to vector<2x32xf32>
    %112 = arith.negf %111 : vector<2x32xf32>
    %113 = math.exp %112 : vector<2x32xf32>
    %cst_30 = arith.constant 1.000000e+00 : f32
    %114 = vector.broadcast %cst_30 : f32 to vector<2x32xf32>
    %115 = arith.addf %114, %113 : vector<2x32xf32>
    %116 = arith.divf %114, %115 : vector<2x32xf32>
    %117 = vector.extract_strided_slice %110 {offsets = [0, 32], sizes = [2, 32], strides = [1, 1]} : vector<2x128xf32> to vector<2x32xf32>
    %118 = arith.negf %117 : vector<2x32xf32>
    %119 = math.exp %118 : vector<2x32xf32>
    %cst_31 = arith.constant 1.000000e+00 : f32
    %120 = vector.broadcast %cst_31 : f32 to vector<2x32xf32>
    %121 = arith.addf %120, %119 : vector<2x32xf32>
    %122 = arith.divf %120, %121 : vector<2x32xf32>
    %123 = vector.extract_strided_slice %110 {offsets = [0, 64], sizes = [2, 32], strides = [1, 1]} : vector<2x128xf32> to vector<2x32xf32>
    %124 = math.tanh %123 : vector<2x32xf32>
    %125 = vector.extract_strided_slice %110 {offsets = [0, 96], sizes = [2, 32], strides = [1, 1]} : vector<2x128xf32> to vector<2x32xf32>
    %126 = arith.negf %125 : vector<2x32xf32>
    %127 = math.exp %126 : vector<2x32xf32>
    %cst_32 = arith.constant 1.000000e+00 : f32
    %128 = vector.broadcast %cst_32 : f32 to vector<2x32xf32>
    %129 = arith.addf %128, %127 : vector<2x32xf32>
    %130 = arith.divf %128, %129 : vector<2x32xf32>
    %131 = arith.mulf %122, %101 : vector<2x32xf32>
    %132 = arith.mulf %116, %124 : vector<2x32xf32>
    %133 = arith.addf %131, %132 : vector<2x32xf32>
    %134 = math.tanh %133 : vector<2x32xf32>
    %135 = arith.mulf %130, %134 : vector<2x32xf32>
    %c0_33 = arith.constant 0 : index
    %c3 = arith.constant 3 : index
    %c0_34 = arith.constant 0 : index
    %136 = vector.load %arg8[%c0_33, %c3, %c0_34] : memref<2x8x32xf32, #tpu.memory_space<vmem>>, vector<2x1x32xf32>
    %137 = vector.shape_cast %136 : vector<2x1x32xf32> to vector<2x32xf32>
    %138 = vector.shape_cast %135 : vector<2x32xf32> to vector<2x1x32xf32>
    tpu.vector_store %arg8[%c0_33, %c3, %c0_34], %138 {strides = array<i32>} : memref<2x8x32xf32, #tpu.memory_space<vmem>>, vector<2x1x32xf32>,
    %139 = vector.extract_strided_slice %8 {offsets = [0, 4, 0], sizes = [2, 1, 128], strides = [1, 1, 1]} : vector<2x8x128xf32> to vector<2x1x128xf32>
    %140 = vector.shape_cast %139 : vector<2x1x128xf32> to vector<2x128xf32>
    %cst_35 = arith.constant dense<0.000000e+00> : vector<2x128xf32>
    %141 = tpu.matmul %135, %1, %cst_35 {dimension_numbers = #tpu.dot_dimension_numbers<[1], [0], [0], [1], [0, 0, 1, 1], [], []>} : vector<2x32xf32>, vector<32x128xf32>, vector<2x128xf32> -> vector<2x128xf32>
    %142 = arith.addf %140, %141 : vector<2x128xf32>
    %143 = vector.extract_strided_slice %142 {offsets = [0, 0], sizes = [2, 32], strides = [1, 1]} : vector<2x128xf32> to vector<2x32xf32>
    %144 = arith.negf %143 : vector<2x32xf32>
    %145 = math.exp %144 : vector<2x32xf32>
    %cst_36 = arith.constant 1.000000e+00 : f32
    %146 = vector.broadcast %cst_36 : f32 to vector<2x32xf32>
    %147 = arith.addf %146, %145 : vector<2x32xf32>
    %148 = arith.divf %146, %147 : vector<2x32xf32>
    %149 = vector.extract_strided_slice %142 {offsets = [0, 32], sizes = [2, 32], strides = [1, 1]} : vector<2x128xf32> to vector<2x32xf32>
    %150 = arith.negf %149 : vector<2x32xf32>
    %151 = math.exp %150 : vector<2x32xf32>
    %cst_37 = arith.constant 1.000000e+00 : f32
    %152 = vector.broadcast %cst_37 : f32 to vector<2x32xf32>
    %153 = arith.addf %152, %151 : vector<2x32xf32>
    %154 = arith.divf %152, %153 : vector<2x32xf32>
    %155 = vector.extract_strided_slice %142 {offsets = [0, 64], sizes = [2, 32], strides = [1, 1]} : vector<2x128xf32> to vector<2x32xf32>
    %156 = math.tanh %155 : vector<2x32xf32>
    %157 = vector.extract_strided_slice %142 {offsets = [0, 96], sizes = [2, 32], strides = [1, 1]} : vector<2x128xf32> to vector<2x32xf32>
    %158 = arith.negf %157 : vector<2x32xf32>
    %159 = math.exp %158 : vector<2x32xf32>
    %cst_38 = arith.constant 1.000000e+00 : f32
    %160 = vector.broadcast %cst_38 : f32 to vector<2x32xf32>
    %161 = arith.addf %160, %159 : vector<2x32xf32>
    %162 = arith.divf %160, %161 : vector<2x32xf32>
    %163 = arith.mulf %154, %133 : vector<2x32xf32>
    %164 = arith.mulf %148, %156 : vector<2x32xf32>
    %165 = arith.addf %163, %164 : vector<2x32xf32>
    %166 = math.tanh %165 : vector<2x32xf32>
    %167 = arith.mulf %162, %166 : vector<2x32xf32>
    %c0_39 = arith.constant 0 : index
    %c4 = arith.constant 4 : index
    %c0_40 = arith.constant 0 : index
    %168 = vector.load %arg8[%c0_39, %c4, %c0_40] : memref<2x8x32xf32, #tpu.memory_space<vmem>>, vector<2x1x32xf32>
    %169 = vector.shape_cast %168 : vector<2x1x32xf32> to vector<2x32xf32>
    %170 = vector.shape_cast %167 : vector<2x32xf32> to vector<2x1x32xf32>
    tpu.vector_store %arg8[%c0_39, %c4, %c0_40], %170 {strides = array<i32>} : memref<2x8x32xf32, #tpu.memory_space<vmem>>, vector<2x1x32xf32>,
    %171 = vector.extract_strided_slice %8 {offsets = [0, 5, 0], sizes = [2, 1, 128], strides = [1, 1, 1]} : vector<2x8x128xf32> to vector<2x1x128xf32>
    %172 = vector.shape_cast %171 : vector<2x1x128xf32> to vector<2x128xf32>
    %cst_41 = arith.constant dense<0.000000e+00> : vector<2x128xf32>
    %173 = tpu.matmul %167, %1, %cst_41 {dimension_numbers = #tpu.dot_dimension_numbers<[1], [0], [0], [1], [0, 0, 1, 1], [], []>} : vector<2x32xf32>, vector<32x128xf32>, vector<2x128xf32> -> vector<2x128xf32>
    %174 = arith.addf %172, %173 : vector<2x128xf32>
    %175 = vector.extract_strided_slice %174 {offsets = [0, 0], sizes = [2, 32], strides = [1, 1]} : vector<2x128xf32> to vector<2x32xf32>
    %176 = arith.negf %175 : vector<2x32xf32>
    %177 = math.exp %176 : vector<2x32xf32>
    %cst_42 = arith.constant 1.000000e+00 : f32
    %178 = vector.broadcast %cst_42 : f32 to vector<2x32xf32>
    %179 = arith.addf %178, %177 : vector<2x32xf32>
    %180 = arith.divf %178, %179 : vector<2x32xf32>
    %181 = vector.extract_strided_slice %174 {offsets = [0, 32], sizes = [2, 32], strides = [1, 1]} : vector<2x128xf32> to vector<2x32xf32>
    %182 = arith.negf %181 : vector<2x32xf32>
    %183 = math.exp %182 : vector<2x32xf32>
    %cst_43 = arith.constant 1.000000e+00 : f32
    %184 = vector.broadcast %cst_43 : f32 to vector<2x32xf32>
    %185 = arith.addf %184, %183 : vector<2x32xf32>
    %186 = arith.divf %184, %185 : vector<2x32xf32>
    %187 = vector.extract_strided_slice %174 {offsets = [0, 64], sizes = [2, 32], strides = [1, 1]} : vector<2x128xf32> to vector<2x32xf32>
    %188 = math.tanh %187 : vector<2x32xf32>
    %189 = vector.extract_strided_slice %174 {offsets = [0, 96], sizes = [2, 32], strides = [1, 1]} : vector<2x128xf32> to vector<2x32xf32>
    %190 = arith.negf %189 : vector<2x32xf32>
    %191 = math.exp %190 : vector<2x32xf32>
    %cst_44 = arith.constant 1.000000e+00 : f32
    %192 = vector.broadcast %cst_44 : f32 to vector<2x32xf32>
    %193 = arith.addf %192, %191 : vector<2x32xf32>
    %194 = arith.divf %192, %193 : vector<2x32xf32>
    %195 = arith.mulf %186, %165 : vector<2x32xf32>
    %196 = arith.mulf %180, %188 : vector<2x32xf32>
    %197 = arith.addf %195, %196 : vector<2x32xf32>
    %198 = math.tanh %197 : vector<2x32xf32>
    %199 = arith.mulf %194, %198 : vector<2x32xf32>
    %c0_45 = arith.constant 0 : index
    %c5 = arith.constant 5 : index
    %c0_46 = arith.constant 0 : index
    %200 = vector.load %arg8[%c0_45, %c5, %c0_46] : memref<2x8x32xf32, #tpu.memory_space<vmem>>, vector<2x1x32xf32>
    %201 = vector.shape_cast %200 : vector<2x1x32xf32> to vector<2x32xf32>
    %202 = vector.shape_cast %199 : vector<2x32xf32> to vector<2x1x32xf32>
    tpu.vector_store %arg8[%c0_45, %c5, %c0_46], %202 {strides = array<i32>} : memref<2x8x32xf32, #tpu.memory_space<vmem>>, vector<2x1x32xf32>,
    %203 = vector.extract_strided_slice %8 {offsets = [0, 6, 0], sizes = [2, 1, 128], strides = [1, 1, 1]} : vector<2x8x128xf32> to vector<2x1x128xf32>
    %204 = vector.shape_cast %203 : vector<2x1x128xf32> to vector<2x128xf32>
    %cst_47 = arith.constant dense<0.000000e+00> : vector<2x128xf32>
    %205 = tpu.matmul %199, %1, %cst_47 {dimension_numbers = #tpu.dot_dimension_numbers<[1], [0], [0], [1], [0, 0, 1, 1], [], []>} : vector<2x32xf32>, vector<32x128xf32>, vector<2x128xf32> -> vector<2x128xf32>
    %206 = arith.addf %204, %205 : vector<2x128xf32>
    %207 = vector.extract_strided_slice %206 {offsets = [0, 0], sizes = [2, 32], strides = [1, 1]} : vector<2x128xf32> to vector<2x32xf32>
    %208 = arith.negf %207 : vector<2x32xf32>
    %209 = math.exp %208 : vector<2x32xf32>
    %cst_48 = arith.constant 1.000000e+00 : f32
    %210 = vector.broadcast %cst_48 : f32 to vector<2x32xf32>
    %211 = arith.addf %210, %209 : vector<2x32xf32>
    %212 = arith.divf %210, %211 : vector<2x32xf32>
    %213 = vector.extract_strided_slice %206 {offsets = [0, 32], sizes = [2, 32], strides = [1, 1]} : vector<2x128xf32> to vector<2x32xf32>
    %214 = arith.negf %213 : vector<2x32xf32>
    %215 = math.exp %214 : vector<2x32xf32>
    %cst_49 = arith.constant 1.000000e+00 : f32
    %216 = vector.broadcast %cst_49 : f32 to vector<2x32xf32>
    %217 = arith.addf %216, %215 : vector<2x32xf32>
    %218 = arith.divf %216, %217 : vector<2x32xf32>
    %219 = vector.extract_strided_slice %206 {offsets = [0, 64], sizes = [2, 32], strides = [1, 1]} : vector<2x128xf32> to vector<2x32xf32>
    %220 = math.tanh %219 : vector<2x32xf32>
    %221 = vector.extract_strided_slice %206 {offsets = [0, 96], sizes = [2, 32], strides = [1, 1]} : vector<2x128xf32> to vector<2x32xf32>
    %222 = arith.negf %221 : vector<2x32xf32>
    %223 = math.exp %222 : vector<2x32xf32>
    %cst_50 = arith.constant 1.000000e+00 : f32
    %224 = vector.broadcast %cst_50 : f32 to vector<2x32xf32>
    %225 = arith.addf %224, %223 : vector<2x32xf32>
    %226 = arith.divf %224, %225 : vector<2x32xf32>
    %227 = arith.mulf %218, %197 : vector<2x32xf32>
    %228 = arith.mulf %212, %220 : vector<2x32xf32>
    %229 = arith.addf %227, %228 : vector<2x32xf32>
    %230 = math.tanh %229 : vector<2x32xf32>
    %231 = arith.mulf %226, %230 : vector<2x32xf32>
    %c0_51 = arith.constant 0 : index
    %c6 = arith.constant 6 : index
    %c0_52 = arith.constant 0 : index
    %232 = vector.load %arg8[%c0_51, %c6, %c0_52] : memref<2x8x32xf32, #tpu.memory_space<vmem>>, vector<2x1x32xf32>
    %233 = vector.shape_cast %232 : vector<2x1x32xf32> to vector<2x32xf32>
    %234 = vector.shape_cast %231 : vector<2x32xf32> to vector<2x1x32xf32>
    tpu.vector_store %arg8[%c0_51, %c6, %c0_52], %234 {strides = array<i32>} : memref<2x8x32xf32, #tpu.memory_space<vmem>>, vector<2x1x32xf32>,
    %235 = vector.extract_strided_slice %8 {offsets = [0, 7, 0], sizes = [2, 1, 128], strides = [1, 1, 1]} : vector<2x8x128xf32> to vector<2x1x128xf32>
    %236 = vector.shape_cast %235 : vector<2x1x128xf32> to vector<2x128xf32>
    %cst_53 = arith.constant dense<0.000000e+00> : vector<2x128xf32>
    %237 = tpu.matmul %231, %1, %cst_53 {dimension_numbers = #tpu.dot_dimension_numbers<[1], [0], [0], [1], [0, 0, 1, 1], [], []>} : vector<2x32xf32>, vector<32x128xf32>, vector<2x128xf32> -> vector<2x128xf32>
    %238 = arith.addf %236, %237 : vector<2x128xf32>
    %239 = vector.extract_strided_slice %238 {offsets = [0, 0], sizes = [2, 32], strides = [1, 1]} : vector<2x128xf32> to vector<2x32xf32>
    %240 = arith.negf %239 : vector<2x32xf32>
    %241 = math.exp %240 : vector<2x32xf32>
    %cst_54 = arith.constant 1.000000e+00 : f32
    %242 = vector.broadcast %cst_54 : f32 to vector<2x32xf32>
    %243 = arith.addf %242, %241 : vector<2x32xf32>
    %244 = arith.divf %242, %243 : vector<2x32xf32>
    %245 = vector.extract_strided_slice %238 {offsets = [0, 32], sizes = [2, 32], strides = [1, 1]} : vector<2x128xf32> to vector<2x32xf32>
    %246 = arith.negf %245 : vector<2x32xf32>
    %247 = math.exp %246 : vector<2x32xf32>
    %cst_55 = arith.constant 1.000000e+00 : f32
    %248 = vector.broadcast %cst_55 : f32 to vector<2x32xf32>
    %249 = arith.addf %248, %247 : vector<2x32xf32>
    %250 = arith.divf %248, %249 : vector<2x32xf32>
    %251 = vector.extract_strided_slice %238 {offsets = [0, 64], sizes = [2, 32], strides = [1, 1]} : vector<2x128xf32> to vector<2x32xf32>
    %252 = math.tanh %251 : vector<2x32xf32>
    %253 = vector.extract_strided_slice %238 {offsets = [0, 96], sizes = [2, 32], strides = [1, 1]} : vector<2x128xf32> to vector<2x32xf32>
    %254 = arith.negf %253 : vector<2x32xf32>
    %255 = math.exp %254 : vector<2x32xf32>
    %cst_56 = arith.constant 1.000000e+00 : f32
    %256 = vector.broadcast %cst_56 : f32 to vector<2x32xf32>
    %257 = arith.addf %256, %255 : vector<2x32xf32>
    %258 = arith.divf %256, %257 : vector<2x32xf32>
    %259 = arith.mulf %250, %229 : vector<2x32xf32>
    %260 = arith.mulf %244, %252 : vector<2x32xf32>
    %261 = arith.addf %259, %260 : vector<2x32xf32>
    %262 = math.tanh %261 : vector<2x32xf32>
    %263 = arith.mulf %258, %262 : vector<2x32xf32>
    %c0_57 = arith.constant 0 : index
    %c7 = arith.constant 7 : index
    %c0_58 = arith.constant 0 : index
    %264 = vector.load %arg8[%c0_57, %c7, %c0_58] : memref<2x8x32xf32, #tpu.memory_space<vmem>>, vector<2x1x32xf32>
    %265 = vector.shape_cast %264 : vector<2x1x32xf32> to vector<2x32xf32>
    %266 = vector.shape_cast %263 : vector<2x32xf32> to vector<2x1x32xf32>
    tpu.vector_store %arg8[%c0_57, %c7, %c0_58], %266 {strides = array<i32>} : memref<2x8x32xf32, #tpu.memory_space<vmem>>, vector<2x1x32xf32>,
    %c0_59 = arith.constant 0 : index
    %c0_60 = arith.constant 0 : index
    %267 = vector.load %arg4[%c0_59, %c0_60] : memref<32x128xf32, #tpu.memory_space<vmem>>, vector<32x128xf32>
    %c0_61 = arith.constant 0 : index
    %c0_62 = arith.constant 0 : index
    %268 = vector.load %arg5[%c0_61, %c0_62] : memref<32x128xf32, #tpu.memory_space<vmem>>, vector<32x128xf32>
    %c0_63 = arith.constant 0 : index
    %c0_64 = arith.constant 0 : index
    %269 = vector.load %arg6[%c0_63, %c0_64] : memref<1x128xf32, #tpu.memory_space<vmem>>, vector<1x128xf32>
    %c0_65 = arith.constant 0 : index
    %c0_66 = arith.constant 0 : index
    %c0_67 = arith.constant 0 : index
    %270 = vector.load %arg8[%c0_65, %c0_66, %c0_67] : memref<2x8x32xf32, #tpu.memory_space<vmem>>, vector<2x8x32xf32>
    %271 = vector.shape_cast %270 : vector<2x8x32xf32> to vector<16x32xf32>
    %cst_68 = arith.constant dense<0.000000e+00> : vector<16x128xf32>
    %272 = tpu.matmul %271, %267, %cst_68 {dimension_numbers = #tpu.dot_dimension_numbers<[1], [0], [0], [1], [0, 0, 1, 1], [], []>} : vector<16x32xf32>, vector<32x128xf32>, vector<16x128xf32> -> vector<16x128xf32>
    %273 = vector.broadcast %269 : vector<1x128xf32> to vector<16x128xf32>
    %274 = arith.addf %272, %273 : vector<16x128xf32>
    %275 = vector.shape_cast %274 : vector<16x128xf32> to vector<2x8x128xf32>
    %cst_69 = arith.constant 0.000000e+00 : f32
    %276 = vector.broadcast %cst_69 : f32 to vector<2x32xf32>
    %cst_70 = arith.constant 0.000000e+00 : f32
    %277 = vector.broadcast %cst_70 : f32 to vector<2x32xf32>
    %278 = vector.extract_strided_slice %275 {offsets = [0, 0, 0], sizes = [2, 1, 128], strides = [1, 1, 1]} : vector<2x8x128xf32> to vector<2x1x128xf32>
    %279 = vector.shape_cast %278 : vector<2x1x128xf32> to vector<2x128xf32>
    %cst_71 = arith.constant dense<0.000000e+00> : vector<2x128xf32>
    %280 = tpu.matmul %276, %268, %cst_71 {dimension_numbers = #tpu.dot_dimension_numbers<[1], [0], [0], [1], [0, 0, 1, 1], [], []>} : vector<2x32xf32>, vector<32x128xf32>, vector<2x128xf32> -> vector<2x128xf32>
    %281 = arith.addf %279, %280 : vector<2x128xf32>
    %282 = vector.extract_strided_slice %281 {offsets = [0, 0], sizes = [2, 32], strides = [1, 1]} : vector<2x128xf32> to vector<2x32xf32>
    %283 = arith.negf %282 : vector<2x32xf32>
    %284 = math.exp %283 : vector<2x32xf32>
    %cst_72 = arith.constant 1.000000e+00 : f32
    %285 = vector.broadcast %cst_72 : f32 to vector<2x32xf32>
    %286 = arith.addf %285, %284 : vector<2x32xf32>
    %287 = arith.divf %285, %286 : vector<2x32xf32>
    %288 = vector.extract_strided_slice %281 {offsets = [0, 32], sizes = [2, 32], strides = [1, 1]} : vector<2x128xf32> to vector<2x32xf32>
    %289 = arith.negf %288 : vector<2x32xf32>
    %290 = math.exp %289 : vector<2x32xf32>
    %cst_73 = arith.constant 1.000000e+00 : f32
    %291 = vector.broadcast %cst_73 : f32 to vector<2x32xf32>
    %292 = arith.addf %291, %290 : vector<2x32xf32>
    %293 = arith.divf %291, %292 : vector<2x32xf32>
    %294 = vector.extract_strided_slice %281 {offsets = [0, 64], sizes = [2, 32], strides = [1, 1]} : vector<2x128xf32> to vector<2x32xf32>
    %295 = math.tanh %294 : vector<2x32xf32>
    %296 = vector.extract_strided_slice %281 {offsets = [0, 96], sizes = [2, 32], strides = [1, 1]} : vector<2x128xf32> to vector<2x32xf32>
    %297 = arith.negf %296 : vector<2x32xf32>
    %298 = math.exp %297 : vector<2x32xf32>
    %cst_74 = arith.constant 1.000000e+00 : f32
    %299 = vector.broadcast %cst_74 : f32 to vector<2x32xf32>
    %300 = arith.addf %299, %298 : vector<2x32xf32>
    %301 = arith.divf %299, %300 : vector<2x32xf32>
    %302 = arith.mulf %293, %277 : vector<2x32xf32>
    %303 = arith.mulf %287, %295 : vector<2x32xf32>
    %304 = arith.addf %302, %303 : vector<2x32xf32>
    %305 = math.tanh %304 : vector<2x32xf32>
    %306 = arith.mulf %301, %305 : vector<2x32xf32>
    %c0_75 = arith.constant 0 : index
    %c0_76 = arith.constant 0 : index
    %c0_77 = arith.constant 0 : index
    %307 = vector.load %arg7[%c0_75, %c0_76, %c0_77] : memref<2x8x32xf32, #tpu.memory_space<vmem>>, vector<2x1x32xf32>
    %308 = vector.shape_cast %307 : vector<2x1x32xf32> to vector<2x32xf32>
    %309 = vector.shape_cast %306 : vector<2x32xf32> to vector<2x1x32xf32>
    tpu.vector_store %arg7[%c0_75, %c0_76, %c0_77], %309 {strides = array<i32>} : memref<2x8x32xf32, #tpu.memory_space<vmem>>, vector<2x1x32xf32>,
    %310 = vector.extract_strided_slice %275 {offsets = [0, 1, 0], sizes = [2, 1, 128], strides = [1, 1, 1]} : vector<2x8x128xf32> to vector<2x1x128xf32>
    %311 = vector.shape_cast %310 : vector<2x1x128xf32> to vector<2x128xf32>
    %cst_78 = arith.constant dense<0.000000e+00> : vector<2x128xf32>
    %312 = tpu.matmul %306, %268, %cst_78 {dimension_numbers = #tpu.dot_dimension_numbers<[1], [0], [0], [1], [0, 0, 1, 1], [], []>} : vector<2x32xf32>, vector<32x128xf32>, vector<2x128xf32> -> vector<2x128xf32>
    %313 = arith.addf %311, %312 : vector<2x128xf32>
    %314 = vector.extract_strided_slice %313 {offsets = [0, 0], sizes = [2, 32], strides = [1, 1]} : vector<2x128xf32> to vector<2x32xf32>
    %315 = arith.negf %314 : vector<2x32xf32>
    %316 = math.exp %315 : vector<2x32xf32>
    %cst_79 = arith.constant 1.000000e+00 : f32
    %317 = vector.broadcast %cst_79 : f32 to vector<2x32xf32>
    %318 = arith.addf %317, %316 : vector<2x32xf32>
    %319 = arith.divf %317, %318 : vector<2x32xf32>
    %320 = vector.extract_strided_slice %313 {offsets = [0, 32], sizes = [2, 32], strides = [1, 1]} : vector<2x128xf32> to vector<2x32xf32>
    %321 = arith.negf %320 : vector<2x32xf32>
    %322 = math.exp %321 : vector<2x32xf32>
    %cst_80 = arith.constant 1.000000e+00 : f32
    %323 = vector.broadcast %cst_80 : f32 to vector<2x32xf32>
    %324 = arith.addf %323, %322 : vector<2x32xf32>
    %325 = arith.divf %323, %324 : vector<2x32xf32>
    %326 = vector.extract_strided_slice %313 {offsets = [0, 64], sizes = [2, 32], strides = [1, 1]} : vector<2x128xf32> to vector<2x32xf32>
    %327 = math.tanh %326 : vector<2x32xf32>
    %328 = vector.extract_strided_slice %313 {offsets = [0, 96], sizes = [2, 32], strides = [1, 1]} : vector<2x128xf32> to vector<2x32xf32>
    %329 = arith.negf %328 : vector<2x32xf32>
    %330 = math.exp %329 : vector<2x32xf32>
    %cst_81 = arith.constant 1.000000e+00 : f32
    %331 = vector.broadcast %cst_81 : f32 to vector<2x32xf32>
    %332 = arith.addf %331, %330 : vector<2x32xf32>
    %333 = arith.divf %331, %332 : vector<2x32xf32>
    %334 = arith.mulf %325, %304 : vector<2x32xf32>
    %335 = arith.mulf %319, %327 : vector<2x32xf32>
    %336 = arith.addf %334, %335 : vector<2x32xf32>
    %337 = math.tanh %336 : vector<2x32xf32>
    %338 = arith.mulf %333, %337 : vector<2x32xf32>
    %c0_82 = arith.constant 0 : index
    %c1_83 = arith.constant 1 : index
    %c0_84 = arith.constant 0 : index
    %339 = vector.load %arg7[%c0_82, %c1_83, %c0_84] : memref<2x8x32xf32, #tpu.memory_space<vmem>>, vector<2x1x32xf32>
    %340 = vector.shape_cast %339 : vector<2x1x32xf32> to vector<2x32xf32>
    %341 = vector.shape_cast %338 : vector<2x32xf32> to vector<2x1x32xf32>
    tpu.vector_store %arg7[%c0_82, %c1_83, %c0_84], %341 {strides = array<i32>} : memref<2x8x32xf32, #tpu.memory_space<vmem>>, vector<2x1x32xf32>,
    %342 = vector.extract_strided_slice %275 {offsets = [0, 2, 0], sizes = [2, 1, 128], strides = [1, 1, 1]} : vector<2x8x128xf32> to vector<2x1x128xf32>
    %343 = vector.shape_cast %342 : vector<2x1x128xf32> to vector<2x128xf32>
    %cst_85 = arith.constant dense<0.000000e+00> : vector<2x128xf32>
    %344 = tpu.matmul %338, %268, %cst_85 {dimension_numbers = #tpu.dot_dimension_numbers<[1], [0], [0], [1], [0, 0, 1, 1], [], []>} : vector<2x32xf32>, vector<32x128xf32>, vector<2x128xf32> -> vector<2x128xf32>
    %345 = arith.addf %343, %344 : vector<2x128xf32>
    %346 = vector.extract_strided_slice %345 {offsets = [0, 0], sizes = [2, 32], strides = [1, 1]} : vector<2x128xf32> to vector<2x32xf32>
    %347 = arith.negf %346 : vector<2x32xf32>
    %348 = math.exp %347 : vector<2x32xf32>
    %cst_86 = arith.constant 1.000000e+00 : f32
    %349 = vector.broadcast %cst_86 : f32 to vector<2x32xf32>
    %350 = arith.addf %349, %348 : vector<2x32xf32>
    %351 = arith.divf %349, %350 : vector<2x32xf32>
    %352 = vector.extract_strided_slice %345 {offsets = [0, 32], sizes = [2, 32], strides = [1, 1]} : vector<2x128xf32> to vector<2x32xf32>
    %353 = arith.negf %352 : vector<2x32xf32>
    %354 = math.exp %353 : vector<2x32xf32>
    %cst_87 = arith.constant 1.000000e+00 : f32
    %355 = vector.broadcast %cst_87 : f32 to vector<2x32xf32>
    %356 = arith.addf %355, %354 : vector<2x32xf32>
    %357 = arith.divf %355, %356 : vector<2x32xf32>
    %358 = vector.extract_strided_slice %345 {offsets = [0, 64], sizes = [2, 32], strides = [1, 1]} : vector<2x128xf32> to vector<2x32xf32>
    %359 = math.tanh %358 : vector<2x32xf32>
    %360 = vector.extract_strided_slice %345 {offsets = [0, 96], sizes = [2, 32], strides = [1, 1]} : vector<2x128xf32> to vector<2x32xf32>
    %361 = arith.negf %360 : vector<2x32xf32>
    %362 = math.exp %361 : vector<2x32xf32>
    %cst_88 = arith.constant 1.000000e+00 : f32
    %363 = vector.broadcast %cst_88 : f32 to vector<2x32xf32>
    %364 = arith.addf %363, %362 : vector<2x32xf32>
    %365 = arith.divf %363, %364 : vector<2x32xf32>
    %366 = arith.mulf %357, %336 : vector<2x32xf32>
    %367 = arith.mulf %351, %359 : vector<2x32xf32>
    %368 = arith.addf %366, %367 : vector<2x32xf32>
    %369 = math.tanh %368 : vector<2x32xf32>
    %370 = arith.mulf %365, %369 : vector<2x32xf32>
    %c0_89 = arith.constant 0 : index
    %c2_90 = arith.constant 2 : index
    %c0_91 = arith.constant 0 : index
    %371 = vector.load %arg7[%c0_89, %c2_90, %c0_91] : memref<2x8x32xf32, #tpu.memory_space<vmem>>, vector<2x1x32xf32>
    %372 = vector.shape_cast %371 : vector<2x1x32xf32> to vector<2x32xf32>
    %373 = vector.shape_cast %370 : vector<2x32xf32> to vector<2x1x32xf32>
    tpu.vector_store %arg7[%c0_89, %c2_90, %c0_91], %373 {strides = array<i32>} : memref<2x8x32xf32, #tpu.memory_space<vmem>>, vector<2x1x32xf32>,
    %374 = vector.extract_strided_slice %275 {offsets = [0, 3, 0], sizes = [2, 1, 128], strides = [1, 1, 1]} : vector<2x8x128xf32> to vector<2x1x128xf32>
    %375 = vector.shape_cast %374 : vector<2x1x128xf32> to vector<2x128xf32>
    %cst_92 = arith.constant dense<0.000000e+00> : vector<2x128xf32>
    %376 = tpu.matmul %370, %268, %cst_92 {dimension_numbers = #tpu.dot_dimension_numbers<[1], [0], [0], [1], [0, 0, 1, 1], [], []>} : vector<2x32xf32>, vector<32x128xf32>, vector<2x128xf32> -> vector<2x128xf32>
    %377 = arith.addf %375, %376 : vector<2x128xf32>
    %378 = vector.extract_strided_slice %377 {offsets = [0, 0], sizes = [2, 32], strides = [1, 1]} : vector<2x128xf32> to vector<2x32xf32>
    %379 = arith.negf %378 : vector<2x32xf32>
    %380 = math.exp %379 : vector<2x32xf32>
    %cst_93 = arith.constant 1.000000e+00 : f32
    %381 = vector.broadcast %cst_93 : f32 to vector<2x32xf32>
    %382 = arith.addf %381, %380 : vector<2x32xf32>
    %383 = arith.divf %381, %382 : vector<2x32xf32>
    %384 = vector.extract_strided_slice %377 {offsets = [0, 32], sizes = [2, 32], strides = [1, 1]} : vector<2x128xf32> to vector<2x32xf32>
    %385 = arith.negf %384 : vector<2x32xf32>
    %386 = math.exp %385 : vector<2x32xf32>
    %cst_94 = arith.constant 1.000000e+00 : f32
    %387 = vector.broadcast %cst_94 : f32 to vector<2x32xf32>
    %388 = arith.addf %387, %386 : vector<2x32xf32>
    %389 = arith.divf %387, %388 : vector<2x32xf32>
    %390 = vector.extract_strided_slice %377 {offsets = [0, 64], sizes = [2, 32], strides = [1, 1]} : vector<2x128xf32> to vector<2x32xf32>
    %391 = math.tanh %390 : vector<2x32xf32>
    %392 = vector.extract_strided_slice %377 {offsets = [0, 96], sizes = [2, 32], strides = [1, 1]} : vector<2x128xf32> to vector<2x32xf32>
    %393 = arith.negf %392 : vector<2x32xf32>
    %394 = math.exp %393 : vector<2x32xf32>
    %cst_95 = arith.constant 1.000000e+00 : f32
    %395 = vector.broadcast %cst_95 : f32 to vector<2x32xf32>
    %396 = arith.addf %395, %394 : vector<2x32xf32>
    %397 = arith.divf %395, %396 : vector<2x32xf32>
    %398 = arith.mulf %389, %368 : vector<2x32xf32>
    %399 = arith.mulf %383, %391 : vector<2x32xf32>
    %400 = arith.addf %398, %399 : vector<2x32xf32>
    %401 = math.tanh %400 : vector<2x32xf32>
    %402 = arith.mulf %397, %401 : vector<2x32xf32>
    %c0_96 = arith.constant 0 : index
    %c3_97 = arith.constant 3 : index
    %c0_98 = arith.constant 0 : index
    %403 = vector.load %arg7[%c0_96, %c3_97, %c0_98] : memref<2x8x32xf32, #tpu.memory_space<vmem>>, vector<2x1x32xf32>
    %404 = vector.shape_cast %403 : vector<2x1x32xf32> to vector<2x32xf32>
    %405 = vector.shape_cast %402 : vector<2x32xf32> to vector<2x1x32xf32>
    tpu.vector_store %arg7[%c0_96, %c3_97, %c0_98], %405 {strides = array<i32>} : memref<2x8x32xf32, #tpu.memory_space<vmem>>, vector<2x1x32xf32>,
    %406 = vector.extract_strided_slice %275 {offsets = [0, 4, 0], sizes = [2, 1, 128], strides = [1, 1, 1]} : vector<2x8x128xf32> to vector<2x1x128xf32>
    %407 = vector.shape_cast %406 : vector<2x1x128xf32> to vector<2x128xf32>
    %cst_99 = arith.constant dense<0.000000e+00> : vector<2x128xf32>
    %408 = tpu.matmul %402, %268, %cst_99 {dimension_numbers = #tpu.dot_dimension_numbers<[1], [0], [0], [1], [0, 0, 1, 1], [], []>} : vector<2x32xf32>, vector<32x128xf32>, vector<2x128xf32> -> vector<2x128xf32>
    %409 = arith.addf %407, %408 : vector<2x128xf32>
    %410 = vector.extract_strided_slice %409 {offsets = [0, 0], sizes = [2, 32], strides = [1, 1]} : vector<2x128xf32> to vector<2x32xf32>
    %411 = arith.negf %410 : vector<2x32xf32>
    %412 = math.exp %411 : vector<2x32xf32>
    %cst_100 = arith.constant 1.000000e+00 : f32
    %413 = vector.broadcast %cst_100 : f32 to vector<2x32xf32>
    %414 = arith.addf %413, %412 : vector<2x32xf32>
    %415 = arith.divf %413, %414 : vector<2x32xf32>
    %416 = vector.extract_strided_slice %409 {offsets = [0, 32], sizes = [2, 32], strides = [1, 1]} : vector<2x128xf32> to vector<2x32xf32>
    %417 = arith.negf %416 : vector<2x32xf32>
    %418 = math.exp %417 : vector<2x32xf32>
    %cst_101 = arith.constant 1.000000e+00 : f32
    %419 = vector.broadcast %cst_101 : f32 to vector<2x32xf32>
    %420 = arith.addf %419, %418 : vector<2x32xf32>
    %421 = arith.divf %419, %420 : vector<2x32xf32>
    %422 = vector.extract_strided_slice %409 {offsets = [0, 64], sizes = [2, 32], strides = [1, 1]} : vector<2x128xf32> to vector<2x32xf32>
    %423 = math.tanh %422 : vector<2x32xf32>
    %424 = vector.extract_strided_slice %409 {offsets = [0, 96], sizes = [2, 32], strides = [1, 1]} : vector<2x128xf32> to vector<2x32xf32>
    %425 = arith.negf %424 : vector<2x32xf32>
    %426 = math.exp %425 : vector<2x32xf32>
    %cst_102 = arith.constant 1.000000e+00 : f32
    %427 = vector.broadcast %cst_102 : f32 to vector<2x32xf32>
    %428 = arith.addf %427, %426 : vector<2x32xf32>
    %429 = arith.divf %427, %428 : vector<2x32xf32>
    %430 = arith.mulf %421, %400 : vector<2x32xf32>
    %431 = arith.mulf %415, %423 : vector<2x32xf32>
    %432 = arith.addf %430, %431 : vector<2x32xf32>
    %433 = math.tanh %432 : vector<2x32xf32>
    %434 = arith.mulf %429, %433 : vector<2x32xf32>
    %c0_103 = arith.constant 0 : index
    %c4_104 = arith.constant 4 : index
    %c0_105 = arith.constant 0 : index
    %435 = vector.load %arg7[%c0_103, %c4_104, %c0_105] : memref<2x8x32xf32, #tpu.memory_space<vmem>>, vector<2x1x32xf32>
    %436 = vector.shape_cast %435 : vector<2x1x32xf32> to vector<2x32xf32>
    %437 = vector.shape_cast %434 : vector<2x32xf32> to vector<2x1x32xf32>
    tpu.vector_store %arg7[%c0_103, %c4_104, %c0_105], %437 {strides = array<i32>} : memref<2x8x32xf32, #tpu.memory_space<vmem>>, vector<2x1x32xf32>,
    %438 = vector.extract_strided_slice %275 {offsets = [0, 5, 0], sizes = [2, 1, 128], strides = [1, 1, 1]} : vector<2x8x128xf32> to vector<2x1x128xf32>
    %439 = vector.shape_cast %438 : vector<2x1x128xf32> to vector<2x128xf32>
    %cst_106 = arith.constant dense<0.000000e+00> : vector<2x128xf32>
    %440 = tpu.matmul %434, %268, %cst_106 {dimension_numbers = #tpu.dot_dimension_numbers<[1], [0], [0], [1], [0, 0, 1, 1], [], []>} : vector<2x32xf32>, vector<32x128xf32>, vector<2x128xf32> -> vector<2x128xf32>
    %441 = arith.addf %439, %440 : vector<2x128xf32>
    %442 = vector.extract_strided_slice %441 {offsets = [0, 0], sizes = [2, 32], strides = [1, 1]} : vector<2x128xf32> to vector<2x32xf32>
    %443 = arith.negf %442 : vector<2x32xf32>
    %444 = math.exp %443 : vector<2x32xf32>
    %cst_107 = arith.constant 1.000000e+00 : f32
    %445 = vector.broadcast %cst_107 : f32 to vector<2x32xf32>
    %446 = arith.addf %445, %444 : vector<2x32xf32>
    %447 = arith.divf %445, %446 : vector<2x32xf32>
    %448 = vector.extract_strided_slice %441 {offsets = [0, 32], sizes = [2, 32], strides = [1, 1]} : vector<2x128xf32> to vector<2x32xf32>
    %449 = arith.negf %448 : vector<2x32xf32>
    %450 = math.exp %449 : vector<2x32xf32>
    %cst_108 = arith.constant 1.000000e+00 : f32
    %451 = vector.broadcast %cst_108 : f32 to vector<2x32xf32>
    %452 = arith.addf %451, %450 : vector<2x32xf32>
    %453 = arith.divf %451, %452 : vector<2x32xf32>
    %454 = vector.extract_strided_slice %441 {offsets = [0, 64], sizes = [2, 32], strides = [1, 1]} : vector<2x128xf32> to vector<2x32xf32>
    %455 = math.tanh %454 : vector<2x32xf32>
    %456 = vector.extract_strided_slice %441 {offsets = [0, 96], sizes = [2, 32], strides = [1, 1]} : vector<2x128xf32> to vector<2x32xf32>
    %457 = arith.negf %456 : vector<2x32xf32>
    %458 = math.exp %457 : vector<2x32xf32>
    %cst_109 = arith.constant 1.000000e+00 : f32
    %459 = vector.broadcast %cst_109 : f32 to vector<2x32xf32>
    %460 = arith.addf %459, %458 : vector<2x32xf32>
    %461 = arith.divf %459, %460 : vector<2x32xf32>
    %462 = arith.mulf %453, %432 : vector<2x32xf32>
    %463 = arith.mulf %447, %455 : vector<2x32xf32>
    %464 = arith.addf %462, %463 : vector<2x32xf32>
    %465 = math.tanh %464 : vector<2x32xf32>
    %466 = arith.mulf %461, %465 : vector<2x32xf32>
    %c0_110 = arith.constant 0 : index
    %c5_111 = arith.constant 5 : index
    %c0_112 = arith.constant 0 : index
    %467 = vector.load %arg7[%c0_110, %c5_111, %c0_112] : memref<2x8x32xf32, #tpu.memory_space<vmem>>, vector<2x1x32xf32>
    %468 = vector.shape_cast %467 : vector<2x1x32xf32> to vector<2x32xf32>
    %469 = vector.shape_cast %466 : vector<2x32xf32> to vector<2x1x32xf32>
    tpu.vector_store %arg7[%c0_110, %c5_111, %c0_112], %469 {strides = array<i32>} : memref<2x8x32xf32, #tpu.memory_space<vmem>>, vector<2x1x32xf32>,
    %470 = vector.extract_strided_slice %275 {offsets = [0, 6, 0], sizes = [2, 1, 128], strides = [1, 1, 1]} : vector<2x8x128xf32> to vector<2x1x128xf32>
    %471 = vector.shape_cast %470 : vector<2x1x128xf32> to vector<2x128xf32>
    %cst_113 = arith.constant dense<0.000000e+00> : vector<2x128xf32>
    %472 = tpu.matmul %466, %268, %cst_113 {dimension_numbers = #tpu.dot_dimension_numbers<[1], [0], [0], [1], [0, 0, 1, 1], [], []>} : vector<2x32xf32>, vector<32x128xf32>, vector<2x128xf32> -> vector<2x128xf32>
    %473 = arith.addf %471, %472 : vector<2x128xf32>
    %474 = vector.extract_strided_slice %473 {offsets = [0, 0], sizes = [2, 32], strides = [1, 1]} : vector<2x128xf32> to vector<2x32xf32>
    %475 = arith.negf %474 : vector<2x32xf32>
    %476 = math.exp %475 : vector<2x32xf32>
    %cst_114 = arith.constant 1.000000e+00 : f32
    %477 = vector.broadcast %cst_114 : f32 to vector<2x32xf32>
    %478 = arith.addf %477, %476 : vector<2x32xf32>
    %479 = arith.divf %477, %478 : vector<2x32xf32>
    %480 = vector.extract_strided_slice %473 {offsets = [0, 32], sizes = [2, 32], strides = [1, 1]} : vector<2x128xf32> to vector<2x32xf32>
    %481 = arith.negf %480 : vector<2x32xf32>
    %482 = math.exp %481 : vector<2x32xf32>
    %cst_115 = arith.constant 1.000000e+00 : f32
    %483 = vector.broadcast %cst_115 : f32 to vector<2x32xf32>
    %484 = arith.addf %483, %482 : vector<2x32xf32>
    %485 = arith.divf %483, %484 : vector<2x32xf32>
    %486 = vector.extract_strided_slice %473 {offsets = [0, 64], sizes = [2, 32], strides = [1, 1]} : vector<2x128xf32> to vector<2x32xf32>
    %487 = math.tanh %486 : vector<2x32xf32>
    %488 = vector.extract_strided_slice %473 {offsets = [0, 96], sizes = [2, 32], strides = [1, 1]} : vector<2x128xf32> to vector<2x32xf32>
    %489 = arith.negf %488 : vector<2x32xf32>
    %490 = math.exp %489 : vector<2x32xf32>
    %cst_116 = arith.constant 1.000000e+00 : f32
    %491 = vector.broadcast %cst_116 : f32 to vector<2x32xf32>
    %492 = arith.addf %491, %490 : vector<2x32xf32>
    %493 = arith.divf %491, %492 : vector<2x32xf32>
    %494 = arith.mulf %485, %464 : vector<2x32xf32>
    %495 = arith.mulf %479, %487 : vector<2x32xf32>
    %496 = arith.addf %494, %495 : vector<2x32xf32>
    %497 = math.tanh %496 : vector<2x32xf32>
    %498 = arith.mulf %493, %497 : vector<2x32xf32>
    %c0_117 = arith.constant 0 : index
    %c6_118 = arith.constant 6 : index
    %c0_119 = arith.constant 0 : index
    %499 = vector.load %arg7[%c0_117, %c6_118, %c0_119] : memref<2x8x32xf32, #tpu.memory_space<vmem>>, vector<2x1x32xf32>
    %500 = vector.shape_cast %499 : vector<2x1x32xf32> to vector<2x32xf32>
    %501 = vector.shape_cast %498 : vector<2x32xf32> to vector<2x1x32xf32>
    tpu.vector_store %arg7[%c0_117, %c6_118, %c0_119], %501 {strides = array<i32>} : memref<2x8x32xf32, #tpu.memory_space<vmem>>, vector<2x1x32xf32>,
    %502 = vector.extract_strided_slice %275 {offsets = [0, 7, 0], sizes = [2, 1, 128], strides = [1, 1, 1]} : vector<2x8x128xf32> to vector<2x1x128xf32>
    %503 = vector.shape_cast %502 : vector<2x1x128xf32> to vector<2x128xf32>
    %cst_120 = arith.constant dense<0.000000e+00> : vector<2x128xf32>
    %504 = tpu.matmul %498, %268, %cst_120 {dimension_numbers = #tpu.dot_dimension_numbers<[1], [0], [0], [1], [0, 0, 1, 1], [], []>} : vector<2x32xf32>, vector<32x128xf32>, vector<2x128xf32> -> vector<2x128xf32>
    %505 = arith.addf %503, %504 : vector<2x128xf32>
    %506 = vector.extract_strided_slice %505 {offsets = [0, 0], sizes = [2, 32], strides = [1, 1]} : vector<2x128xf32> to vector<2x32xf32>
    %507 = arith.negf %506 : vector<2x32xf32>
    %508 = math.exp %507 : vector<2x32xf32>
    %cst_121 = arith.constant 1.000000e+00 : f32
    %509 = vector.broadcast %cst_121 : f32 to vector<2x32xf32>
    %510 = arith.addf %509, %508 : vector<2x32xf32>
    %511 = arith.divf %509, %510 : vector<2x32xf32>
    %512 = vector.extract_strided_slice %505 {offsets = [0, 32], sizes = [2, 32], strides = [1, 1]} : vector<2x128xf32> to vector<2x32xf32>
    %513 = arith.negf %512 : vector<2x32xf32>
    %514 = math.exp %513 : vector<2x32xf32>
    %cst_122 = arith.constant 1.000000e+00 : f32
    %515 = vector.broadcast %cst_122 : f32 to vector<2x32xf32>
    %516 = arith.addf %515, %514 : vector<2x32xf32>
    %517 = arith.divf %515, %516 : vector<2x32xf32>
    %518 = vector.extract_strided_slice %505 {offsets = [0, 64], sizes = [2, 32], strides = [1, 1]} : vector<2x128xf32> to vector<2x32xf32>
    %519 = math.tanh %518 : vector<2x32xf32>
    %520 = vector.extract_strided_slice %505 {offsets = [0, 96], sizes = [2, 32], strides = [1, 1]} : vector<2x128xf32> to vector<2x32xf32>
    %521 = arith.negf %520 : vector<2x32xf32>
    %522 = math.exp %521 : vector<2x32xf32>
    %cst_123 = arith.constant 1.000000e+00 : f32
    %523 = vector.broadcast %cst_123 : f32 to vector<2x32xf32>
    %524 = arith.addf %523, %522 : vector<2x32xf32>
    %525 = arith.divf %523, %524 : vector<2x32xf32>
    %526 = arith.mulf %517, %496 : vector<2x32xf32>
    %527 = arith.mulf %511, %519 : vector<2x32xf32>
    %528 = arith.addf %526, %527 : vector<2x32xf32>
    %529 = math.tanh %528 : vector<2x32xf32>
    %530 = arith.mulf %525, %529 : vector<2x32xf32>
    %c0_124 = arith.constant 0 : index
    %c7_125 = arith.constant 7 : index
    %c0_126 = arith.constant 0 : index
    %531 = vector.load %arg7[%c0_124, %c7_125, %c0_126] : memref<2x8x32xf32, #tpu.memory_space<vmem>>, vector<2x1x32xf32>
    %532 = vector.shape_cast %531 : vector<2x1x32xf32> to vector<2x32xf32>
    %533 = vector.shape_cast %530 : vector<2x32xf32> to vector<2x1x32xf32>
    tpu.vector_store %arg7[%c0_124, %c7_125, %c0_126], %533 {strides = array<i32>} : memref<2x8x32xf32, #tpu.memory_space<vmem>>, vector<2x1x32xf32>,
    return
  }
}

</mosaic_0001>

<bundles_post_ra>
// kernel: tpu_custom_call.1
= control target key start
LH: loop header
LB: loop body
LE: loop exit
PB: predicated region body
PF: predicated region fallthrough
CT: control target
= control target key end

     0   :  { %12 = vsyncpa [#allocation4], 0  ;;  %s3215_s0 = inlined_call_operand.hbm [shape: f32[2,8,16], index: 0, kind: input, shape index: {}]   ;;  %s3216_s1 = inlined_call_operand.hbm [shape: f32[16,128], index: 1, kind: input, shape index: {}]   ;;  %s3217_s2 = inlined_call_operand.hbm [shape: f32[32,128], index: 2, kind: input, shape index: {}]   ;;  %s3218_s3 = inlined_call_operand.vmem [shape: f32[1,128], index: 3, kind: input, shape index: {}]   ;;  %s3219_s4 = inlined_call_operand.hbm [shape: f32[32,128], index: 4, kind: input, shape index: {}]   ;;  %s3220_s5 = inlined_call_operand.hbm [shape: f32[32,128], index: 5, kind: input, shape index: {}]   ;;  %s3221_s6 = inlined_call_operand.vmem [shape: f32[1,128], index: 6, kind: input, shape index: {}]   ;;  %s3222_s7 = inlined_call_operand.hbm [shape: f32[2,8,32], index: 7, kind: output, shape index: {}]  }
   0x1   :  { %13 = vsyncpa [#allocation7], 0 }
   0x2   :  { %14 = vsyncpa [#allocation10], 0 }
   0x3   :  { %15 = vsyncpa [#allocation5], 0  ;;  %s33_s26 = sshll.u32 %s3216_s1, 4  ;;  %s2645_s27 = smov [#allocation6]   ;;  %s34_s26 = int_to_ptr.hbm [resolvable:$true] %s33_s26 }
   0x4   :  { %s35_s28 = sshll.u32 %s2645_s27, 4  ;;  %s61_s8 = sshll.u32 %s3219_s4, 4  ;;  %s36_s28 = int_to_ptr.vmem [resolvable:$true] %s35_s28  ;;  %s62_s8 = int_to_ptr.hbm [resolvable:$true] %s61_s8 }
   0x5   :  { %s2646_s9 = smov 128   ;;  %s2647_s10 = smov 8  }
   0x6   :  { %41 = dma.hbm_to_vmem [thread:$0]  %s34_s26, 256, %s36_s28, [#allocation7], %s2646_s9, %s2646_s9, %s2647_s10  }
   0x7   :  { %s2648_s11 = smov [#allocation9]   ;;  %s20_s1 = sshll.u32 %s3215_s0, 4  ;;  %s21_s1 = int_to_ptr.hbm [resolvable:$true] %s20_s1 }
   0x8   :  { %s63_s12 = sshll.u32 %s2648_s11, 4  ;;  %s46_s16 = sshll.u32 %s3217_s2, 4  ;;  %s64_s12 = int_to_ptr.vmem [resolvable:$true] %s63_s12  ;;  %s47_s16 = int_to_ptr.hbm [resolvable:$true] %s46_s16 }
   0x9   :  { %69 = dma.hbm_to_vmem [thread:$0]  %s62_s8, 512, %s64_s12, [#allocation10], %s2646_s9, %s2646_s9, %s2647_s10  }
   0xa   :  { %s2649_s17 = smov [#allocation3]   ;;  %s2650_s19 = smov [#allocation8]  }
   0xb   :  { %s22_s18 = sshll.u32 %s2649_s17, 4  ;;  %s48_s0 = sshll.u32 %s2650_s19, 4  ;;  %s23_s18 = int_to_ptr.vmem [resolvable:$true] %s22_s18  ;;  %s49_s0 = int_to_ptr.vmem [resolvable:$true] %s48_s0 }
   0xc   :  { %28 = dma.hbm_to_vmem [thread:$0]  %s21_s1, 256, %s23_s18, [#allocation4], %s2646_s9, %s2646_s9, %s2647_s10  }
   0xd   :  { %s74_s22 = sshll.u32 %s3220_s5, 4  ;;  %s2651_s2 = smov [#allocation11]   ;;  %s75_s22 = int_to_ptr.hbm [resolvable:$true] %s74_s22 }
   0xe   :  { %54 = dma.hbm_to_vmem [thread:$0]  %s47_s16, 512, %s49_s0, [#allocation7], %s2646_s9, %s2646_s9, %s2647_s10  }
   0xf   :  { %s76_s23 = sshll.u32 %s2651_s2, 4  ;;  %s77_s23 = int_to_ptr.vmem [resolvable:$true] %s76_s23 }
  0x10   :  { %82 = dma.hbm_to_vmem [thread:$0]  %s75_s22, 512, %s77_s23, [#allocation10], %s2646_s9, %s2646_s9, %s2647_s10  }
  0x11   :  { %2637 = dma.done.wait [#allocation4], 256  }
  0x12   :  { %2638 = vsyncadd [#allocation4], 4294967040 }
  0x13   :  { %2639 = dma.done.wait [#allocation7], 768  }
  0x14   :  { %2640 = vsyncadd [#allocation7], 4294966528 }
  0x15   :  { %2641 = dma.done.wait [#allocation10], 1024  }
  0x16   :  { %2642 = vsyncadd [#allocation10], 4294966272  ;;  %v106_v0 = vld [vmem:[#allocation6 + $0x8] sm:$0xff]  ;;  %v105_v2 = vld [vmem:[#allocation6] sm:$0xff]  ;;  %vm117_vm0 = vcmask 130048   ;;  %v2652_v7 = vmov 0.0  }
  0x17   :  { %v110_v1 = vld [vmem:[#allocation8 + $0x18] sm:$0xff]  ;;  %138 = vmatpush.msra.mxu0 %v106_v0  ;;  %v109_v3 = vld [vmem:[#allocation8 + $0x10] sm:$0xff]  ;;  %v112_v4 = vld [vmem:[#allocation3] sm:$0xff]  ;;  %s2653_s25 = smov 64   ;;  %vm263_vm9 = vcmask 1041409   ;;  %vm147_vm10 = vcmask 261120  }
  0x18   :  { %163 = vmatpush.msra.mxu1 %v110_v1  ;;  %v108_v5 = vld [vmem:[#allocation8 + $0x8] sm:$0xff]  ;;  %281 = vmatpush.msra.mxu2 %v110_v1  ;;  %v107_v6 = vld [vmem:[#allocation8] sm:$0xff]  ;;  %v2235_v11 = vld [vmem:[%s3218_s3] ss:$0 sm:$0xff]  ;;  %s2654_s3 = smov 32   ;;  %s2159_s8 = sshll.u32 %s3222_s7, 4  ;;  %s2160_s8 = int_to_ptr.hbm [resolvable:$true] %s2159_s8 }
  0x19   :  { %404 = vmatpush.msra.mxu3 %v110_v1  ;;  %139 = vmatpush.msra.mxu0 %v105_v2  ;;  %v113_v8 = vld [vmem:[#allocation3 + $0x8] sm:$0xff] }
  0x1a   :  { %164 = vmatpush.msra.mxu1 %v109_v3  ;;  %2174 = vmatmul.msk.f32.vlgmr.msra.gmra.mxu0 %vm117_vm0, %v112_v4 }
  0x1b   :  { %282 = vmatpush.msra.mxu2 %v109_v3  ;;  %405 = vmatpush.msra.mxu3 %v109_v3 }
  0x1c   :  { %165 = vmatpush.msra.mxu1 %v108_v5  ;;  %904 = vmatpush.msrb.mxu0 %v110_v1 }
  0x1d   :  { %283 = vmatpush.msra.mxu2 %v108_v5  ;;  %406 = vmatpush.msra.mxu3 %v108_v5 }
  0x1e   :  { %166 = vmatpush.msra.mxu1 %v107_v6  ;;  %905 = vmatpush.msrb.mxu0 %v109_v3 }
  0x1f   :  { %167 = vmatmul.f32.vlgmr.msra.gmra.mxu1 %v2652_v7  ;;  %284 = vmatpush.msra.mxu2 %v107_v6 }
  0x20   :  { %407 = vmatpush.msra.mxu3 %v107_v6  ;;  %529 = vmatpush.msrb.mxu1 %v110_v1 }
  0x21   :  { %654 = vmatpush.msrb.mxu2 %v110_v1  ;;  %906 = vmatpush.msrb.mxu0 %v108_v5 }
  0x22   :  { %779 = vmatpush.msrb.mxu3 %v110_v1  ;;  %530 = vmatpush.msrb.mxu1 %v109_v3 }
  0x23   :  { %2175 = vmatmul.msk.f32.gmra.mxu0 %vm117_vm0, %v113_v8  ;;  %655 = vmatpush.msrb.mxu2 %v109_v3 }
  0x24   :  { %531 = vmatpush.msrb.mxu1 %v108_v5  ;;  %780 = vmatpush.msrb.mxu3 %v109_v3 }
  0x25   :  { %656 = vmatpush.msrb.mxu2 %v108_v5  ;;  %907 = vmatpush.msrb.mxu0 %v107_v6 }
  0x26   :  { %532 = vmatpush.msrb.mxu1 %v107_v6  ;;  %781 = vmatpush.msrb.mxu3 %v108_v5 }
  0x27   :  { %657 = vmatpush.msrb.mxu2 %v107_v6 }
  0x28   :  { %782 = vmatpush.msrb.mxu3 %v107_v6  ;;  %1029 = vmatpush.msra.mxu1 %v110_v1 }
  0x2a   :  { %1030 = vmatpush.msra.mxu1 %v109_v3 }
  0x2c   :  { %1031 = vmatpush.msra.mxu1 %v108_v5 }
  0x2e   :  { %1032 = vmatpush.msra.mxu1 %v107_v6 }
  0x97   :  { %v141_v9 = vpop.f32.mrf.mxu0 }
  0x98   :  { %v2735_v16 = vadd.f32 %v2235_v11, %v141_v9 }
  0x9c   :  { %v168_v10 = vpop.f32.mrf.mxu1 }
  0x9d   :  { %v172_v12 = vrot.slane %v168_v10, 1  ;;  %v175_v17 = vadd.f32 %v168_v10, %v2735_v16 }
  0x9f   :  { %v2176_v21 = vmul.f32 -1.442695, %v175_v17 }
  0xa0   :  { %v144_v13 = vpop.f32.mrf.mxu0 }
  0xa1   :  { %v2732_v14 = vadd.f32 %v2235_v11, %v144_v13 }
  0xa3   :  { %v176_v15 = vadd.f32 %v172_v12, %v2732_v14 }
  0xa5   :  { %2237 = vtanh.f32 %v176_v15  ;;  %v2177_v20 = vmul.f32 -1.442695, %v176_v15 }
  0xa6   :  { %2239 = vtanh.f32 %v175_v17 }
  0xa7   :  { %2241 = vpow2.f32 %v2177_v20 }
  0xa8   :  { %2243 = vpow2.f32 %v2176_v21 }
  0xab   :  { %v2238_v18 = vpop.eup %2237 }
  0xac   :  { %223 = vrot.lane.b32.xlu0 %v2238_v18, %s2653_s25  ;;  %v2240_v19 = vpop.eup %2239 }
  0xad   :  { %v2242_v22 = vpop.eup %2241 }
  0xae   :  { %v184_v23 = vadd.f32 1.0, %v2242_v22  ;;  %v2244_v24 = vpop.eup %2243 }
  0xaf   :  { %v183_v25 = vadd.f32 1.0, %v2244_v24 }
  0xb0   :  { %2245 = vrcp.f32 %v184_v23  ;;  %v211_v34 = vand.u32 2147483648, %v184_v23  ;;  %vm205_vm2 = vweird.f32 %v184_v23  ;;  %v209_v35 = vand.u32 2147483647, %v184_v23 }
  0xb1   :  { %2247 = vrcp.f32 %v183_v25  ;;  %v196_v43 = vand.u32 2147483648, %v183_v25  ;;  %vm190_vm6 = vweird.f32 %v183_v25  ;;  %v194_v44 = vand.u32 2147483647, %v183_v25 }
  0xb2   :  { %v212_v38 = vor.u32 1.1754944e-38, %v211_v34  ;;  %vm210_vm4 = vcmp.eq.f32.partialorder %v209_v35, 8.507059e+37 }
  0xb3   :  { %v197_v46 = vor.u32 1.1754944e-38, %v196_v43  ;;  %vm195_vm8 = vcmp.eq.f32.partialorder %v194_v44, 8.507059e+37 }
  0xb4   :  { %221 = vrot.lane.b32.xlu0 %v2240_v19, %s2653_s25 }
  0xb6   :  { %v2246_v26 = vpop.eup %2245 }
  0xb7   :  { %v201_v27 = vmul.f32 %v2246_v26, %v184_v23  ;;  %v2248_v29 = vpop.eup %2247  ;;  %vm206_vm1 = vweird.f32 %v2246_v26 }
  0xb8   :  { %v186_v31 = vmul.f32 %v2248_v29, %v183_v25  ;;  %vm207_vm3 = vmor %vm205_vm2, %vm206_vm1  ;;  %vm191_vm5 = vweird.f32 %v2248_v29 }
  0xb9   :  { %v202_v28 = vsub.f32 1.0, %v201_v27  ;;  %vm192_vm7 = vmor %vm190_vm6, %vm191_vm5 }
  0xba   :  { %v187_v33 = vsub.f32 1.0, %v186_v31 }
  0xbb   :  { %v203_v30 = vmul.f32 %v2246_v26, %v202_v28 }
  0xbc   :  { %v188_v37 = vmul.f32 %v2248_v29, %v187_v33 }
  0xbd   :  { %v204_v32 = vadd.f32 %v2246_v26, %v203_v30 }
  0xbe   :  { %v189_v42 = vadd.f32 %v2248_v29, %v188_v37 }
  0xbf   :  { %v208_v36 = vsel %vm207_vm3, %v2246_v26, %v204_v32 }
  0xc0   :  { %v213_v40 = vsel %vm210_vm4, %v212_v38, %v208_v36  ;;  %v193_v45 = vsel %vm192_vm7, %v2248_v29, %v189_v42 }
  0xc1   :  { %v198_v48 = vsel %vm195_vm8, %v197_v46, %v193_v45  ;;  %v218_v50 = vmul.f32 0.0, %v213_v40 }
  0xc2   :  { %v217_v53 = vmul.f32 0.0, %v198_v48 }
 0x11e   :  { %v224_v39 = vpop.permute.xlu0 %223 }
 0x11f   :  { %v228_v41 = vmul.f32 %v224_v39, %v213_v40 }
 0x121   :  { %233 = vrot.lane.b32.xlu1 %v228_v41, %s2654_s3 }
 0x126   :  { %v222_v47 = vpop.permute.xlu0 %221 }
 0x127   :  { %v227_v49 = vmul.f32 %v222_v47, %v198_v48 }
 0x129   :  { %231 = vrot.lane.b32.xlu1 %v227_v49, %s2654_s3 }
 0x193   :  { %v234_v51 = vpop.permute.xlu1 %233 }
 0x194   :  { %v2742_v52 = vadd.f32 %v234_v51, %v218_v50 }
 0x196   :  { %2249 = vtanh.f32 %v2742_v52 }
 0x19b   :  { %v232_v54 = vpop.permute.xlu1 %231 }
 0x19c   :  { %v2250_v55 = vpop.eup %2249  ;;  %v2745_v56 = vadd.f32 %v232_v54, %v217_v53 }
 0x19d   :  { %245 = vrot.lane.b32.xlu2 %v2250_v55, %s2653_s25 }
 0x19e   :  { %2251 = vtanh.f32 %v2745_v56  ;;  %v337_v45 = vrot.slane %v2745_v56, 7 }
 0x1a4   :  { %v2252_v57 = vpop.eup %2251 }
 0x1a5   :  { %243 = vrot.lane.b32.xlu2 %v2252_v57, %s2653_s25 }
 0x1f7   :  { %v246_v58 = vpop.permute.xlu2 %245 }
 0x1f8   :  { %v2750_v59 = vmul.f32 %v246_v58, %v213_v40  ;;  %v338_v40 = vrot.slane %v2742_v52, 7 }
 0x1fa   :  { %v262_v61 = vrot.slane %v2750_v59, 7 }
 0x1ff   :  { %v244_v60 = vpop.permute.xlu2 %243 }
 0x200   :  { %v2753_v62 = vmul.f32 %v244_v60, %v198_v48 }
 0x202   :  { %v264_v63 = vsel %vm263_vm9, %v262_v61, %v2753_v62 }
 0x203   :  { %265 = vrot.lane.b32.xlu0 %v264_v63, %s2654_s3 }
 0x275   :  { %v266_v0 = vpop.permute.xlu0 %265 }
 0x276   :  { %2178 = vmatmul.msk.f32.vlgmr.msra.gmra.mxu2 %vm147_vm10, %v266_v0 }
 0x2f9   :  { %v286_v1 = vpop.f32.mrf.mxu2 }
 0x2fa   :  { %v290_v2 = vrot.slane %v286_v1, 7  ;;  %v294_v3 = vadd.f32 %v286_v1, %v2732_v14 }
 0x2fc   :  { %v293_v4 = vadd.f32 %v290_v2, %v2735_v16  ;;  %2253 = vtanh.f32 %v294_v3  ;;  %v2180_v8 = vmul.f32 -1.442695, %v294_v3 }
 0x2fe   :  { %2255 = vtanh.f32 %v293_v4  ;;  %v2179_v13 = vmul.f32 -1.442695, %v293_v4 }
 0x2ff   :  { %2257 = vpow2.f32 %v2180_v8 }
 0x302   :  { %v2254_v5 = vpop.eup %2253 }
 0x303   :  { %347 = vrot.lane.b32.xlu2 %v2254_v5, %s2653_s25 }
 0x304   :  { %v2256_v6 = vpop.eup %2255 }
 0x305   :  { %345 = vrot.lane.b32.xlu1 %v2256_v6, %s2653_s25  ;;  %v2258_v9 = vpop.eup %2257 }
 0x306   :  { %v302_v10 = vadd.f32 1.0, %v2258_v9 }
 0x308   :  { %2259 = vrcp.f32 %v302_v10  ;;  %v329_v20 = vand.u32 2147483648, %v302_v10  ;;  %vm323_vm12 = vweird.f32 %v302_v10  ;;  %v327_v22 = vand.u32 2147483647, %v302_v10 }
 0x309   :  { %2261 = vpow2.f32 %v2179_v13 }
 0x30a   :  { %v330_v24 = vor.u32 1.1754944e-38, %v329_v20  ;;  %vm328_vm14 = vcmp.eq.f32.partialorder %v327_v22, 8.507059e+37 }
 0x30e   :  { %v2260_v11 = vpop.eup %2259 }
 0x30f   :  { %v319_v12 = vmul.f32 %v2260_v11, %v302_v10  ;;  %v2262_v18 = vpop.eup %2261  ;;  %vm324_vm11 = vweird.f32 %v2260_v11 }
 0x310   :  { %v301_v21 = vadd.f32 1.0, %v2262_v18  ;;  %vm325_vm13 = vmor %vm323_vm12, %vm324_vm11 }
 0x311   :  { %v320_v15 = vsub.f32 1.0, %v319_v12 }
 0x312   :  { %2263 = vrcp.f32 %v301_v21  ;;  %v314_v33 = vand.u32 2147483648, %v301_v21  ;;  %vm308_vm0 = vweird.f32 %v301_v21  ;;  %v312_v34 = vand.u32 2147483647, %v301_v21 }
 0x313   :  { %v321_v17 = vmul.f32 %v2260_v11, %v320_v15 }
 0x314   :  { %v315_v36 = vor.u32 1.1754944e-38, %v314_v33  ;;  %vm313_vm2 = vcmp.eq.f32.partialorder %v312_v34, 8.507059e+37 }
 0x315   :  { %v322_v19 = vadd.f32 %v2260_v11, %v321_v17 }
 0x317   :  { %v326_v23 = vsel %vm325_vm13, %v2260_v11, %v322_v19 }
 0x318   :  { %v331_v26 = vsel %vm328_vm14, %v330_v24, %v326_v23  ;;  %v2264_v28 = vpop.eup %2263 }
 0x319   :  { %v304_v29 = vmul.f32 %v2264_v28, %v301_v21  ;;  %vm309_vm15 = vweird.f32 %v2264_v28  ;;  %v342_v41 = vmul.f32 %v338_v40, %v331_v26 }
 0x31a   :  { %vm310_vm1 = vmor %vm308_vm0, %vm309_vm15 }
 0x31b   :  { %v305_v30 = vsub.f32 1.0, %v304_v29 }
 0x31d   :  { %v306_v31 = vmul.f32 %v2264_v28, %v305_v30 }
 0x31f   :  { %v307_v32 = vadd.f32 %v2264_v28, %v306_v31 }
 0x321   :  { %v311_v35 = vsel %vm310_vm1, %v2264_v28, %v307_v32 }
 0x322   :  { %v316_v38 = vsel %vm313_vm2, %v315_v36, %v311_v35 }
 0x323   :  { %v341_v46 = vmul.f32 %v337_v45, %v316_v38 }
 0x35d   :  { %v348_v25 = vpop.permute.xlu2 %347 }
 0x35e   :  { %v352_v27 = vmul.f32 %v348_v25, %v331_v26 }
 0x360   :  { %357 = vrot.lane.b32.xlu1 %v352_v27, %s2654_s3 }
 0x377   :  { %v346_v37 = vpop.permute.xlu1 %345 }
 0x378   :  { %v351_v39 = vmul.f32 %v346_v37, %v316_v38 }
 0x37a   :  { %355 = vrot.lane.b32.xlu0 %v351_v39, %s2654_s3 }
 0x3d2   :  { %v358_v42 = vpop.permute.xlu1 %357 }
 0x3d3   :  { %v2766_v43 = vadd.f32 %v358_v42, %v342_v41 }
 0x3d5   :  { %2265 = vtanh.f32 %v2766_v43  ;;  %v462_v36 = vrot.slane %v2766_v43, 7 }
 0x3db   :  { %v2266_v44 = vpop.eup %2265 }
 0x3dc   :  { %369 = vrot.lane.b32.xlu0 %v2266_v44, %s2653_s25 }
 0x3ec   :  { %v356_v47 = vpop.permute.xlu0 %355 }
 0x3ed   :  { %v2771_v48 = vadd.f32 %v356_v47, %v341_v46 }
 0x3ef   :  { %2267 = vtanh.f32 %v2771_v48  ;;  %v461_v35 = vrot.slane %v2771_v48, 7 }
 0x3f5   :  { %v2268_v49 = vpop.eup %2267 }
 0x3f6   :  { %367 = vrot.lane.b32.xlu2 %v2268_v49, %s2653_s25 }
 0x44e   :  { %v370_v50 = vpop.permute.xlu0 %369 }
 0x44f   :  { %v2777_v53 = vmul.f32 %v370_v50, %v331_v26 }
 0x450   :  { %v368_v51 = vpop.permute.xlu2 %367 }
 0x451   :  { %v2775_v52 = vmul.f32 %v368_v51, %v316_v38 }
 0x453   :  { %v386_v54 = vrot.slane %v2775_v52, 1 }
 0x455   :  { %v387_v55 = vsel %vm263_vm9, %v2777_v53, %v386_v54 }
 0x456   :  { %388 = vrot.lane.b32.xlu1 %v387_v55, %s2654_s3 }
 0x4c8   :  { %v389_v56 = vpop.permute.xlu1 %388 }
 0x4c9   :  { %2181 = vmatmul.msk.f32.vlgmr.msra.gmra.mxu3 %vm147_vm10, %v389_v56 }
 0x54c   :  { %v409_v57 = vpop.f32.mrf.mxu3 }
 0x54d   :  { %v413_v58 = vrot.slane %v409_v57, 6  ;;  %v414_v60 = vrot.slane %v409_v57, 7 }
 0x54f   :  { %v417_v61 = vadd.f32 %v413_v58, %v2735_v16  ;;  %v418_v63 = vadd.f32 %v414_v60, %v2732_v14 }
 0x551   :  { %2269 = vtanh.f32 %v417_v61  ;;  %v2182_v2 = vmul.f32 -1.442695, %v417_v61  ;;  %v2183_v6 = vmul.f32 -1.442695, %v418_v63 }
 0x552   :  { %2271 = vtanh.f32 %v418_v63 }
 0x553   :  { %2273 = vpow2.f32 %v2182_v2 }
 0x557   :  { %v2270_v0 = vpop.eup %2269 }
 0x558   :  { %v2272_v1 = vpop.eup %2271  ;;  %469 = vrot.lane.b32.xlu2 %v2270_v0, %s2653_s25 }
 0x559   :  { %471 = vrot.lane.b32.xlu0 %v2272_v1, %s2653_s25  ;;  %v2274_v3 = vpop.eup %2273 }
 0x55a   :  { %v425_v4 = vadd.f32 1.0, %v2274_v3 }
 0x55c   :  { %2275 = vrcp.f32 %v425_v4  ;;  %v438_v15 = vand.u32 2147483648, %v425_v4  ;;  %vm432_vm4 = vweird.f32 %v425_v4  ;;  %v436_v17 = vand.u32 2147483647, %v425_v4 }
 0x55d   :  { %2277 = vpow2.f32 %v2183_v6 }
 0x55e   :  { %v439_v19 = vor.u32 1.1754944e-38, %v438_v15  ;;  %vm437_vm6 = vcmp.eq.f32.partialorder %v436_v17, 8.507059e+37 }
 0x562   :  { %v2276_v5 = vpop.eup %2275 }
 0x563   :  { %v428_v8 = vmul.f32 %v2276_v5, %v425_v4  ;;  %v2278_v11 = vpop.eup %2277  ;;  %vm433_vm3 = vweird.f32 %v2276_v5 }
 0x564   :  { %v426_v12 = vadd.f32 1.0, %v2278_v11  ;;  %vm434_vm5 = vmor %vm432_vm4, %vm433_vm3 }
 0x565   :  { %v429_v9 = vsub.f32 1.0, %v428_v8 }
 0x566   :  { %2279 = vrcp.f32 %v426_v12  ;;  %v453_v28 = vand.u32 2147483648, %v426_v12  ;;  %vm447_vm8 = vweird.f32 %v426_v12  ;;  %v451_v29 = vand.u32 2147483647, %v426_v12 }
 0x567   :  { %v430_v10 = vmul.f32 %v2276_v5, %v429_v9 }
 0x568   :  { %v454_v31 = vor.u32 1.1754944e-38, %v453_v28  ;;  %vm452_vm12 = vcmp.eq.f32.partialorder %v451_v29, 8.507059e+37 }
 0x569   :  { %v431_v13 = vadd.f32 %v2276_v5, %v430_v10 }
 0x56b   :  { %v435_v18 = vsel %vm434_vm5, %v2276_v5, %v431_v13 }
 0x56c   :  { %v440_v21 = vsel %vm437_vm6, %v439_v19, %v435_v18  ;;  %v2280_v23 = vpop.eup %2279 }
 0x56d   :  { %v443_v24 = vmul.f32 %v2280_v23, %v426_v12  ;;  %vm448_vm7 = vweird.f32 %v2280_v23  ;;  %v465_v37 = vmul.f32 %v461_v35, %v440_v21 }
 0x56e   :  { %vm449_vm11 = vmor %vm447_vm8, %vm448_vm7 }
 0x56f   :  { %v444_v25 = vsub.f32 1.0, %v443_v24 }
 0x571   :  { %v445_v26 = vmul.f32 %v2280_v23, %v444_v25 }
 0x573   :  { %v446_v27 = vadd.f32 %v2280_v23, %v445_v26 }
 0x575   :  { %v450_v30 = vsel %vm449_vm11, %v2280_v23, %v446_v27 }
 0x576   :  { %v455_v33 = vsel %vm452_vm12, %v454_v31, %v450_v30 }
 0x577   :  { %v466_v38 = vmul.f32 %v462_v36, %v455_v33 }
 0x5b2   :  { %v470_v20 = vpop.permute.xlu2 %469 }
 0x5b3   :  { %v475_v22 = vmul.f32 %v470_v20, %v440_v21 }
 0x5b5   :  { %479 = vrot.lane.b32.xlu1 %v475_v22, %s2654_s3 }
 0x5cb   :  { %v472_v32 = vpop.permute.xlu0 %471 }
 0x5cc   :  { %v476_v34 = vmul.f32 %v472_v32, %v455_v33 }
 0x5ce   :  { %481 = vrot.lane.b32.xlu2 %v476_v34, %s2654_s3 }
 0x627   :  { %v480_v39 = vpop.permute.xlu1 %479 }
 0x628   :  { %v482_v40 = vpop.permute.xlu2 %481  ;;  %v2792_v41 = vadd.f32 %v480_v39, %v465_v37 }
 0x629   :  { %v2794_v42 = vadd.f32 %v482_v40, %v466_v38 }
 0x62a   :  { %2281 = vtanh.f32 %v2792_v41 }
 0x62b   :  { %2283 = vtanh.f32 %v2794_v42  ;;  %v587_v38 = vrot.slane %v2794_v42, 7 }
 0x630   :  { %v2282_v44 = vpop.eup %2281 }
 0x631   :  { %v2284_v45 = vpop.eup %2283  ;;  %491 = vrot.lane.b32.xlu0 %v2282_v44, %s2653_s25 }
 0x632   :  { %493 = vrot.lane.b32.xlu1 %v2284_v45, %s2653_s25 }
 0x6a3   :  { %v492_v46 = vpop.permute.xlu0 %491 }
 0x6a4   :  { %v494_v43 = vpop.permute.xlu1 %493  ;;  %v2800_v47 = vmul.f32 %v492_v46, %v440_v21 }
 0x6a5   :  { %v2802_v48 = vmul.f32 %v494_v43, %v455_v33  ;;  %v586_v33 = vrot.slane %v2792_v41, 7 }
 0x6a6   :  { %v510_v49 = vrot.slane %v2800_v47, 2 }
 0x6a7   :  { %v511_v50 = vrot.slane %v2802_v48, 1 }
 0x6a9   :  { %v512_v51 = vsel %vm263_vm9, %v511_v50, %v510_v49 }
 0x6aa   :  { %513 = vrot.lane.b32.xlu2 %v512_v51, %s2654_s3 }
 0x704   :  { %v514_v54 = vpop.permute.xlu2 %513 }
 0x705   :  { %2184 = vmatmul.msk.f32.vlgmr.msrb.gmra.mxu1 %vm147_vm10, %v514_v54 }
 0x782   :  { %v534_v55 = vpop.f32.mrf.mxu1 }
 0x783   :  { %v538_v56 = vrot.slane %v534_v55, 5  ;;  %v539_v57 = vrot.slane %v534_v55, 6 }
 0x785   :  { %v542_v58 = vadd.f32 %v538_v56, %v2735_v16  ;;  %v543_v60 = vadd.f32 %v539_v57, %v2732_v14 }
 0x787   :  { %2285 = vtanh.f32 %v542_v58  ;;  %v2185_v0 = vmul.f32 -1.442695, %v542_v58  ;;  %v2186_v1 = vmul.f32 -1.442695, %v543_v60 }
 0x788   :  { %2287 = vtanh.f32 %v543_v60 }
 0x789   :  { %2289 = vpow2.f32 %v2185_v0 }
 0x78a   :  { %2291 = vpow2.f32 %v2186_v1 }
 0x78d   :  { %v2286_v61 = vpop.eup %2285 }
 0x78e   :  { %v2288_v63 = vpop.eup %2287  ;;  %594 = vrot.lane.b32.xlu0 %v2286_v61, %s2653_s25 }
 0x78f   :  { %596 = vrot.lane.b32.xlu1 %v2288_v63, %s2653_s25  ;;  %v2290_v2 = vpop.eup %2289 }
 0x790   :  { %v2292_v3 = vpop.eup %2291  ;;  %v550_v4 = vadd.f32 1.0, %v2290_v2 }
 0x791   :  { %v551_v5 = vadd.f32 1.0, %v2292_v3 }
 0x792   :  { %2293 = vrcp.f32 %v550_v4  ;;  %v563_v19 = vand.u32 2147483648, %v550_v4  ;;  %vm557_vm15 = vweird.f32 %v550_v4  ;;  %v561_v21 = vand.u32 2147483647, %v550_v4 }
 0x793   :  { %2295 = vrcp.f32 %v551_v5  ;;  %v578_v20 = vand.u32 2147483648, %v551_v5  ;;  %vm572_vm0 = vweird.f32 %v551_v5  ;;  %v576_v22 = vand.u32 2147483647, %v551_v5 }
 0x794   :  { %v564_v25 = vor.u32 1.1754944e-38, %v563_v19  ;;  %vm562_vm3 = vcmp.eq.f32.partialorder %v561_v21, 8.507059e+37 }
 0x795   :  { %v579_v26 = vor.u32 1.1754944e-38, %v578_v20  ;;  %vm577_vm4 = vcmp.eq.f32.partialorder %v576_v22, 8.507059e+37 }
 0x798   :  { %v2294_v6 = vpop.eup %2293 }
 0x799   :  { %v2296_v8 = vpop.eup %2295  ;;  %v553_v9 = vmul.f32 %v2294_v6, %v550_v4  ;;  %vm558_vm13 = vweird.f32 %v2294_v6 }
 0x79a   :  { %v568_v10 = vmul.f32 %v2296_v8, %v551_v5  ;;  %vm573_vm14 = vweird.f32 %v2296_v8  ;;  %vm559_vm1 = vmor %vm557_vm15, %vm558_vm13 }
 0x79b   :  { %v554_v11 = vsub.f32 1.0, %v553_v9  ;;  %vm574_vm2 = vmor %vm572_vm0, %vm573_vm14 }
 0x79c   :  { %v569_v12 = vsub.f32 1.0, %v568_v10 }
 0x79d   :  { %v555_v13 = vmul.f32 %v2294_v6, %v554_v11 }
 0x79e   :  { %v570_v15 = vmul.f32 %v2296_v8, %v569_v12 }
 0x79f   :  { %v556_v17 = vadd.f32 %v2294_v6, %v555_v13 }
 0x7a0   :  { %v571_v18 = vadd.f32 %v2296_v8, %v570_v15 }
 0x7a1   :  { %v560_v23 = vsel %vm559_vm1, %v2294_v6, %v556_v17 }
 0x7a2   :  { %v575_v24 = vsel %vm574_vm2, %v2296_v8, %v571_v18  ;;  %v565_v28 = vsel %vm562_vm3, %v564_v25, %v560_v23 }
 0x7a3   :  { %v580_v30 = vsel %vm577_vm4, %v579_v26, %v575_v24  ;;  %v590_v34 = vmul.f32 %v586_v33, %v565_v28 }
 0x7a4   :  { %v591_v39 = vmul.f32 %v587_v38, %v580_v30 }
 0x800   :  { %v595_v27 = vpop.permute.xlu0 %594 }
 0x801   :  { %v597_v29 = vpop.permute.xlu1 %596  ;;  %v600_v31 = vmul.f32 %v595_v27, %v565_v28 }
 0x802   :  { %v601_v32 = vmul.f32 %v597_v29, %v580_v30 }
 0x803   :  { %604 = vrot.lane.b32.xlu2 %v600_v31, %s2654_s3 }
 0x804   :  { %606 = vrot.lane.b32.xlu0 %v601_v32, %s2654_s3 }
 0x85d   :  { %v605_v35 = vpop.permute.xlu2 %604 }
 0x85e   :  { %v2816_v36 = vadd.f32 %v605_v35, %v590_v34 }
 0x860   :  { %2297 = vtanh.f32 %v2816_v36 }
 0x866   :  { %v2298_v37 = vpop.eup %2297 }
 0x867   :  { %616 = vrot.lane.b32.xlu1 %v2298_v37, %s2653_s25 }
 0x876   :  { %v607_v40 = vpop.permute.xlu0 %606 }
 0x877   :  { %v2821_v44 = vadd.f32 %v607_v40, %v591_v39  ;;  %v711_v39 = vrot.slane %v2816_v36, 7 }
 0x879   :  { %2299 = vtanh.f32 %v2821_v44  ;;  %v712_v33 = vrot.slane %v2821_v44, 7 }
 0x87f   :  { %v2300_v45 = vpop.eup %2299 }
 0x880   :  { %618 = vrot.lane.b32.xlu2 %v2300_v45, %s2653_s25 }
 0x8d9   :  { %v617_v41 = vpop.permute.xlu1 %616 }
 0x8da   :  { %v619_v46 = vpop.permute.xlu2 %618  ;;  %v2825_v43 = vmul.f32 %v617_v41, %v565_v28 }
 0x8db   :  { %v2827_v49 = vmul.f32 %v619_v46, %v580_v30 }
 0x8dc   :  { %v635_v50 = vrot.slane %v2825_v43, 3 }
 0x8dd   :  { %v636_v51 = vrot.slane %v2827_v49, 2 }
 0x8df   :  { %v637_v42 = vsel %vm263_vm9, %v636_v51, %v635_v50 }
 0x8e0   :  { %638 = vrot.lane.b32.xlu0 %v637_v42, %s2654_s3 }
 0x952   :  { %v639_v54 = vpop.permute.xlu0 %638 }
 0x953   :  { %2187 = vmatmul.msk.f32.vlgmr.msrb.gmra.mxu2 %vm147_vm10, %v639_v54 }
 0x9d6   :  { %v659_v55 = vpop.f32.mrf.mxu2 }
 0x9d7   :  { %v663_v56 = vrot.slane %v659_v55, 4  ;;  %v664_v57 = vrot.slane %v659_v55, 5 }
 0x9d9   :  { %v667_v58 = vadd.f32 %v663_v56, %v2735_v16  ;;  %v668_v60 = vadd.f32 %v664_v57, %v2732_v14 }
 0x9db   :  { %2301 = vtanh.f32 %v667_v58  ;;  %v2189_v0 = vmul.f32 -1.442695, %v668_v60  ;;  %v2188_v4 = vmul.f32 -1.442695, %v667_v58 }
 0x9dc   :  { %2303 = vtanh.f32 %v668_v60 }
 0x9dd   :  { %2305 = vpow2.f32 %v2189_v0 }
 0x9e1   :  { %v2302_v61 = vpop.eup %2301 }
 0x9e2   :  { %v2304_v63 = vpop.eup %2303  ;;  %719 = vrot.lane.b32.xlu1 %v2302_v61, %s2653_s25 }
 0x9e3   :  { %721 = vrot.lane.b32.xlu2 %v2304_v63, %s2653_s25  ;;  %v2306_v1 = vpop.eup %2305 }
 0x9e4   :  { %v676_v2 = vadd.f32 1.0, %v2306_v1 }
 0x9e6   :  { %2307 = vrcp.f32 %v676_v2  ;;  %v703_v12 = vand.u32 2147483648, %v676_v2  ;;  %vm697_vm6 = vweird.f32 %v676_v2  ;;  %v701_v13 = vand.u32 2147483647, %v676_v2 }
 0x9e7   :  { %2309 = vpow2.f32 %v2188_v4 }
 0x9e8   :  { %v704_v17 = vor.u32 1.1754944e-38, %v703_v12  ;;  %vm702_vm8 = vcmp.eq.f32.partialorder %v701_v13, 8.507059e+37 }
 0x9ec   :  { %v2308_v3 = vpop.eup %2307 }
 0x9ed   :  { %v693_v5 = vmul.f32 %v2308_v3, %v676_v2  ;;  %v2310_v8 = vpop.eup %2309  ;;  %vm698_vm5 = vweird.f32 %v2308_v3 }
 0x9ee   :  { %v675_v10 = vadd.f32 1.0, %v2310_v8  ;;  %vm699_vm7 = vmor %vm697_vm6, %vm698_vm5 }
 0x9ef   :  { %v694_v6 = vsub.f32 1.0, %v693_v5 }
 0x9f0   :  { %2311 = vrcp.f32 %v675_v10  ;;  %v688_v26 = vand.u32 2147483648, %v675_v10  ;;  %vm682_vm12 = vweird.f32 %v675_v10  ;;  %v686_v27 = vand.u32 2147483647, %v675_v10 }
 0x9f1   :  { %v695_v9 = vmul.f32 %v2308_v3, %v694_v6 }
 0x9f2   :  { %v689_v29 = vor.u32 1.1754944e-38, %v688_v26  ;;  %vm687_vm14 = vcmp.eq.f32.partialorder %v686_v27, 8.507059e+37 }
 0x9f3   :  { %v696_v11 = vadd.f32 %v2308_v3, %v695_v9 }
 0x9f5   :  { %v700_v15 = vsel %vm699_vm7, %v2308_v3, %v696_v11 }
 0x9f6   :  { %v705_v19 = vsel %vm702_vm8, %v704_v17, %v700_v15  ;;  %v2312_v20 = vpop.eup %2311 }
 0x9f7   :  { %v678_v22 = vmul.f32 %v2312_v20, %v675_v10  ;;  %vm683_vm11 = vweird.f32 %v2312_v20  ;;  %v716_v34 = vmul.f32 %v712_v33, %v705_v19 }
 0x9f8   :  { %vm684_vm13 = vmor %vm682_vm12, %vm683_vm11 }
 0x9f9   :  { %v679_v23 = vsub.f32 1.0, %v678_v22 }
 0x9fb   :  { %v680_v24 = vmul.f32 %v2312_v20, %v679_v23 }
 0x9fd   :  { %v681_v25 = vadd.f32 %v2312_v20, %v680_v24 }
 0x9ff   :  { %v685_v28 = vsel %vm684_vm13, %v2312_v20, %v681_v25 }
 0xa00   :  { %v690_v31 = vsel %vm687_vm14, %v689_v29, %v685_v28 }
 0xa01   :  { %v715_v40 = vmul.f32 %v711_v39, %v690_v31 }
 0xa3d   :  { %v722_v18 = vpop.permute.xlu2 %721 }
 0xa3e   :  { %v726_v21 = vmul.f32 %v722_v18, %v705_v19 }
 0xa40   :  { %731 = vrot.lane.b32.xlu1 %v726_v21, %s2654_s3 }
 0xa54   :  { %v720_v30 = vpop.permute.xlu1 %719 }
 0xa55   :  { %v725_v32 = vmul.f32 %v720_v30, %v690_v31 }
 0xa57   :  { %729 = vrot.lane.b32.xlu0 %v725_v32, %s2654_s3 }
 0xab2   :  { %v732_v35 = vpop.permute.xlu1 %731 }
 0xab3   :  { %v2841_v37 = vadd.f32 %v732_v35, %v716_v34 }
 0xab5   :  { %2313 = vtanh.f32 %v2841_v37 }
 0xabb   :  { %v2314_v38 = vpop.eup %2313 }
 0xabc   :  { %743 = vrot.lane.b32.xlu0 %v2314_v38, %s2653_s25  ;;  %v837_v38 = vrot.slane %v2841_v37, 7 }
 0xac9   :  { %v730_v45 = vpop.permute.xlu0 %729 }
 0xaca   :  { %v2846_v41 = vadd.f32 %v730_v45, %v715_v40 }
 0xacc   :  { %2315 = vtanh.f32 %v2846_v41  ;;  %v836_v35 = vrot.slane %v2846_v41, 7 }
 0xad2   :  { %v2316_v46 = vpop.eup %2315 }
 0xad3   :  { %741 = vrot.lane.b32.xlu2 %v2316_v46, %s2653_s25 }
 0xb2d   :  { %v742_v44 = vpop.permute.xlu2 %741 }
 0xb2e   :  { %v744_v50 = vpop.permute.xlu0 %743  ;;  %v2850_v51 = vmul.f32 %v742_v44, %v690_v31 }
 0xb2f   :  { %v2852_v42 = vmul.f32 %v744_v50, %v705_v19 }
 0xb30   :  { %v760_v54 = vrot.slane %v2850_v51, 4 }
 0xb31   :  { %v761_v55 = vrot.slane %v2852_v42, 3 }
 0xb33   :  { %v762_v36 = vsel %vm263_vm9, %v761_v55, %v760_v54 }
 0xb34   :  { %763 = vrot.lane.b32.xlu1 %v762_v36, %s2654_s3 }
 0xba6   :  { %v764_v56 = vpop.permute.xlu1 %763 }
 0xba7   :  { %2190 = vmatmul.msk.f32.vlgmr.msrb.gmra.mxu3 %vm147_vm10, %v764_v56 }
 0xc2a   :  { %v784_v57 = vpop.f32.mrf.mxu3 }
 0xc2b   :  { %v788_v58 = vrot.slane %v784_v57, 3  ;;  %v789_v60 = vrot.slane %v784_v57, 4 }
 0xc2d   :  { %v792_v61 = vadd.f32 %v788_v58, %v2735_v16  ;;  %v793_v63 = vadd.f32 %v789_v60, %v2732_v14 }
 0xc2f   :  { %2317 = vtanh.f32 %v792_v61  ;;  %v2191_v2 = vmul.f32 -1.442695, %v792_v61  ;;  %v2192_v6 = vmul.f32 -1.442695, %v793_v63 }
 0xc30   :  { %2319 = vtanh.f32 %v793_v63 }
 0xc31   :  { %2321 = vpow2.f32 %v2191_v2 }
 0xc35   :  { %v2318_v0 = vpop.eup %2317 }
 0xc36   :  { %v2320_v1 = vpop.eup %2319  ;;  %844 = vrot.lane.b32.xlu2 %v2318_v0, %s2653_s25 }
 0xc37   :  { %846 = vrot.lane.b32.xlu0 %v2320_v1, %s2653_s25  ;;  %v2322_v3 = vpop.eup %2321 }
 0xc38   :  { %v800_v4 = vadd.f32 1.0, %v2322_v3 }
 0xc3a   :  { %2323 = vrcp.f32 %v800_v4  ;;  %v813_v15 = vand.u32 2147483648, %v800_v4  ;;  %vm807_vm0 = vweird.f32 %v800_v4  ;;  %v811_v17 = vand.u32 2147483647, %v800_v4 }
 0xc3b   :  { %2325 = vpow2.f32 %v2192_v6 }
 0xc3c   :  { %v814_v19 = vor.u32 1.1754944e-38, %v813_v15  ;;  %vm812_vm2 = vcmp.eq.f32.partialorder %v811_v17, 8.507059e+37 }
 0xc40   :  { %v2324_v5 = vpop.eup %2323 }
 0xc41   :  { %v803_v8 = vmul.f32 %v2324_v5, %v800_v4  ;;  %v2326_v11 = vpop.eup %2325  ;;  %vm808_vm15 = vweird.f32 %v2324_v5 }
 0xc42   :  { %v801_v12 = vadd.f32 1.0, %v2326_v11  ;;  %vm809_vm1 = vmor %vm807_vm0, %vm808_vm15 }
 0xc43   :  { %v804_v9 = vsub.f32 1.0, %v803_v8 }
 0xc44   :  { %2327 = vrcp.f32 %v801_v12  ;;  %v828_v28 = vand.u32 2147483648, %v801_v12  ;;  %vm822_vm4 = vweird.f32 %v801_v12  ;;  %v826_v29 = vand.u32 2147483647, %v801_v12 }
 0xc45   :  { %v805_v10 = vmul.f32 %v2324_v5, %v804_v9 }
 0xc46   :  { %v829_v31 = vor.u32 1.1754944e-38, %v828_v28  ;;  %vm827_vm6 = vcmp.eq.f32.partialorder %v826_v29, 8.507059e+37 }
 0xc47   :  { %v806_v13 = vadd.f32 %v2324_v5, %v805_v10 }
 0xc49   :  { %v810_v18 = vsel %vm809_vm1, %v2324_v5, %v806_v13 }
 0xc4a   :  { %v815_v21 = vsel %vm812_vm2, %v814_v19, %v810_v18  ;;  %v2328_v23 = vpop.eup %2327 }
 0xc4b   :  { %v818_v24 = vmul.f32 %v2328_v23, %v801_v12  ;;  %vm823_vm3 = vweird.f32 %v2328_v23  ;;  %v840_v39 = vmul.f32 %v836_v35, %v815_v21 }
 0xc4c   :  { %vm824_vm5 = vmor %vm822_vm4, %vm823_vm3 }
 0xc4d   :  { %v819_v25 = vsub.f32 1.0, %v818_v24 }
 0xc4f   :  { %v820_v26 = vmul.f32 %v2328_v23, %v819_v25 }
 0xc51   :  { %v821_v27 = vadd.f32 %v2328_v23, %v820_v26 }
 0xc53   :  { %v825_v30 = vsel %vm824_vm5, %v2328_v23, %v821_v27 }
 0xc54   :  { %v830_v33 = vsel %vm827_vm6, %v829_v31, %v825_v30 }
 0xc55   :  { %v841_v40 = vmul.f32 %v837_v38, %v830_v33 }
 0xc90   :  { %v845_v20 = vpop.permute.xlu2 %844 }
 0xc91   :  { %v850_v22 = vmul.f32 %v845_v20, %v815_v21 }
 0xc93   :  { %854 = vrot.lane.b32.xlu1 %v850_v22, %s2654_s3 }
 0xca9   :  { %v847_v32 = vpop.permute.xlu0 %846 }
 0xcaa   :  { %v851_v34 = vmul.f32 %v847_v32, %v830_v33 }
 0xcac   :  { %856 = vrot.lane.b32.xlu2 %v851_v34, %s2654_s3 }
 0xd05   :  { %v855_v45 = vpop.permute.xlu1 %854 }
 0xd06   :  { %v857_v46 = vpop.permute.xlu2 %856  ;;  %v2867_v44 = vadd.f32 %v855_v45, %v840_v39 }
 0xd07   :  { %v2869_v50 = vadd.f32 %v857_v46, %v841_v40 }
 0xd08   :  { %2329 = vtanh.f32 %v2867_v44  ;;  %v961_v45 = vrot.slane %v2867_v44, 7 }
 0xd09   :  { %2331 = vtanh.f32 %v2869_v50 }
 0xd0e   :  { %v2330_v54 = vpop.eup %2329 }
 0xd0f   :  { %v2332_v55 = vpop.eup %2331  ;;  %866 = vrot.lane.b32.xlu0 %v2330_v54, %s2653_s25 }
 0xd10   :  { %868 = vrot.lane.b32.xlu1 %v2332_v55, %s2653_s25 }
 0xd81   :  { %v867_v41 = vpop.permute.xlu0 %866 }
 0xd82   :  { %v869_v37 = vpop.permute.xlu1 %868  ;;  %v2875_v36 = vmul.f32 %v867_v41, %v815_v21 }
 0xd83   :  { %v2877_v56 = vmul.f32 %v869_v37, %v830_v33  ;;  %v962_v37 = vrot.slane %v2869_v50, 7 }
 0xd84   :  { %v885_v57 = vrot.slane %v2875_v36, 5 }
 0xd85   :  { %v886_v58 = vrot.slane %v2877_v56, 4 }
 0xd87   :  { %v887_v60 = vsel %vm263_vm9, %v886_v58, %v885_v57 }
 0xd88   :  { %888 = vrot.lane.b32.xlu2 %v887_v60, %s2654_s3 }
 0xde2   :  { %v889_v61 = vpop.permute.xlu2 %888 }
 0xde3   :  { %2193 = vmatmul.msk.f32.vlgmr.msrb.gmra.mxu0 %vm147_vm10, %v889_v61 }
 0xe60   :  { %v909_v63 = vpop.f32.mrf.mxu0 }
 0xe61   :  { %v913_v0 = vrot.slane %v909_v63, 2  ;;  %v914_v1 = vrot.slane %v909_v63, 3 }
 0xe63   :  { %v917_v2 = vadd.f32 %v913_v0, %v2735_v16  ;;  %v918_v3 = vadd.f32 %v914_v1, %v2732_v14 }
 0xe65   :  { %2333 = vtanh.f32 %v917_v2  ;;  %v2194_v6 = vmul.f32 -1.442695, %v917_v2  ;;  %v2195_v8 = vmul.f32 -1.442695, %v918_v3 }
 0xe66   :  { %2335 = vtanh.f32 %v918_v3 }
 0xe67   :  { %2337 = vpow2.f32 %v2194_v6 }
 0xe68   :  { %2339 = vpow2.f32 %v2195_v8 }
 0xe6b   :  { %v2334_v4 = vpop.eup %2333 }
 0xe6c   :  { %v2336_v5 = vpop.eup %2335  ;;  %969 = vrot.lane.b32.xlu0 %v2334_v4, %s2653_s25 }
 0xe6d   :  { %971 = vrot.lane.b32.xlu1 %v2336_v5, %s2653_s25  ;;  %v2338_v9 = vpop.eup %2337 }
 0xe6e   :  { %v2340_v10 = vpop.eup %2339  ;;  %v925_v11 = vadd.f32 1.0, %v2338_v9 }
 0xe6f   :  { %v926_v12 = vadd.f32 1.0, %v2340_v10 }
 0xe70   :  { %2341 = vrcp.f32 %v925_v11  ;;  %v938_v25 = vand.u32 2147483648, %v925_v11  ;;  %vm932_vm11 = vweird.f32 %v925_v11  ;;  %v936_v27 = vand.u32 2147483647, %v925_v11 }
 0xe71   :  { %2343 = vrcp.f32 %v926_v12  ;;  %v953_v26 = vand.u32 2147483648, %v926_v12  ;;  %vm947_vm12 = vweird.f32 %v926_v12  ;;  %v951_v28 = vand.u32 2147483647, %v926_v12 }
 0xe72   :  { %v939_v31 = vor.u32 1.1754944e-38, %v938_v25  ;;  %vm937_vm15 = vcmp.eq.f32.partialorder %v936_v27, 8.507059e+37 }
 0xe73   :  { %v954_v32 = vor.u32 1.1754944e-38, %v953_v26  ;;  %vm952_vm0 = vcmp.eq.f32.partialorder %v951_v28, 8.507059e+37 }
 0xe76   :  { %v2342_v13 = vpop.eup %2341 }
 0xe77   :  { %v2344_v15 = vpop.eup %2343  ;;  %v928_v17 = vmul.f32 %v2342_v13, %v925_v11  ;;  %vm933_vm7 = vweird.f32 %v2342_v13 }
 0xe78   :  { %v943_v18 = vmul.f32 %v2344_v15, %v926_v12  ;;  %vm948_vm8 = vweird.f32 %v2344_v15  ;;  %vm934_vm13 = vmor %vm932_vm11, %vm933_vm7  ;;  %vm259_vm11 = vcmask 253952  }
 0xe79   :  { %v929_v19 = vsub.f32 1.0, %v928_v17  ;;  %vm949_vm14 = vmor %vm947_vm12, %vm948_vm8  ;;  %vm632_vm12 = vcmask 257027  }
 0xe7a   :  { %v944_v20 = vsub.f32 1.0, %v943_v18 }
 0xe7b   :  { %v930_v21 = vmul.f32 %v2342_v13, %v929_v19 }
 0xe7c   :  { %v945_v22 = vmul.f32 %v2344_v15, %v944_v20 }
 0xe7d   :  { %v931_v23 = vadd.f32 %v2342_v13, %v930_v21 }
 0xe7e   :  { %v946_v24 = vadd.f32 %v2344_v15, %v945_v22 }
 0xe7f   :  { %v935_v29 = vsel %vm934_vm13, %v2342_v13, %v931_v23  ;;  %vm1007_vm13 = vcmask 260102  }
 0xe80   :  { %v950_v30 = vsel %vm949_vm14, %v2344_v15, %v946_v24  ;;  %v940_v34 = vsel %vm937_vm15, %v939_v31, %v935_v29  ;;  %vm383_vm14 = vcmask 254977   ;;  %vm757_vm15 = vcmask 258052  }
 0xe81   :  { %v955_v38 = vsel %vm952_vm0, %v954_v32, %v950_v30  ;;  %v965_v46 = vmul.f32 %v961_v45, %v940_v34  ;;  %vm507_vm0 = vcmask 256002  }
 0xe82   :  { %v966_v57 = vmul.f32 %v962_v37, %v955_v38 }
 0xede   :  { %v970_v33 = vpop.permute.xlu0 %969 }
 0xedf   :  { %v972_v35 = vpop.permute.xlu1 %971  ;;  %v975_v39 = vmul.f32 %v970_v33, %v940_v34 }
 0xee0   :  { %v976_v40 = vmul.f32 %v972_v35, %v955_v38 }
 0xee1   :  { %979 = vrot.lane.b32.xlu2 %v975_v39, %s2654_s3 }
 0xee2   :  { %981 = vrot.lane.b32.xlu0 %v976_v40, %s2654_s3 }
 0xf3b   :  { %v980_v54 = vpop.permute.xlu2 %979 }
 0xf3c   :  { %v2891_v55 = vadd.f32 %v980_v54, %v965_v46 }
 0xf3e   :  { %2345 = vtanh.f32 %v2891_v55 }
 0xf44   :  { %v2346_v41 = vpop.eup %2345 }
 0xf45   :  { %991 = vrot.lane.b32.xlu1 %v2346_v41, %s2653_s25 }
 0xf54   :  { %v982_v58 = vpop.permute.xlu0 %981 }
 0xf55   :  { %v2896_v60 = vadd.f32 %v982_v58, %v966_v57 }
 0xf57   :  { %2347 = vtanh.f32 %v2896_v60 }
 0xf5d   :  { %v2348_v61 = vpop.eup %2347 }
 0xf5e   :  { %993 = vrot.lane.b32.xlu2 %v2348_v61, %s2653_s25 }
 0xfb7   :  { %v992_v44 = vpop.permute.xlu1 %991 }
 0xfb8   :  { %v994_v63 = vpop.permute.xlu2 %993  ;;  %v2900_v0 = vmul.f32 %v992_v44, %v940_v34 }
 0xfb9   :  { %v2902_v1 = vmul.f32 %v994_v63, %v955_v38 }
 0xfba   :  { %v1010_v2 = vrot.slane %v2900_v0, 6 }
 0xfbb   :  { %v1011_v3 = vrot.slane %v2902_v1, 5 }
 0xfbd   :  { %v1012_v50 = vsel %vm263_vm9, %v1011_v3, %v1010_v2 }
 0xfbe   :  { %1013 = vrot.lane.b32.xlu0 %v1012_v50, %s2654_s3 }
0x1030   :  { %v1014_v4 = vpop.permute.xlu0 %1013 }
0x1031   :  { %2196 = vmatmul.msk.f32.vlgmr.msra.gmra.mxu1 %vm147_vm10, %v1014_v4 }
0x10ae   :  { %v1034_v5 = vpop.f32.mrf.mxu1 }
0x10af   :  { %v1038_v6 = vrot.slane %v1034_v5, 1  ;;  %v1039_v8 = vrot.slane %v1034_v5, 2 }
0x10b1   :  { %v1042_v9 = vadd.f32 %v1038_v6, %v2735_v16  ;;  %v1043_v10 = vadd.f32 %v1039_v8, %v2732_v14  ;;  %v1137_v8 = vld [vmem:[#allocation9 + $0x10] sm:$0xff] }
0x10b3   :  { %2349 = vtanh.f32 %v1042_v9  ;;  %v2198_v13 = vmul.f32 -1.442695, %v1043_v10  ;;  %v2197_v19 = vmul.f32 -1.442695, %v1042_v9  ;;  %v1142_v9 = vld [vmem:[#allocation11 + $0x18] sm:$0xff] }
0x10b4   :  { %2351 = vtanh.f32 %v1043_v10  ;;  %1190 = vmatpush.msra.mxu3 %v1142_v9  ;;  %v1141_v10 = vld [vmem:[#allocation11 + $0x10] sm:$0xff]  ;;  %1306 = vmatpush.msra.mxu0 %v1142_v9 }
0x10b5   :  { %2353 = vpow2.f32 %v2198_v13  ;;  %1428 = vmatpush.msrb.mxu1 %v1142_v9  ;;  %v1135_v13 = vld [vmem:[#allocation9] sm:$0xff] }
0x10b6   :  { %1191 = vmatpush.msra.mxu3 %v1141_v10  ;;  %1307 = vmatpush.msra.mxu0 %v1141_v10 }
0x10b7   :  { %1429 = vmatpush.msrb.mxu1 %v1141_v10 }
0x10b9   :  { %v2350_v11 = vpop.eup %2349 }
0x10ba   :  { %v2352_v12 = vpop.eup %2351  ;;  %1094 = vrot.lane.b32.xlu1 %v2350_v11, %s2653_s25  ;;  %v1136_v11 = vld [vmem:[#allocation9 + $0x8] sm:$0xff] }
0x10bb   :  { %1096 = vrot.lane.b32.xlu2 %v2352_v12, %s2653_s25  ;;  %v2354_v15 = vpop.eup %2353  ;;  %v1140_v12 = vld [vmem:[#allocation11 + $0x8] sm:$0xff] }
0x10bc   :  { %v1051_v17 = vadd.f32 1.0, %v2354_v15  ;;  %1192 = vmatpush.msra.mxu3 %v1140_v12  ;;  %1308 = vmatpush.msra.mxu0 %v1140_v12  ;;  %v1139_v15 = vld [vmem:[#allocation11] sm:$0xff] }
0x10bd   :  { %1430 = vmatpush.msrb.mxu1 %v1140_v12 }
0x10be   :  { %2355 = vrcp.f32 %v1051_v17  ;;  %v1078_v24 = vand.u32 2147483648, %v1051_v17  ;;  %vm1072_vm2 = vweird.f32 %v1051_v17  ;;  %v1076_v25 = vand.u32 2147483647, %v1051_v17  ;;  %1193 = vmatpush.msra.mxu3 %v1139_v15  ;;  %1309 = vmatpush.msra.mxu0 %v1139_v15 }
0x10bf   :  { %2357 = vpow2.f32 %v2197_v19  ;;  %1194 = vmatmul.f32.vlgmr.msra.gmra.mxu3 %v2652_v7  ;;  %1431 = vmatpush.msrb.mxu1 %v1139_v15 }
0x10c0   :  { %v1079_v27 = vor.u32 1.1754944e-38, %v1078_v24  ;;  %vm1077_vm4 = vcmp.eq.f32.partialorder %v1076_v25, 8.507059e+37  ;;  %1552 = vmatpush.msrb.mxu3 %v1142_v9  ;;  %1676 = vmatpush.msrb.mxu0 %v1142_v9 }
0x10c1   :  { %1800 = vmatpush.msra.mxu1 %v1142_v9 }
0x10c2   :  { %1553 = vmatpush.msrb.mxu3 %v1141_v10  ;;  %1677 = vmatpush.msrb.mxu0 %v1141_v10 }
0x10c3   :  { %1801 = vmatpush.msra.mxu1 %v1141_v10 }
0x10c4   :  { %v2356_v18 = vpop.eup %2355  ;;  %1554 = vmatpush.msrb.mxu3 %v1140_v12  ;;  %1678 = vmatpush.msrb.mxu0 %v1140_v12 }
0x10c5   :  { %v1068_v20 = vmul.f32 %v2356_v18, %v1051_v17  ;;  %v2358_v21 = vpop.eup %2357  ;;  %vm1073_vm1 = vweird.f32 %v2356_v18  ;;  %1802 = vmatpush.msra.mxu1 %v1140_v12 }
0x10c6   :  { %v1050_v22 = vadd.f32 1.0, %v2358_v21  ;;  %vm1074_vm3 = vmor %vm1072_vm2, %vm1073_vm1  ;;  %vm3224_vm1 = vcmask 259077   ;;  %1555 = vmatpush.msrb.mxu3 %v1139_v15  ;;  %1679 = vmatpush.msrb.mxu0 %v1139_v15  ;;  %vm3223_vm2 = vcmask 261127  }
0x10c7   :  { %v1069_v16 = vsub.f32 1.0, %v1068_v20  ;;  %1803 = vmatpush.msra.mxu1 %v1139_v15 }
0x10c8   :  { %2359 = vrcp.f32 %v1050_v22  ;;  %v1063_v38 = vand.u32 2147483648, %v1050_v22  ;;  %vm1057_vm6 = vweird.f32 %v1050_v22  ;;  %v1061_v39 = vand.u32 2147483647, %v1050_v22  ;;  %2048 = vmatpush.msra.mxu3 %v1142_v9 }
0x10c9   :  { %v1070_v14 = vmul.f32 %v2356_v18, %v1069_v16  ;;  %v2236_v16 = vld [vmem:[%s3221_s6] ss:$0 sm:$0xff]  ;;  %s2655_s6 = smov [#allocation12]  }
0x10ca   :  { %v1064_v45 = vor.u32 1.1754944e-38, %v1063_v38  ;;  %vm1062_vm8 = vcmp.eq.f32.partialorder %v1061_v39, 8.507059e+37  ;;  %2049 = vmatpush.msra.mxu3 %v1141_v10  ;;  %s2157_s28 = sshll.u32 %s2655_s6, 4  ;;  %s2158_s28 = int_to_ptr.vmem [resolvable:$true] %s2157_s28 }
0x10cb   :  { %v1071_v23 = vadd.f32 %v2356_v18, %v1070_v14 }
0x10cc   :  { %2050 = vmatpush.msra.mxu3 %v1140_v12 }
0x10cd   :  { %v1075_v26 = vsel %vm1074_vm3, %v2356_v18, %v1071_v23 }
0x10ce   :  { %v2913_v29 = vsel %vm1077_vm4, %v1079_v27, %v1075_v26  ;;  %v2360_v30 = vpop.eup %2359  ;;  %2051 = vmatpush.msra.mxu3 %v1139_v15 }
0x10cf   :  { %v1053_v32 = vmul.f32 %v2360_v30, %v1050_v22  ;;  %vm1058_vm5 = vweird.f32 %v2360_v30 }
0x10d0   :  { %vm1059_vm7 = vmor %vm1057_vm6, %vm1058_vm5 }
0x10d1   :  { %v1054_v33 = vsub.f32 1.0, %v1053_v32 }
0x10d3   :  { %v1055_v34 = vmul.f32 %v2360_v30, %v1054_v33 }
0x10d5   :  { %v1056_v35 = vadd.f32 %v2360_v30, %v1055_v34 }
0x10d7   :  { %v1060_v40 = vsel %vm1059_vm7, %v2360_v30, %v1056_v35 }
0x10d8   :  { %v1065_v54 = vsel %vm1062_vm8, %v1064_v45, %v1060_v40 }
0x1115   :  { %v1097_v28 = vpop.permute.xlu2 %1096 }
0x1116   :  { %v1101_v31 = vmul.f32 %v1097_v28, %v2913_v29 }
0x1118   :  { %1106 = vrot.lane.b32.xlu1 %v1101_v31, %s2654_s3 }
0x1120   :  { %253 = vrot.lane.b32.xlu1 %v2753_v62, %s2654_s3  ;;  %v1087_v62 = vrot.slane %v2896_v60, 7 }
0x1128   :  { %626 = vrot.lane.b32.xlu1 %v2825_v43, %s2654_s3  ;;  %v1091_v43 = vmul.f32 %v1087_v62, %v2913_v29 }
0x112c   :  { %v1095_v46 = vpop.permute.xlu1 %1094 }
0x112d   :  { %v1100_v41 = vmul.f32 %v1095_v46, %v1065_v54 }
0x112f   :  { %1104 = vrot.lane.b32.xlu0 %v1100_v41, %s2654_s3 }
0x1130   :  { %1001 = vrot.lane.b32.xlu1 %v2900_v0, %s2654_s3 }
0x1138   :  { %379 = vrot.lane.b32.xlu1 %v2777_v53, %s2654_s3  ;;  %v1086_v53 = vrot.slane %v2891_v55, 7 }
0x1140   :  { %753 = vrot.lane.b32.xlu1 %v2852_v42, %s2654_s3  ;;  %v1090_v42 = vmul.f32 %v1086_v53, %v1065_v54 }
0x1142   :  { %v1195_v14 = vpop.f32.mrf.mxu3 }
0x1143   :  { %v1199_v25 = vrot.slane %v1195_v14, 1 }
0x118a   :  { %v1107_v37 = vpop.permute.xlu1 %1106 }
0x118b   :  { %v1111_v57 = vadd.f32 %v1107_v37, %v1091_v43 }
0x118d   :  { %2361 = vtanh.f32 %v1111_v57 }
0x1192   :  { %v254_v58 = vpop.permute.xlu1 %253 }
0x1193   :  { %v2362_v61 = vpop.eup %2361  ;;  %260 = vst.msk [vmem:[#allocation2] sm:$0x1] %vm259_vm11, %v254_v58 }
0x1194   :  { %1118 = vrot.lane.b32.xlu0 %v2362_v61, %s2653_s25 }
0x119a   :  { %v627_v44 = vpop.permute.xlu1 %626 }
0x119b   :  { %633 = vst.msk [vmem:[#allocation2] sm:$0x8] %vm632_vm12, %v627_v44 }
0x119c   :  { %501 = vrot.lane.b32.xlu0 %v2800_v47, %s2654_s3 }
0x11a1   :  { %v1105_v60 = vpop.permute.xlu0 %1104 }
0x11a2   :  { %v1002_v63 = vpop.permute.xlu1 %1001  ;;  %v1110_v0 = vadd.f32 %v1105_v60, %v1090_v42 }
0x11a3   :  { %1008 = vst.msk [vmem:[#allocation2] sm:$0x40] %vm1007_vm13, %v1002_v63 }
0x11a4   :  { %2363 = vtanh.f32 %v1110_v0  ;;  %876 = vrot.lane.b32.xlu0 %v2875_v36, %s2654_s3 }
0x11aa   :  { %v2364_v2 = vpop.eup %2363  ;;  %v380_v3 = vpop.permute.xlu1 %379 }
0x11ab   :  { %385 = vst.msk [vmem:[#allocation2 + $0x8] sm:$0x2] %vm383_vm14, %v380_v3  ;;  %1116 = vrot.lane.b32.xlu2 %v2364_v2, %s2653_s25 }
0x11ac   :  { %255 = vrot.lane.b32.xlu0 %v2750_v59, %s2654_s3 }
0x11b2   :  { %v754_v47 = vpop.permute.xlu1 %753 }
0x11b3   :  { %759 = vst.msk [vmem:[#allocation2 + $0x8] sm:$0x10] %vm757_vm15, %v754_v47  ;;  %377 = vrot.lane.b32.xlu2 %v2775_v52, %s2654_s3 }
0x11b4   :  { %628 = vrot.lane.b32.xlu0 %v2827_v49, %s2654_s3 }
0x11bb   :  { %751 = vrot.lane.b32.xlu2 %v2850_v51, %s2654_s3 }
0x11bc   :  { %1003 = vrot.lane.b32.xlu0 %v2902_v1, %s2654_s3 }
0x11c3   :  { %503 = vrot.lane.b32.xlu2 %v2802_v48, %s2654_s3 }
0x1205   :  { %v1117_v59 = vpop.permute.xlu2 %1116 }
0x1206   :  { %v1119_v36 = vpop.permute.xlu0 %1118  ;;  %v1122_v55 = vmul.f32 %v1117_v59, %v1065_v54 }
0x1207   :  { %v1123_v50 = vmul.f32 %v1119_v36, %v2913_v29 }
0x1208   :  { %1126 = vrot.lane.b32.xlu2 %v1122_v55, %s2654_s3 }
0x1209   :  { %1128 = vrot.lane.b32.xlu1 %v1123_v50, %s2654_s3 }
0x120d   :  { %v378_v52 = vpop.permute.xlu2 %377 }
0x120e   :  { %v502_v49 = vpop.permute.xlu0 %501  ;;  %384 = vst.msk [vmem:[#allocation2] sm:$0x2] %vm383_vm14, %v378_v52 }
0x120f   :  { %508 = vst.msk [vmem:[#allocation2] sm:$0x4] %vm507_vm0, %v502_v49 }
0x1210   :  { %878 = vrot.lane.b32.xlu2 %v2877_v56, %s2654_s3  ;;  %v1138_v56 = vld [vmem:[#allocation9 + $0x18] sm:$0xff] }
0x1211   :  { %1167 = vmatpush.msra.mxu2 %v1138_v56 }
0x1213   :  { %1168 = vmatpush.msra.mxu2 %v1137_v8 }
0x1215   :  { %v752_v48 = vpop.permute.xlu2 %751  ;;  %1169 = vmatpush.msra.mxu2 %v1136_v11 }
0x1216   :  { %v877_v51 = vpop.permute.xlu0 %876  ;;  %758 = vst.msk [vmem:[#allocation2] sm:$0x10] %vm757_vm15, %v752_v48 }
0x1217   :  { %883 = vst.msk [vmem:[#allocation2] sm:$0x20] %vm3224_vm1, %v877_v51  ;;  %1170 = vmatpush.msra.mxu2 %v1135_v13 }
0x1219   :  { %1924 = vmatpush.msrb.mxu2 %v1142_v9 }
0x121b   :  { %1925 = vmatpush.msrb.mxu2 %v1141_v10 }
0x121d   :  { %v504_v1 = vpop.permute.xlu2 %503  ;;  %1926 = vmatpush.msrb.mxu2 %v1140_v12 }
0x121e   :  { %v256_v4 = vpop.permute.xlu0 %255  ;;  %509 = vst.msk [vmem:[#allocation2 + $0x8] sm:$0x4] %vm507_vm0, %v504_v1 }
0x121f   :  { %261 = vst.msk [vmem:[#allocation2 + $0x8] sm:$0x1] %vm259_vm11, %v256_v4  ;;  %1927 = vmatpush.msrb.mxu2 %v1139_v15 }
0x1226   :  { %v629_v5 = vpop.permute.xlu0 %628 }
0x1227   :  { %634 = vst.msk [vmem:[#allocation2 + $0x8] sm:$0x8] %vm632_vm12, %v629_v5 }
0x122e   :  { %v1004_v6 = vpop.permute.xlu0 %1003 }
0x122f   :  { %1009 = vst.msk [vmem:[#allocation2 + $0x8] sm:$0x40] %vm1007_vm13, %v1004_v6 }
0x1262   :  { %v1127_v7 = vpop.permute.xlu2 %1126 }
0x1263   :  { %1133 = vst.msk [vmem:[#allocation2] sm:$0x80] %vm3223_vm2, %v1127_v7 }
0x126a   :  { %v879_v17 = vpop.permute.xlu2 %878  ;;  %v1144_v18 = vld [vmem:[#allocation2] sm:$0xff] }
0x126b   :  { %884 = vst.msk [vmem:[#allocation2 + $0x8] sm:$0x20] %vm3224_vm1, %v879_v17  ;;  %2199 = vmatmul.msk.f32.vlgmr.msra.gmra.mxu2 %vm147_vm10, %v1144_v18 }
0x127b   :  { %v1129_v19 = vpop.permute.xlu1 %1128 }
0x127c   :  { %1134 = vst.msk [vmem:[#allocation2 + $0x8] sm:$0x80] %vm3223_vm2, %v1129_v19 }
0x1283   :  { %v1145_v20 = vld [vmem:[#allocation2 + $0x8] sm:$0xff] }
0x1284   :  { %2200 = vmatmul.msk.f32.gmra.mxu2 %vm147_vm10, %v1145_v20 }
0x12ee   :  { %v1172_v21 = vpop.f32.mrf.mxu2 }
0x12ef   :  { %v2976_v22 = vadd.f32 %v2236_v16, %v1172_v21 }
0x12f1   :  { %v1202_v23 = vadd.f32 %v1195_v14, %v2976_v22 }
0x12f3   :  { %2365 = vtanh.f32 %v1202_v23  ;;  %v2201_v30 = vmul.f32 -1.442695, %v1202_v23 }
0x12f9   :  { %v2366_v24 = vpop.eup %2365 }
0x12fa   :  { %1248 = vrot.lane.b32.xlu0 %v2366_v24, %s2653_s25 }
0x1307   :  { %v1175_v26 = vpop.f32.mrf.mxu2 }
0x1308   :  { %v2980_v27 = vadd.f32 %v2236_v16, %v1175_v26 }
0x130a   :  { %v1203_v28 = vadd.f32 %v1199_v25, %v2980_v27 }
0x130c   :  { %2367 = vtanh.f32 %v1203_v28  ;;  %v2202_v31 = vmul.f32 -1.442695, %v1203_v28 }
0x130d   :  { %2369 = vpow2.f32 %v2201_v30 }
0x130e   :  { %2371 = vpow2.f32 %v2202_v31 }
0x1312   :  { %v2368_v29 = vpop.eup %2367 }
0x1313   :  { %1250 = vrot.lane.b32.xlu2 %v2368_v29, %s2653_s25  ;;  %v2370_v32 = vpop.eup %2369 }
0x1314   :  { %v2372_v33 = vpop.eup %2371  ;;  %v1210_v34 = vadd.f32 1.0, %v2370_v32 }
0x1315   :  { %v1211_v35 = vadd.f32 1.0, %v2372_v33 }
0x1316   :  { %2373 = vrcp.f32 %v1210_v34  ;;  %v1223_v37 = vand.u32 2147483648, %v1210_v34  ;;  %vm1217_vm5 = vweird.f32 %v1210_v34  ;;  %v1221_v58 = vand.u32 2147483647, %v1210_v34 }
0x1317   :  { %2375 = vrcp.f32 %v1211_v35  ;;  %v1238_v61 = vand.u32 2147483648, %v1211_v35  ;;  %vm1232_vm7 = vweird.f32 %v1211_v35  ;;  %v1236_v44 = vand.u32 2147483647, %v1211_v35 }
0x1318   :  { %v1224_v42 = vor.u32 1.1754944e-38, %v1223_v37  ;;  %vm1222_vm2 = vcmp.eq.f32.partialorder %v1221_v58, 8.507059e+37 }
0x1319   :  { %v1239_v63 = vor.u32 1.1754944e-38, %v1238_v61  ;;  %vm1237_vm1 = vcmp.eq.f32.partialorder %v1236_v44, 8.507059e+37 }
0x131c   :  { %v2374_v38 = vpop.eup %2373 }
0x131d   :  { %v2376_v39 = vpop.eup %2375  ;;  %v1213_v40 = vmul.f32 %v2374_v38, %v1210_v34  ;;  %vm1218_vm3 = vweird.f32 %v2374_v38 }
0x131e   :  { %v1228_v45 = vmul.f32 %v2376_v39, %v1211_v35  ;;  %vm1233_vm4 = vweird.f32 %v2376_v39  ;;  %vm1219_vm6 = vmor %vm1217_vm5, %vm1218_vm3 }
0x131f   :  { %v1214_v46 = vsub.f32 1.0, %v1213_v40  ;;  %vm1234_vm8 = vmor %vm1232_vm7, %vm1233_vm4 }
0x1320   :  { %v1229_v54 = vsub.f32 1.0, %v1228_v45 }
0x1321   :  { %v1215_v41 = vmul.f32 %v2374_v38, %v1214_v46 }
0x1322   :  { %v1230_v62 = vmul.f32 %v2376_v39, %v1229_v54 }
0x1323   :  { %v1216_v43 = vadd.f32 %v2374_v38, %v1215_v41 }
0x1324   :  { %v1231_v57 = vadd.f32 %v2376_v39, %v1230_v62 }
0x1325   :  { %v1220_v53 = vsel %vm1219_vm6, %v2374_v38, %v1216_v43 }
0x1326   :  { %v1235_v60 = vsel %vm1234_vm8, %v2376_v39, %v1231_v57  ;;  %v1225_v2 = vsel %vm1222_vm2, %v1224_v42, %v1220_v53 }
0x1327   :  { %v1240_v59 = vsel %vm1237_vm1, %v1239_v63, %v1235_v60  ;;  %v1244_v55 = vmul.f32 0.0, %v1225_v2 }
0x1328   :  { %v1245_v48 = vmul.f32 0.0, %v1240_v59 }
0x136c   :  { %v1249_v0 = vpop.permute.xlu0 %1248 }
0x136d   :  { %v1254_v3 = vmul.f32 %v1249_v0, %v1225_v2  ;;  %v1251_v47 = vpop.permute.xlu2 %1250 }
0x136e   :  { %v1255_v36 = vmul.f32 %v1251_v47, %v1240_v59 }
0x136f   :  { %1258 = vrot.lane.b32.xlu2 %v1254_v3, %s2654_s3 }
0x1370   :  { %1260 = vrot.lane.b32.xlu1 %v1255_v36, %s2654_s3 }
0x13c9   :  { %v1259_v50 = vpop.permute.xlu2 %1258 }
0x13ca   :  { %v2986_v52 = vadd.f32 %v1259_v50, %v1244_v55 }
0x13cc   :  { %2377 = vtanh.f32 %v2986_v52  ;;  %v1362_v44 = vrot.slane %v2986_v52, 7 }
0x13d2   :  { %v2378_v49 = vpop.eup %2377 }
0x13d3   :  { %1270 = vrot.lane.b32.xlu1 %v2378_v49, %s2653_s25 }
0x13e2   :  { %v1261_v51 = vpop.permute.xlu1 %1260 }
0x13e3   :  { %v2990_v1 = vadd.f32 %v1261_v51, %v1245_v48 }
0x13e5   :  { %2379 = vtanh.f32 %v2990_v1  ;;  %v1363_v0 = vrot.slane %v2990_v1, 7 }
0x13eb   :  { %v2380_v4 = vpop.eup %2379 }
0x13ec   :  { %1272 = vrot.lane.b32.xlu0 %v2380_v4, %s2653_s25 }
0x1445   :  { %v1271_v5 = vpop.permute.xlu1 %1270 }
0x1446   :  { %v2996_v8 = vmul.f32 %v1271_v5, %v1225_v2 }
0x145e   :  { %v1273_v6 = vpop.permute.xlu0 %1272 }
0x145f   :  { %v2994_v56 = vmul.f32 %v1273_v6, %v1240_v59 }
0x1461   :  { %v1288_v9 = vrot.slane %v2994_v56, 7 }
0x1463   :  { %v1289_v10 = vsel %vm263_vm9, %v1288_v9, %v2996_v8 }
0x1464   :  { %1290 = vrot.lane.b32.xlu2 %v1289_v10, %s2654_s3 }
0x14be   :  { %v1291_v11 = vpop.permute.xlu2 %1290 }
0x14bf   :  { %2203 = vmatmul.msk.f32.vlgmr.msra.gmra.mxu0 %vm147_vm10, %v1291_v11 }
0x153c   :  { %v1311_v12 = vpop.f32.mrf.mxu0 }
0x153d   :  { %v1315_v13 = vrot.slane %v1311_v12, 7  ;;  %v1319_v15 = vadd.f32 %v1311_v12, %v2980_v27 }
0x153f   :  { %v1318_v7 = vadd.f32 %v1315_v13, %v2976_v22  ;;  %2381 = vtanh.f32 %v1319_v15  ;;  %v2205_v19 = vmul.f32 -1.442695, %v1319_v15 }
0x1541   :  { %2383 = vtanh.f32 %v1318_v7  ;;  %v2204_v20 = vmul.f32 -1.442695, %v1318_v7 }
0x1542   :  { %2385 = vpow2.f32 %v2205_v19 }
0x1543   :  { %2387 = vpow2.f32 %v2204_v20 }
0x1545   :  { %v2382_v17 = vpop.eup %2381 }
0x1546   :  { %1372 = vrot.lane.b32.xlu1 %v2382_v17, %s2653_s25 }
0x1547   :  { %v2384_v18 = vpop.eup %2383 }
0x1548   :  { %1370 = vrot.lane.b32.xlu0 %v2384_v18, %s2653_s25  ;;  %v2386_v16 = vpop.eup %2385 }
0x1549   :  { %v2388_v21 = vpop.eup %2387  ;;  %v1327_v14 = vadd.f32 1.0, %v2386_v16 }
0x154a   :  { %v1326_v23 = vadd.f32 1.0, %v2388_v21 }
0x154b   :  { %2389 = vrcp.f32 %v1327_v14  ;;  %v1354_v34 = vand.u32 2147483648, %v1327_v14  ;;  %vm1348_vm2 = vweird.f32 %v1327_v14  ;;  %v1352_v35 = vand.u32 2147483647, %v1327_v14 }
0x154c   :  { %2391 = vrcp.f32 %v1326_v23  ;;  %v1339_v40 = vand.u32 2147483648, %v1326_v23  ;;  %vm1333_vm5 = vweird.f32 %v1326_v23  ;;  %v1337_v46 = vand.u32 2147483647, %v1326_v23 }
0x154d   :  { %v1355_v45 = vor.u32 1.1754944e-38, %v1354_v34  ;;  %vm1353_vm6 = vcmp.eq.f32.partialorder %v1352_v35, 8.507059e+37 }
0x154e   :  { %v1340_v37 = vor.u32 1.1754944e-38, %v1339_v40  ;;  %vm1338_vm8 = vcmp.eq.f32.partialorder %v1337_v46, 8.507059e+37 }
0x1551   :  { %v2390_v24 = vpop.eup %2389 }
0x1552   :  { %v2392_v25 = vpop.eup %2391  ;;  %v1344_v26 = vmul.f32 %v2390_v24, %v1327_v14  ;;  %vm1349_vm1 = vweird.f32 %v2390_v24 }
0x1553   :  { %v1329_v28 = vmul.f32 %v2392_v25, %v1326_v23  ;;  %vm1350_vm3 = vmor %vm1348_vm2, %vm1349_vm1  ;;  %vm1334_vm4 = vweird.f32 %v2392_v25 }
0x1554   :  { %v1345_v29 = vsub.f32 1.0, %v1344_v26  ;;  %vm1335_vm7 = vmor %vm1333_vm5, %vm1334_vm4 }
0x1555   :  { %v1330_v30 = vsub.f32 1.0, %v1329_v28 }
0x1556   :  { %v1346_v31 = vmul.f32 %v2390_v24, %v1345_v29 }
0x1557   :  { %v1331_v32 = vmul.f32 %v2392_v25, %v1330_v30 }
0x1558   :  { %v1347_v33 = vadd.f32 %v2390_v24, %v1346_v31 }
0x1559   :  { %v1332_v38 = vadd.f32 %v2392_v25, %v1331_v32 }
0x155a   :  { %v1351_v39 = vsel %vm1350_vm3, %v2390_v24, %v1347_v33 }
0x155b   :  { %v1356_v41 = vsel %vm1353_vm6, %v1355_v45, %v1351_v39  ;;  %v1336_v62 = vsel %vm1335_vm7, %v2392_v25, %v1332_v38 }
0x155c   :  { %v1341_v58 = vsel %vm1338_vm8, %v1340_v37, %v1336_v62  ;;  %v1367_v2 = vmul.f32 %v1363_v0, %v1356_v41 }
0x155d   :  { %v1366_v53 = vmul.f32 %v1362_v44, %v1341_v58 }
0x15b8   :  { %v1373_v54 = vpop.permute.xlu1 %1372 }
0x15b9   :  { %v1377_v43 = vmul.f32 %v1373_v54, %v1356_v41 }
0x15ba   :  { %v1371_v57 = vpop.permute.xlu0 %1370 }
0x15bb   :  { %1382 = vrot.lane.b32.xlu0 %v1377_v43, %s2654_s3  ;;  %v1376_v61 = vmul.f32 %v1371_v57, %v1341_v58 }
0x15bd   :  { %1380 = vrot.lane.b32.xlu2 %v1376_v61, %s2654_s3 }
0x1617   :  { %v1381_v42 = vpop.permute.xlu2 %1380 }
0x1618   :  { %v3010_v60 = vadd.f32 %v1381_v42, %v1366_v53 }
0x161a   :  { %2393 = vtanh.f32 %v3010_v60  ;;  %v1485_v61 = vrot.slane %v3010_v60, 7 }
0x1620   :  { %v2394_v63 = vpop.eup %2393 }
0x1621   :  { %1392 = vrot.lane.b32.xlu1 %v2394_v63, %s2653_s25 }
0x162d   :  { %v1383_v3 = vpop.permute.xlu0 %1382 }
0x162e   :  { %v3015_v47 = vadd.f32 %v1383_v3, %v1367_v2 }
0x1630   :  { %2395 = vtanh.f32 %v3015_v47  ;;  %v1486_v62 = vrot.slane %v3015_v47, 7 }
0x1636   :  { %v2396_v59 = vpop.eup %2395 }
0x1637   :  { %1394 = vrot.lane.b32.xlu2 %v2396_v59, %s2653_s25 }
0x1691   :  { %v1395_v36 = vpop.permute.xlu2 %1394 }
0x1692   :  { %v3021_v52 = vmul.f32 %v1395_v36, %v1356_v41 }
0x1693   :  { %v1393_v55 = vpop.permute.xlu1 %1392 }
0x1694   :  { %v3019_v50 = vmul.f32 %v1393_v55, %v1341_v58 }
0x1696   :  { %v1410_v49 = vrot.slane %v3019_v50, 1 }
0x1698   :  { %v1411_v48 = vsel %vm263_vm9, %v3021_v52, %v1410_v49 }
0x1699   :  { %1412 = vrot.lane.b32.xlu0 %v1411_v48, %s2654_s3 }
0x170b   :  { %v1413_v51 = vpop.permute.xlu0 %1412 }
0x170c   :  { %2206 = vmatmul.msk.f32.vlgmr.msrb.gmra.mxu1 %vm147_vm10, %v1413_v51 }
0x1789   :  { %v1433_v1 = vpop.f32.mrf.mxu1 }
0x178a   :  { %v1437_v4 = vrot.slane %v1433_v1, 6  ;;  %v1438_v5 = vrot.slane %v1433_v1, 7 }
0x178c   :  { %v1441_v6 = vadd.f32 %v1437_v4, %v2976_v22  ;;  %v1442_v9 = vadd.f32 %v1438_v5, %v2980_v27 }
0x178e   :  { %2397 = vtanh.f32 %v1441_v6  ;;  %v2208_v12 = vmul.f32 -1.442695, %v1442_v9  ;;  %v2207_v17 = vmul.f32 -1.442695, %v1441_v6 }
0x178f   :  { %2399 = vtanh.f32 %v1442_v9 }
0x1790   :  { %2401 = vpow2.f32 %v2208_v12 }
0x1794   :  { %v2398_v10 = vpop.eup %2397 }
0x1795   :  { %v2400_v11 = vpop.eup %2399  ;;  %1493 = vrot.lane.b32.xlu1 %v2398_v10, %s2653_s25 }
0x1796   :  { %1495 = vrot.lane.b32.xlu2 %v2400_v11, %s2653_s25  ;;  %v2402_v13 = vpop.eup %2401 }
0x1797   :  { %v1450_v15 = vadd.f32 1.0, %v2402_v13 }
0x1799   :  { %2403 = vrcp.f32 %v1450_v15  ;;  %v1477_v23 = vand.u32 2147483648, %v1450_v15  ;;  %vm1471_vm2 = vweird.f32 %v1450_v15  ;;  %v1475_v24 = vand.u32 2147483647, %v1450_v15 }
0x179a   :  { %2405 = vpow2.f32 %v2207_v17 }
0x179b   :  { %v1478_v26 = vor.u32 1.1754944e-38, %v1477_v23  ;;  %vm1476_vm4 = vcmp.eq.f32.partialorder %v1475_v24, 8.507059e+37 }
0x179f   :  { %v2404_v7 = vpop.eup %2403 }
0x17a0   :  { %v1467_v18 = vmul.f32 %v2404_v7, %v1450_v15  ;;  %v2406_v20 = vpop.eup %2405  ;;  %vm1472_vm1 = vweird.f32 %v2404_v7 }
0x17a1   :  { %v1449_v21 = vadd.f32 1.0, %v2406_v20  ;;  %vm1473_vm3 = vmor %vm1471_vm2, %vm1472_vm1 }
0x17a2   :  { %v1468_v19 = vsub.f32 1.0, %v1467_v18 }
0x17a3   :  { %2407 = vrcp.f32 %v1449_v21  ;;  %v1462_v38 = vand.u32 2147483648, %v1449_v21  ;;  %vm1456_vm6 = vweird.f32 %v1449_v21  ;;  %v1460_v39 = vand.u32 2147483647, %v1449_v21 }
0x17a4   :  { %v1469_v16 = vmul.f32 %v2404_v7, %v1468_v19 }
0x17a5   :  { %v1463_v45 = vor.u32 1.1754944e-38, %v1462_v38  ;;  %vm1461_vm8 = vcmp.eq.f32.partialorder %v1460_v39, 8.507059e+37 }
0x17a6   :  { %v1470_v14 = vadd.f32 %v2404_v7, %v1469_v16 }
0x17a8   :  { %v1474_v25 = vsel %vm1473_vm3, %v2404_v7, %v1470_v14 }
0x17a9   :  { %v1479_v29 = vsel %vm1476_vm4, %v1478_v26, %v1474_v25  ;;  %v2408_v30 = vpop.eup %2407 }
0x17aa   :  { %v1452_v32 = vmul.f32 %v2408_v30, %v1449_v21  ;;  %vm1457_vm5 = vweird.f32 %v2408_v30  ;;  %v1490_v43 = vmul.f32 %v1486_v62, %v1479_v29 }
0x17ab   :  { %vm1458_vm7 = vmor %vm1456_vm6, %vm1457_vm5 }
0x17ac   :  { %v1453_v33 = vsub.f32 1.0, %v1452_v32 }
0x17ae   :  { %v1454_v34 = vmul.f32 %v2408_v30, %v1453_v33 }
0x17b0   :  { %v1455_v35 = vadd.f32 %v2408_v30, %v1454_v34 }
0x17b2   :  { %v1459_v40 = vsel %vm1458_vm7, %v2408_v30, %v1455_v35 }
0x17b3   :  { %v1464_v54 = vsel %vm1461_vm8, %v1463_v45, %v1459_v40 }
0x17b4   :  { %v1489_v44 = vmul.f32 %v1485_v61, %v1464_v54 }
0x17f0   :  { %v1496_v28 = vpop.permute.xlu2 %1495 }
0x17f1   :  { %v1500_v31 = vmul.f32 %v1496_v28, %v1479_v29 }
0x17f3   :  { %1505 = vrot.lane.b32.xlu1 %v1500_v31, %s2654_s3 }
0x1807   :  { %v1494_v46 = vpop.permute.xlu1 %1493 }
0x1808   :  { %v1499_v41 = vmul.f32 %v1494_v46, %v1464_v54 }
0x180a   :  { %1503 = vrot.lane.b32.xlu0 %v1499_v41, %s2654_s3 }
0x1865   :  { %v1506_v37 = vpop.permute.xlu1 %1505 }
0x1866   :  { %v3035_v57 = vadd.f32 %v1506_v37, %v1490_v43 }
0x1868   :  { %2409 = vtanh.f32 %v3035_v57 }
0x186e   :  { %v2410_v58 = vpop.eup %2409 }
0x186f   :  { %1517 = vrot.lane.b32.xlu0 %v2410_v58, %s2653_s25 }
0x187c   :  { %v1504_v53 = vpop.permute.xlu0 %1503 }
0x187d   :  { %v3040_v42 = vadd.f32 %v1504_v53, %v1489_v44 }
0x187f   :  { %2411 = vtanh.f32 %v3040_v42  ;;  %v1609_v46 = vrot.slane %v3040_v42, 7 }
0x1885   :  { %v2412_v63 = vpop.eup %2411 }
0x1886   :  { %1515 = vrot.lane.b32.xlu2 %v2412_v63, %s2653_s25 }
0x18e0   :  { %v1516_v0 = vpop.permute.xlu2 %1515 }
0x18e1   :  { %v1518_v2 = vpop.permute.xlu0 %1517  ;;  %v3044_v3 = vmul.f32 %v1516_v0, %v1464_v54  ;;  %v1610_v54 = vrot.slane %v3035_v57, 7 }
0x18e2   :  { %v3046_v47 = vmul.f32 %v1518_v2, %v1479_v29 }
0x18e3   :  { %v1533_v59 = vrot.slane %v3044_v3, 2 }
0x18e4   :  { %v1534_v36 = vrot.slane %v3046_v47, 1 }
0x18e6   :  { %v1535_v60 = vsel %vm263_vm9, %v1534_v36, %v1533_v59 }
0x18e7   :  { %1536 = vrot.lane.b32.xlu1 %v1535_v60, %s2654_s3 }
0x1959   :  { %v1537_v55 = vpop.permute.xlu1 %1536 }
0x195a   :  { %2209 = vmatmul.msk.f32.vlgmr.msrb.gmra.mxu3 %vm147_vm10, %v1537_v55 }
0x19dd   :  { %v1557_v49 = vpop.f32.mrf.mxu3 }
0x19de   :  { %v1561_v48 = vrot.slane %v1557_v49, 5  ;;  %v1562_v51 = vrot.slane %v1557_v49, 6 }
0x19e0   :  { %v1565_v1 = vadd.f32 %v1561_v48, %v2976_v22  ;;  %v1566_v4 = vadd.f32 %v1562_v51, %v2980_v27 }
0x19e2   :  { %2413 = vtanh.f32 %v1565_v1  ;;  %v2210_v9 = vmul.f32 -1.442695, %v1565_v1  ;;  %v2211_v13 = vmul.f32 -1.442695, %v1566_v4 }
0x19e3   :  { %2415 = vtanh.f32 %v1566_v4 }
0x19e4   :  { %2417 = vpow2.f32 %v2210_v9 }
0x19e8   :  { %v2414_v5 = vpop.eup %2413 }
0x19e9   :  { %v2416_v6 = vpop.eup %2415  ;;  %1617 = vrot.lane.b32.xlu2 %v2414_v5, %s2653_s25 }
0x19ea   :  { %1619 = vrot.lane.b32.xlu0 %v2416_v6, %s2653_s25  ;;  %v2418_v10 = vpop.eup %2417 }
0x19eb   :  { %v1573_v11 = vadd.f32 1.0, %v2418_v10 }
0x19ed   :  { %2419 = vrcp.f32 %v1573_v11  ;;  %v1586_v16 = vand.u32 2147483648, %v1573_v11  ;;  %vm1580_vm2 = vweird.f32 %v1573_v11  ;;  %v1584_v21 = vand.u32 2147483647, %v1573_v11 }
0x19ee   :  { %2421 = vpow2.f32 %v2211_v13 }
0x19ef   :  { %v1587_v23 = vor.u32 1.1754944e-38, %v1586_v16  ;;  %vm1585_vm4 = vcmp.eq.f32.partialorder %v1584_v21, 8.507059e+37 }
0x19f3   :  { %v2420_v12 = vpop.eup %2419 }
0x19f4   :  { %v1576_v15 = vmul.f32 %v2420_v12, %v1573_v11  ;;  %v2422_v18 = vpop.eup %2421  ;;  %vm1581_vm1 = vweird.f32 %v2420_v12 }
0x19f5   :  { %v1574_v19 = vadd.f32 1.0, %v2422_v18  ;;  %vm1582_vm3 = vmor %vm1580_vm2, %vm1581_vm1 }
0x19f6   :  { %v1577_v7 = vsub.f32 1.0, %v1576_v15 }
0x19f7   :  { %2423 = vrcp.f32 %v1574_v19  ;;  %v1601_v33 = vand.u32 2147483648, %v1574_v19  ;;  %vm1595_vm6 = vweird.f32 %v1574_v19  ;;  %v1599_v34 = vand.u32 2147483647, %v1574_v19 }
0x19f8   :  { %v1578_v17 = vmul.f32 %v2420_v12, %v1577_v7 }
0x19f9   :  { %v1602_v38 = vor.u32 1.1754944e-38, %v1601_v33  ;;  %vm1600_vm8 = vcmp.eq.f32.partialorder %v1599_v34, 8.507059e+37 }
0x19fa   :  { %v1579_v20 = vadd.f32 %v2420_v12, %v1578_v17 }
0x19fc   :  { %v1583_v14 = vsel %vm1582_vm3, %v2420_v12, %v1579_v20 }
0x19fd   :  { %v1588_v25 = vsel %vm1585_vm4, %v1587_v23, %v1583_v14  ;;  %v2424_v28 = vpop.eup %2423 }
0x19fe   :  { %v1591_v29 = vmul.f32 %v2424_v28, %v1574_v19  ;;  %vm1596_vm5 = vweird.f32 %v2424_v28  ;;  %v1613_v41 = vmul.f32 %v1609_v46, %v1588_v25 }
0x19ff   :  { %vm1597_vm7 = vmor %vm1595_vm6, %vm1596_vm5 }
0x1a00   :  { %v1592_v30 = vsub.f32 1.0, %v1591_v29 }
0x1a02   :  { %v1593_v31 = vmul.f32 %v2424_v28, %v1592_v30 }
0x1a04   :  { %v1594_v32 = vadd.f32 %v2424_v28, %v1593_v31 }
0x1a06   :  { %v1598_v35 = vsel %vm1597_vm7, %v2424_v28, %v1594_v32 }
0x1a07   :  { %v1603_v40 = vsel %vm1600_vm8, %v1602_v38, %v1598_v35 }
0x1a08   :  { %v1614_v62 = vmul.f32 %v1610_v54, %v1603_v40 }
0x1a43   :  { %v1618_v24 = vpop.permute.xlu2 %1617 }
0x1a44   :  { %v1623_v26 = vmul.f32 %v1618_v24, %v1588_v25 }
0x1a46   :  { %1627 = vrot.lane.b32.xlu1 %v1623_v26, %s2654_s3 }
0x1a5c   :  { %v1620_v39 = vpop.permute.xlu0 %1619 }
0x1a5d   :  { %v1624_v45 = vmul.f32 %v1620_v39, %v1603_v40 }
0x1a5f   :  { %1629 = vrot.lane.b32.xlu2 %v1624_v45, %s2654_s3 }
0x1ab8   :  { %v1628_v43 = vpop.permute.xlu1 %1627 }
0x1ab9   :  { %v1630_v37 = vpop.permute.xlu2 %1629  ;;  %v3061_v58 = vadd.f32 %v1628_v43, %v1613_v41 }
0x1aba   :  { %v3063_v61 = vadd.f32 %v1630_v37, %v1614_v62 }
0x1abb   :  { %2425 = vtanh.f32 %v3061_v58  ;;  %v1733_v45 = vrot.slane %v3061_v58, 7 }
0x1abc   :  { %2427 = vtanh.f32 %v3063_v61  ;;  %v1734_v43 = vrot.slane %v3063_v61, 7 }
0x1ac1   :  { %v2426_v44 = vpop.eup %2425 }
0x1ac2   :  { %v2428_v53 = vpop.eup %2427  ;;  %1639 = vrot.lane.b32.xlu0 %v2426_v44, %s2653_s25 }
0x1ac3   :  { %1641 = vrot.lane.b32.xlu1 %v2428_v53, %s2653_s25 }
0x1b34   :  { %v1640_v42 = vpop.permute.xlu0 %1639 }
0x1b35   :  { %v1642_v57 = vpop.permute.xlu1 %1641  ;;  %v3069_v63 = vmul.f32 %v1640_v42, %v1588_v25 }
0x1b36   :  { %v3071_v0 = vmul.f32 %v1642_v57, %v1603_v40 }
0x1b37   :  { %v1657_v2 = vrot.slane %v3069_v63, 3 }
0x1b38   :  { %v1658_v59 = vrot.slane %v3071_v0, 2 }
0x1b3a   :  { %v1659_v36 = vsel %vm263_vm9, %v1658_v59, %v1657_v2 }
0x1b3b   :  { %1660 = vrot.lane.b32.xlu2 %v1659_v36, %s2654_s3 }
0x1b95   :  { %v1661_v60 = vpop.permute.xlu2 %1660 }
0x1b96   :  { %2212 = vmatmul.msk.f32.vlgmr.msrb.gmra.mxu0 %vm147_vm10, %v1661_v60 }
0x1c13   :  { %v1681_v55 = vpop.f32.mrf.mxu0 }
0x1c14   :  { %v1685_v49 = vrot.slane %v1681_v55, 4  ;;  %v1686_v48 = vrot.slane %v1681_v55, 5 }
0x1c16   :  { %v1689_v51 = vadd.f32 %v1685_v49, %v2976_v22  ;;  %v1690_v1 = vadd.f32 %v1686_v48, %v2980_v27 }
0x1c18   :  { %2429 = vtanh.f32 %v1689_v51  ;;  %v2213_v6 = vmul.f32 -1.442695, %v1689_v51  ;;  %v2214_v9 = vmul.f32 -1.442695, %v1690_v1 }
0x1c19   :  { %2431 = vtanh.f32 %v1690_v1 }
0x1c1a   :  { %2433 = vpow2.f32 %v2213_v6 }
0x1c1b   :  { %2435 = vpow2.f32 %v2214_v9 }
0x1c1e   :  { %v2430_v4 = vpop.eup %2429 }
0x1c1f   :  { %v2432_v5 = vpop.eup %2431  ;;  %1741 = vrot.lane.b32.xlu0 %v2430_v4, %s2653_s25 }
0x1c20   :  { %1743 = vrot.lane.b32.xlu1 %v2432_v5, %s2653_s25  ;;  %v2434_v10 = vpop.eup %2433 }
0x1c21   :  { %v2436_v11 = vpop.eup %2435  ;;  %v1697_v12 = vadd.f32 1.0, %v2434_v10 }
0x1c22   :  { %v1698_v13 = vadd.f32 1.0, %v2436_v11 }
0x1c23   :  { %2437 = vrcp.f32 %v1697_v12  ;;  %v1710_v24 = vand.u32 2147483648, %v1697_v12  ;;  %vm1704_vm3 = vweird.f32 %v1697_v12  ;;  %v1708_v26 = vand.u32 2147483647, %v1697_v12 }
0x1c24   :  { %2439 = vrcp.f32 %v1698_v13  ;;  %v1725_v25 = vand.u32 2147483648, %v1698_v13  ;;  %vm1719_vm4 = vweird.f32 %v1698_v13  ;;  %v1723_v28 = vand.u32 2147483647, %v1698_v13 }
0x1c25   :  { %v1711_v31 = vor.u32 1.1754944e-38, %v1710_v24  ;;  %vm1709_vm7 = vcmp.eq.f32.partialorder %v1708_v26, 8.507059e+37 }
0x1c26   :  { %v1726_v32 = vor.u32 1.1754944e-38, %v1725_v25  ;;  %vm1724_vm8 = vcmp.eq.f32.partialorder %v1723_v28, 8.507059e+37 }
0x1c29   :  { %v2438_v15 = vpop.eup %2437 }
0x1c2a   :  { %v2440_v7 = vpop.eup %2439  ;;  %v1700_v17 = vmul.f32 %v2438_v15, %v1697_v12  ;;  %vm1705_vm1 = vweird.f32 %v2438_v15 }
0x1c2b   :  { %v1715_v18 = vmul.f32 %v2440_v7, %v1698_v13  ;;  %vm1720_vm2 = vweird.f32 %v2440_v7  ;;  %vm1706_vm5 = vmor %vm1704_vm3, %vm1705_vm1 }
0x1c2c   :  { %v1701_v19 = vsub.f32 1.0, %v1700_v17  ;;  %vm1721_vm6 = vmor %vm1719_vm4, %vm1720_vm2 }
0x1c2d   :  { %v1716_v20 = vsub.f32 1.0, %v1715_v18 }
0x1c2e   :  { %v1702_v16 = vmul.f32 %v2438_v15, %v1701_v19 }
0x1c2f   :  { %v1717_v21 = vmul.f32 %v2440_v7, %v1716_v20 }
0x1c30   :  { %v1703_v14 = vadd.f32 %v2438_v15, %v1702_v16 }
0x1c31   :  { %v1718_v23 = vadd.f32 %v2440_v7, %v1717_v21 }
0x1c32   :  { %v1707_v29 = vsel %vm1706_vm5, %v2438_v15, %v1703_v14 }
0x1c33   :  { %v1722_v30 = vsel %vm1721_vm6, %v2440_v7, %v1718_v23  ;;  %v1712_v34 = vsel %vm1709_vm7, %v1711_v31, %v1707_v29 }
0x1c34   :  { %v1727_v38 = vsel %vm1724_vm8, %v1726_v32, %v1722_v30  ;;  %v1737_v46 = vmul.f32 %v1733_v45, %v1712_v34 }
0x1c35   :  { %v1738_v37 = vmul.f32 %v1734_v43, %v1727_v38 }
0x1c91   :  { %v1742_v33 = vpop.permute.xlu0 %1741 }
0x1c92   :  { %v1744_v35 = vpop.permute.xlu1 %1743  ;;  %v1747_v39 = vmul.f32 %v1742_v33, %v1712_v34 }
0x1c93   :  { %v1748_v40 = vmul.f32 %v1744_v35, %v1727_v38 }
0x1c94   :  { %1751 = vrot.lane.b32.xlu2 %v1747_v39, %s2654_s3 }
0x1c95   :  { %1753 = vrot.lane.b32.xlu0 %v1748_v40, %s2654_s3 }
0x1cee   :  { %v1752_v54 = vpop.permute.xlu2 %1751 }
0x1cef   :  { %v3085_v41 = vadd.f32 %v1752_v54, %v1737_v46 }
0x1cf1   :  { %2441 = vtanh.f32 %v3085_v41 }
0x1cf7   :  { %v2442_v62 = vpop.eup %2441 }
0x1cf8   :  { %1763 = vrot.lane.b32.xlu1 %v2442_v62, %s2653_s25 }
0x1d07   :  { %v1754_v44 = vpop.permute.xlu0 %1753 }
0x1d08   :  { %v3090_v53 = vadd.f32 %v1754_v44, %v1738_v37  ;;  %v1857_v44 = vrot.slane %v3085_v41, 7 }
0x1d0a   :  { %2443 = vtanh.f32 %v3090_v53  ;;  %v1858_v46 = vrot.slane %v3090_v53, 7 }
0x1d10   :  { %v2444_v42 = vpop.eup %2443 }
0x1d11   :  { %1765 = vrot.lane.b32.xlu2 %v2444_v42, %s2653_s25 }
0x1d6a   :  { %v1764_v58 = vpop.permute.xlu1 %1763 }
0x1d6b   :  { %v1766_v57 = vpop.permute.xlu2 %1765  ;;  %v3094_v2 = vmul.f32 %v1764_v58, %v1712_v34 }
0x1d6c   :  { %v3096_v59 = vmul.f32 %v1766_v57, %v1727_v38 }
0x1d6d   :  { %v1781_v36 = vrot.slane %v3094_v2, 4 }
0x1d6e   :  { %v1782_v60 = vrot.slane %v3096_v59, 3 }
0x1d70   :  { %v1783_v61 = vsel %vm263_vm9, %v1782_v60, %v1781_v36 }
0x1d71   :  { %1784 = vrot.lane.b32.xlu0 %v1783_v61, %s2654_s3 }
0x1de3   :  { %v1785_v55 = vpop.permute.xlu0 %1784 }
0x1de4   :  { %2215 = vmatmul.msk.f32.vlgmr.msra.gmra.mxu1 %vm147_vm10, %v1785_v55 }
0x1e61   :  { %v1805_v49 = vpop.f32.mrf.mxu1 }
0x1e62   :  { %v1809_v48 = vrot.slane %v1805_v49, 3  ;;  %v1810_v51 = vrot.slane %v1805_v49, 4 }
0x1e64   :  { %v1813_v1 = vadd.f32 %v1809_v48, %v2976_v22  ;;  %v1814_v4 = vadd.f32 %v1810_v51, %v2980_v27 }
0x1e66   :  { %2445 = vtanh.f32 %v1813_v1  ;;  %v2217_v9 = vmul.f32 -1.442695, %v1814_v4  ;;  %v2216_v13 = vmul.f32 -1.442695, %v1813_v1 }
0x1e67   :  { %2447 = vtanh.f32 %v1814_v4 }
0x1e68   :  { %2449 = vpow2.f32 %v2217_v9 }
0x1e6c   :  { %v2446_v5 = vpop.eup %2445 }
0x1e6d   :  { %v2448_v6 = vpop.eup %2447  ;;  %1865 = vrot.lane.b32.xlu1 %v2446_v5, %s2653_s25 }
0x1e6e   :  { %1867 = vrot.lane.b32.xlu2 %v2448_v6, %s2653_s25  ;;  %v2450_v10 = vpop.eup %2449 }
0x1e6f   :  { %v1822_v11 = vadd.f32 1.0, %v2450_v10 }
0x1e71   :  { %2451 = vrcp.f32 %v1822_v11  ;;  %v1849_v16 = vand.u32 2147483648, %v1822_v11  ;;  %vm1843_vm2 = vweird.f32 %v1822_v11  ;;  %v1847_v21 = vand.u32 2147483647, %v1822_v11 }
0x1e72   :  { %2453 = vpow2.f32 %v2216_v13 }
0x1e73   :  { %v1850_v23 = vor.u32 1.1754944e-38, %v1849_v16  ;;  %vm1848_vm4 = vcmp.eq.f32.partialorder %v1847_v21, 8.507059e+37 }
0x1e77   :  { %v2452_v12 = vpop.eup %2451 }
0x1e78   :  { %v1839_v15 = vmul.f32 %v2452_v12, %v1822_v11  ;;  %v2454_v17 = vpop.eup %2453  ;;  %vm1844_vm1 = vweird.f32 %v2452_v12 }
0x1e79   :  { %v1821_v19 = vadd.f32 1.0, %v2454_v17  ;;  %vm1845_vm3 = vmor %vm1843_vm2, %vm1844_vm1 }
0x1e7a   :  { %v1840_v7 = vsub.f32 1.0, %v1839_v15 }
0x1e7b   :  { %2455 = vrcp.f32 %v1821_v19  ;;  %v1834_v33 = vand.u32 2147483648, %v1821_v19  ;;  %vm1828_vm6 = vweird.f32 %v1821_v19  ;;  %v1832_v34 = vand.u32 2147483647, %v1821_v19 }
0x1e7c   :  { %v1841_v18 = vmul.f32 %v2452_v12, %v1840_v7 }
0x1e7d   :  { %v1835_v38 = vor.u32 1.1754944e-38, %v1834_v33  ;;  %vm1833_vm8 = vcmp.eq.f32.partialorder %v1832_v34, 8.507059e+37 }
0x1e7e   :  { %v1842_v20 = vadd.f32 %v2452_v12, %v1841_v18 }
0x1e80   :  { %v1846_v14 = vsel %vm1845_vm3, %v2452_v12, %v1842_v20 }
0x1e81   :  { %v1851_v25 = vsel %vm1848_vm4, %v1850_v23, %v1846_v14  ;;  %v2456_v26 = vpop.eup %2455 }
0x1e82   :  { %v1824_v29 = vmul.f32 %v2456_v26, %v1821_v19  ;;  %vm1829_vm5 = vweird.f32 %v2456_v26  ;;  %v1862_v54 = vmul.f32 %v1858_v46, %v1851_v25 }
0x1e83   :  { %vm1830_vm7 = vmor %vm1828_vm6, %vm1829_vm5 }
0x1e84   :  { %v1825_v30 = vsub.f32 1.0, %v1824_v29 }
0x1e86   :  { %v1826_v31 = vmul.f32 %v2456_v26, %v1825_v30 }
0x1e88   :  { %v1827_v32 = vadd.f32 %v2456_v26, %v1826_v31 }
0x1e8a   :  { %v1831_v35 = vsel %vm1830_vm7, %v2456_v26, %v1827_v32 }
0x1e8b   :  { %v1836_v40 = vsel %vm1833_vm8, %v1835_v38, %v1831_v35 }
0x1e8c   :  { %v1861_v42 = vmul.f32 %v1857_v44, %v1836_v40 }
0x1ec8   :  { %v1868_v24 = vpop.permute.xlu2 %1867 }
0x1ec9   :  { %v1872_v28 = vmul.f32 %v1868_v24, %v1851_v25 }
0x1ecb   :  { %1877 = vrot.lane.b32.xlu1 %v1872_v28, %s2654_s3 }
0x1edf   :  { %v1866_v39 = vpop.permute.xlu1 %1865 }
0x1ee0   :  { %v1871_v45 = vmul.f32 %v1866_v39, %v1836_v40 }
0x1ee2   :  { %1875 = vrot.lane.b32.xlu0 %v1871_v45, %s2654_s3 }
0x1f3d   :  { %v1878_v62 = vpop.permute.xlu1 %1877 }
0x1f3e   :  { %v3110_v43 = vadd.f32 %v1878_v62, %v1862_v54 }
0x1f40   :  { %2457 = vtanh.f32 %v3110_v43  ;;  %v1982_v44 = vrot.slane %v3110_v43, 7 }
0x1f46   :  { %v2458_v37 = vpop.eup %2457 }
0x1f47   :  { %1889 = vrot.lane.b32.xlu0 %v2458_v37, %s2653_s25 }
0x1f54   :  { %v1876_v58 = vpop.permute.xlu0 %1875 }
0x1f55   :  { %v3115_v57 = vadd.f32 %v1876_v58, %v1861_v42 }
0x1f57   :  { %2459 = vtanh.f32 %v3115_v57  ;;  %v1981_v37 = vrot.slane %v3115_v57, 7 }
0x1f5d   :  { %v2460_v36 = vpop.eup %2459 }
0x1f5e   :  { %1887 = vrot.lane.b32.xlu2 %v2460_v36, %s2653_s25 }
0x1fb8   :  { %v1888_v53 = vpop.permute.xlu2 %1887 }
0x1fb9   :  { %v1890_v60 = vpop.permute.xlu0 %1889  ;;  %v3119_v61 = vmul.f32 %v1888_v53, %v1836_v40 }
0x1fba   :  { %v3121_v55 = vmul.f32 %v1890_v60, %v1851_v25 }
0x1fbb   :  { %v1905_v49 = vrot.slane %v3119_v61, 5 }
0x1fbc   :  { %v1906_v48 = vrot.slane %v3121_v55, 4 }
0x1fbe   :  { %v1907_v41 = vsel %vm263_vm9, %v1906_v48, %v1905_v49 }
0x1fbf   :  { %1908 = vrot.lane.b32.xlu1 %v1907_v41, %s2654_s3 }
0x2031   :  { %v1909_v51 = vpop.permute.xlu1 %1908 }
0x2032   :  { %2218 = vmatmul.msk.f32.vlgmr.msrb.gmra.mxu2 %vm147_vm10, %v1909_v51 }
0x20b5   :  { %v1929_v1 = vpop.f32.mrf.mxu2 }
0x20b6   :  { %v1933_v4 = vrot.slane %v1929_v1, 2  ;;  %v1934_v5 = vrot.slane %v1929_v1, 3 }
0x20b8   :  { %v1937_v6 = vadd.f32 %v1933_v4, %v2976_v22  ;;  %v1938_v9 = vadd.f32 %v1934_v5, %v2980_v27 }
0x20ba   :  { %2461 = vtanh.f32 %v1937_v6  ;;  %v2219_v12 = vmul.f32 -1.442695, %v1937_v6  ;;  %v2220_v17 = vmul.f32 -1.442695, %v1938_v9 }
0x20bb   :  { %2463 = vtanh.f32 %v1938_v9 }
0x20bc   :  { %2465 = vpow2.f32 %v2219_v12 }
0x20c0   :  { %v2462_v10 = vpop.eup %2461 }
0x20c1   :  { %v2464_v11 = vpop.eup %2463  ;;  %1989 = vrot.lane.b32.xlu2 %v2462_v10, %s2653_s25 }
0x20c2   :  { %1991 = vrot.lane.b32.xlu0 %v2464_v11, %s2653_s25  ;;  %v2466_v13 = vpop.eup %2465 }
0x20c3   :  { %v1945_v15 = vadd.f32 1.0, %v2466_v13 }
0x20c5   :  { %2467 = vrcp.f32 %v1945_v15  ;;  %v1958_v23 = vand.u32 2147483648, %v1945_v15  ;;  %vm1952_vm2 = vweird.f32 %v1945_v15  ;;  %v1956_v24 = vand.u32 2147483647, %v1945_v15 }
0x20c6   :  { %2469 = vpow2.f32 %v2220_v17 }
0x20c7   :  { %v1959_v26 = vor.u32 1.1754944e-38, %v1958_v23  ;;  %vm1957_vm4 = vcmp.eq.f32.partialorder %v1956_v24, 8.507059e+37 }
0x20cb   :  { %v2468_v7 = vpop.eup %2467 }
0x20cc   :  { %v1948_v18 = vmul.f32 %v2468_v7, %v1945_v15  ;;  %v2470_v16 = vpop.eup %2469  ;;  %vm1953_vm1 = vweird.f32 %v2468_v7 }
0x20cd   :  { %v1946_v21 = vadd.f32 1.0, %v2470_v16  ;;  %vm1954_vm3 = vmor %vm1952_vm2, %vm1953_vm1 }
0x20ce   :  { %v1949_v19 = vsub.f32 1.0, %v1948_v18 }
0x20cf   :  { %2471 = vrcp.f32 %v1946_v21  ;;  %v1973_v38 = vand.u32 2147483648, %v1946_v21  ;;  %vm1967_vm6 = vweird.f32 %v1946_v21  ;;  %v1971_v39 = vand.u32 2147483647, %v1946_v21 }
0x20d0   :  { %v1950_v20 = vmul.f32 %v2468_v7, %v1949_v19 }
0x20d1   :  { %v1974_v45 = vor.u32 1.1754944e-38, %v1973_v38  ;;  %vm1972_vm8 = vcmp.eq.f32.partialorder %v1971_v39, 8.507059e+37 }
0x20d2   :  { %v1951_v14 = vadd.f32 %v2468_v7, %v1950_v20 }
0x20d4   :  { %v1955_v25 = vsel %vm1954_vm3, %v2468_v7, %v1951_v14 }
0x20d5   :  { %v1960_v29 = vsel %vm1957_vm4, %v1959_v26, %v1955_v25  ;;  %v2472_v31 = vpop.eup %2471 }
0x20d6   :  { %v1963_v32 = vmul.f32 %v2472_v31, %v1946_v21  ;;  %vm1968_vm5 = vweird.f32 %v2472_v31  ;;  %v1985_v42 = vmul.f32 %v1981_v37, %v1960_v29 }
0x20d7   :  { %vm1969_vm7 = vmor %vm1967_vm6, %vm1968_vm5 }
0x20d8   :  { %v1964_v33 = vsub.f32 1.0, %v1963_v32 }
0x20da   :  { %v1965_v34 = vmul.f32 %v2472_v31, %v1964_v33 }
0x20dc   :  { %v1966_v35 = vadd.f32 %v2472_v31, %v1965_v34 }
0x20de   :  { %v1970_v40 = vsel %vm1969_vm7, %v2472_v31, %v1966_v35  ;;  %vm3225_vm7 = vcmask 259077  }
0x20df   :  { %v1975_v54 = vsel %vm1972_vm8, %v1974_v45, %v1970_v40  ;;  %vm3226_vm8 = vmmov %vm3225_vm7 }
0x20e0   :  { %v1986_v58 = vmul.f32 %v1982_v44, %v1975_v54 }
0x211b   :  { %v1990_v28 = vpop.permute.xlu2 %1989 }
0x211c   :  { %v1995_v30 = vmul.f32 %v1990_v28, %v1960_v29 }
0x211e   :  { %1999 = vrot.lane.b32.xlu1 %v1995_v30, %s2654_s3 }
0x2134   :  { %v1992_v46 = vpop.permute.xlu0 %1991 }
0x2135   :  { %v1996_v62 = vmul.f32 %v1992_v46, %v1975_v54 }
0x2137   :  { %2001 = vrot.lane.b32.xlu2 %v1996_v62, %s2654_s3 }
0x2190   :  { %v2000_v36 = vpop.permute.xlu1 %1999 }
0x2191   :  { %v2002_v53 = vpop.permute.xlu2 %2001  ;;  %v3136_v60 = vadd.f32 %v2000_v36, %v1985_v42 }
0x2192   :  { %v3138_v49 = vadd.f32 %v2002_v53, %v1986_v58 }
0x2193   :  { %2473 = vtanh.f32 %v3136_v60  ;;  %v2105_v58 = vrot.slane %v3136_v60, 7 }
0x2194   :  { %2475 = vtanh.f32 %v3138_v49 }
0x2199   :  { %v2474_v48 = vpop.eup %2473 }
0x219a   :  { %v2476_v41 = vpop.eup %2475  ;;  %2011 = vrot.lane.b32.xlu0 %v2474_v48, %s2653_s25 }
0x219b   :  { %2013 = vrot.lane.b32.xlu1 %v2476_v41, %s2653_s25 }
0x220c   :  { %v2012_v57 = vpop.permute.xlu0 %2011 }
0x220d   :  { %v2014_v43 = vpop.permute.xlu1 %2013  ;;  %v3144_v51 = vmul.f32 %v2012_v57, %v1960_v29 }
0x220e   :  { %v3146_v1 = vmul.f32 %v2014_v43, %v1975_v54 }
0x220f   :  { %v2029_v4 = vrot.slane %v3144_v51, 6 }
0x2210   :  { %v2030_v5 = vrot.slane %v3146_v1, 5 }
0x2212   :  { %v2031_v6 = vsel %vm263_vm9, %v2030_v5, %v2029_v4 }
0x2213   :  { %2032 = vrot.lane.b32.xlu2 %v2031_v6, %s2654_s3 }
0x226d   :  { %v2033_v9 = vpop.permute.xlu2 %2032 }
0x226e   :  { %2221 = vmatmul.msk.f32.vlgmr.msra.gmra.mxu3 %vm147_vm10, %v2033_v9 }
0x22f1   :  { %v2053_v10 = vpop.f32.mrf.mxu3 }
0x22f2   :  { %v2057_v11 = vrot.slane %v2053_v10, 1  ;;  %v2058_v12 = vrot.slane %v2053_v10, 2 }
0x22f4   :  { %v2061_v13 = vadd.f32 %v2057_v11, %v2976_v22  ;;  %v2062_v15 = vadd.f32 %v2058_v12, %v2980_v27 }
0x22f6   :  { %2477 = vtanh.f32 %v2061_v13  ;;  %v2222_v18 = vmul.f32 -1.442695, %v2061_v13  ;;  %v2223_v19 = vmul.f32 -1.442695, %v2062_v15 }
0x22f7   :  { %2479 = vtanh.f32 %v2062_v15 }
0x22f8   :  { %2481 = vpow2.f32 %v2222_v18 }
0x22f9   :  { %2483 = vpow2.f32 %v2223_v19 }
0x22fc   :  { %v2478_v7 = vpop.eup %2477 }
0x22fd   :  { %v2480_v17 = vpop.eup %2479  ;;  %2113 = vrot.lane.b32.xlu0 %v2478_v7, %s2653_s25 }
0x22fe   :  { %2115 = vrot.lane.b32.xlu1 %v2480_v17, %s2653_s25  ;;  %v2482_v20 = vpop.eup %2481 }
0x22ff   :  { %v2484_v16 = vpop.eup %2483  ;;  %v2069_v21 = vadd.f32 1.0, %v2482_v20 }
0x2300   :  { %v2070_v14 = vadd.f32 1.0, %v2484_v16 }
0x2301   :  { %2485 = vrcp.f32 %v2069_v21  ;;  %v2082_v32 = vand.u32 2147483648, %v2069_v21  ;;  %vm2076_vm1 = vweird.f32 %v2069_v21  ;;  %v2080_v34 = vand.u32 2147483647, %v2069_v21 }
0x2302   :  { %2487 = vrcp.f32 %v2070_v14  ;;  %v2097_v33 = vand.u32 2147483648, %v2070_v14  ;;  %vm2091_vm2 = vweird.f32 %v2070_v14  ;;  %v2095_v35 = vand.u32 2147483647, %v2070_v14 }
0x2303   :  { %v2083_v40 = vor.u32 1.1754944e-38, %v2082_v32  ;;  %vm2081_vm5 = vcmp.eq.f32.partialorder %v2080_v34, 8.507059e+37 }
0x2304   :  { %v2098_v45 = vor.u32 1.1754944e-38, %v2097_v33  ;;  %vm2096_vm6 = vcmp.eq.f32.partialorder %v2095_v35, 8.507059e+37 }
0x2307   :  { %v2486_v22 = vpop.eup %2485 }
0x2308   :  { %v2488_v27 = vpop.eup %2487  ;;  %v2072_v23 = vmul.f32 %v2486_v22, %v2069_v21  ;;  %vm2077_vm9 = vweird.f32 %v2486_v22 }
0x2309   :  { %v2087_v24 = vmul.f32 %v2488_v27, %v2070_v14  ;;  %vm2092_vm10 = vweird.f32 %v2488_v27  ;;  %vm2078_vm3 = vmor %vm2076_vm1, %vm2077_vm9 }
0x230a   :  { %v2073_v25 = vsub.f32 1.0, %v2072_v23  ;;  %vm2093_vm4 = vmor %vm2091_vm2, %vm2092_vm10 }
0x230b   :  { %v2088_v26 = vsub.f32 1.0, %v2087_v24 }
0x230c   :  { %v2074_v28 = vmul.f32 %v2486_v22, %v2073_v25 }
0x230d   :  { %v2089_v29 = vmul.f32 %v2488_v27, %v2088_v26 }
0x230e   :  { %v2075_v30 = vadd.f32 %v2486_v22, %v2074_v28 }
0x230f   :  { %v2090_v31 = vadd.f32 %v2488_v27, %v2089_v29 }
0x2310   :  { %v2079_v38 = vsel %vm2078_vm3, %v2486_v22, %v2075_v30 }
0x2311   :  { %v2094_v39 = vsel %vm2093_vm4, %v2488_v27, %v2090_v31  ;;  %v2084_v54 = vsel %vm2081_vm5, %v2083_v40, %v2079_v38 }
0x2312   :  { %v2099_v37 = vsel %vm2096_vm6, %v2098_v45, %v2094_v39  ;;  %v2109_v36 = vmul.f32 %v2105_v58, %v2084_v54 }
0x236f   :  { %v2114_v46 = vpop.permute.xlu0 %2113 }
0x2370   :  { %v2116_v62 = vpop.permute.xlu1 %2115  ;;  %v2119_v44 = vmul.f32 %v2114_v46, %v2084_v54 }
0x2371   :  { %v2120_v42 = vmul.f32 %v2116_v62, %v2099_v37 }
0x2372   :  { %2123 = vrot.lane.b32.xlu2 %v2119_v44, %s2654_s3 }
0x2373   :  { %2125 = vrot.lane.b32.xlu0 %v2120_v42, %s2654_s3 }
0x237b   :  { %1280 = vrot.lane.b32.xlu0 %v2996_v8, %s2654_s3  ;;  %v2106_v8 = vrot.slane %v3138_v49, 7 }
0x2383   :  { %1404 = vrot.lane.b32.xlu0 %v3021_v52, %s2654_s3  ;;  %v2110_v52 = vmul.f32 %v2106_v8, %v2099_v37 }
0x238b   :  { %1649 = vrot.lane.b32.xlu0 %v3069_v63, %s2654_s3 }
0x2393   :  { %1775 = vrot.lane.b32.xlu0 %v3096_v59, %s2654_s3 }
0x239b   :  { %2021 = vrot.lane.b32.xlu0 %v3144_v51, %s2654_s3 }
0x23cc   :  { %v2124_v53 = vpop.permute.xlu2 %2123 }
0x23cd   :  { %v2129_v48 = vadd.f32 %v2124_v53, %v2109_v36 }
0x23cf   :  { %2489 = vtanh.f32 %v2129_v48 }
0x23d5   :  { %v2490_v41 = vpop.eup %2489 }
0x23d6   :  { %2135 = vrot.lane.b32.xlu1 %v2490_v41, %s2653_s25 }
0x23de   :  { %1282 = vrot.lane.b32.xlu1 %v2994_v56, %s2654_s3 }
0x23e5   :  { %v2126_v63 = vpop.permute.xlu0 %2125 }
0x23e6   :  { %v2130_v59 = vadd.f32 %v2126_v63, %v2110_v52  ;;  %1525 = vrot.lane.b32.xlu1 %v3044_v3, %s2654_s3 }
0x23e8   :  { %2491 = vtanh.f32 %v2130_v59 }
0x23ed   :  { %v1281_v60 = vpop.permute.xlu0 %1280 }
0x23ee   :  { %v2492_v57 = vpop.eup %2491  ;;  %1286 = vst.msk [vmem:[#allocation12] sm:$0x1] %vm259_vm11, %v1281_v60  ;;  %1651 = vrot.lane.b32.xlu1 %v3071_v0, %s2654_s3 }
0x23ef   :  { %2137 = vrot.lane.b32.xlu2 %v2492_v57, %s2653_s25 }
0x23f5   :  { %v1405_v43 = vpop.permute.xlu0 %1404 }
0x23f6   :  { %1409 = vst.msk [vmem:[#allocation12 + $0x8] sm:$0x2] %vm383_vm14, %v1405_v43  ;;  %1897 = vrot.lane.b32.xlu1 %v3119_v61, %s2654_s3 }
0x23f7   :  { %1402 = vrot.lane.b32.xlu2 %v3019_v50, %s2654_s3 }
0x23fd   :  { %v1650_v56 = vpop.permute.xlu0 %1649 }
0x23fe   :  { %1655 = vst.msk [vmem:[#allocation12] sm:$0x8] %vm632_vm12, %v1650_v56  ;;  %2023 = vrot.lane.b32.xlu1 %v3146_v1, %s2654_s3 }
0x23ff   :  { %1527 = vrot.lane.b32.xlu2 %v3046_v47, %s2654_s3 }
0x2405   :  { %v1776_v3 = vpop.permute.xlu0 %1775 }
0x2406   :  { %1780 = vst.msk [vmem:[#allocation12 + $0x8] sm:$0x10] %vm757_vm15, %v1776_v3 }
0x2407   :  { %1773 = vrot.lane.b32.xlu2 %v3094_v2, %s2654_s3 }
0x240d   :  { %v2022_v0 = vpop.permute.xlu0 %2021 }
0x240e   :  { %2027 = vst.msk [vmem:[#allocation12] sm:$0x40] %vm1007_vm13, %v2022_v0 }
0x240f   :  { %1899 = vrot.lane.b32.xlu2 %v3121_v55, %s2654_s3 }
0x2448   :  { %v2136_v50 = vpop.permute.xlu1 %2135 }
0x2449   :  { %v2138_v61 = vpop.permute.xlu2 %2137  ;;  %v2141_v49 = vmul.f32 %v2136_v50, %v2084_v54 }
0x244a   :  { %v2142_v51 = vmul.f32 %v2138_v61, %v2099_v37 }
0x244b   :  { %2145 = vrot.lane.b32.xlu2 %v2141_v49, %s2654_s3 }
0x244c   :  { %2147 = vrot.lane.b32.xlu0 %v2142_v51, %s2654_s3 }
0x2450   :  { %v1283_v47 = vpop.permute.xlu1 %1282 }
0x2451   :  { %v1403_v1 = vpop.permute.xlu2 %1402  ;;  %1287 = vst.msk [vmem:[#allocation12 + $0x8] sm:$0x1] %vm259_vm11, %v1283_v47  ;;  %vm3227_vm11 = vcmask 261127  }
0x2452   :  { %1408 = vst.msk [vmem:[#allocation12] sm:$0x2] %vm383_vm14, %v1403_v1 }
0x2458   :  { %v1526_v2 = vpop.permute.xlu1 %1525 }
0x2459   :  { %v1528_v4 = vpop.permute.xlu2 %1527  ;;  %1531 = vst.msk [vmem:[#allocation12] sm:$0x4] %vm507_vm0, %v1526_v2 }
0x245a   :  { %1532 = vst.msk [vmem:[#allocation12 + $0x8] sm:$0x4] %vm507_vm0, %v1528_v4 }
0x2460   :  { %v1652_v55 = vpop.permute.xlu1 %1651 }
0x2461   :  { %v1774_v5 = vpop.permute.xlu2 %1773  ;;  %1656 = vst.msk [vmem:[#allocation12 + $0x8] sm:$0x8] %vm632_vm12, %v1652_v55  ;;  %vm3228_vm12 = vmmov %vm3227_vm11 }
0x2462   :  { %1779 = vst.msk [vmem:[#allocation12] sm:$0x10] %vm757_vm15, %v1774_v5 }
0x2468   :  { %v1898_v6 = vpop.permute.xlu1 %1897 }
0x2469   :  { %v1900_v9 = vpop.permute.xlu2 %1899  ;;  %1903 = vst.msk [vmem:[#allocation12] sm:$0x20] %vm3225_vm7, %v1898_v6 }
0x246a   :  { %1904 = vst.msk [vmem:[#allocation12 + $0x8] sm:$0x20] %vm3226_vm8, %v1900_v9 }
0x2470   :  { %v2024_v10 = vpop.permute.xlu1 %2023 }
0x2471   :  { %2028 = vst.msk [vmem:[#allocation12 + $0x8] sm:$0x40] %vm1007_vm13, %v2024_v10 }
0x24a5   :  { %v2146_v11 = vpop.permute.xlu2 %2145 }
0x24a6   :  { %2151 = vst.msk [vmem:[#allocation12] sm:$0x80] %vm3227_vm11, %v2146_v11 }
0x24be   :  { %v2148_v12 = vpop.permute.xlu0 %2147 }
0x24bf   :  { %2152 = vst.msk [vmem:[#allocation12 + $0x8] sm:$0x80] %vm3228_vm12, %v2148_v12 }
0x24c0   :  { %2165 = dma.vmem_to_hbm [thread:$0]  %s2158_s28, 256, %s2160_s8, [#allocation5], %s2646_s9, %s2646_s9, %s2647_s10  }
0x24c1   :  { %2643 = dma.done.wait [#allocation5], 256  }
0x24c2   :  { %2644 = vsyncadd [#allocation5], 4294967040 }
0x24c3   :  { %2170 = vsyncpa [#allocation4], 1 }
0x24c4   :  { %2171 = vsyncpa [#allocation7], 1 }
0x24c5   :  { %2172 = vsyncpa [#allocation10], 1 }
0x24c6   :  { %2173 = vsyncpa [#allocation5], 1 }

</bundles_post_ra>
